<compile_context>
chip_gen: v7x
topology: tpu7x:2x2x1
jax: 0.10.0
libtpu: 0.0.40
codegen_flags: <defaults>
</compile_context>

<pallas_src>
import numpy as np
import jax
import jax.numpy as jnp
from jax import lax
from jax.experimental import pallas as pl
from jax.experimental.pallas import tpu as pltpu

# ---- scaled-down constants (structure identical to the PyTorch module) -----
ACTION_DIM = 2
MAP_SIZE = 32            # 550 in the module; scaled so MAP_SIZE // 16 == 2
C1, C2 = 32, 16          # conv channel counts, as in the module
MAP_FEATURE_DIM = 32     # 128 in the module
POSE_DIM = 3
LIDAR_DIM = 8
GOAL_DIM = 2
AUX_DIM = POSE_DIM + LIDAR_DIM + GOAL_DIM                       # 13
STATE_DIM = MAP_FEATURE_DIM + AUX_DIM                           # 45
H1, H2, H3 = 64, 32, 16  # FC hidden sizes (256, 128, 64 in the module)
LOG_SIG_MIN = -20.0
LOG_SIG_MAX = 2.0

POOL1 = MAP_SIZE // 4    # pooled spatial after conv1+pool      (8)
POOL2 = MAP_SIZE // 16   # pooled spatial after conv2+pool      (2)
FLAT_DIM = C2 * POOL2 * POOL2                                   # 64
BATCH_PAD = 8            # pad batch to one sublane group
AUX_PAD = 16             # aux (13) zero-padded so fc1's split dot has clean K
K1_PAD = 16              # conv1 im2col K: 9 taps + 1 ones/valid col + 6 zeros

# packed weight blob layout (rows; 64 lanes, all offsets multiples of 16)
W_COLS = 64
OFF_W1 = 0                               # (16, 32)  row 9 = conv1 bias
OFF_W2 = OFF_W1 + K1_PAD                 # (288, 16)
OFF_WM = OFF_W2 + 9 * C1                 # (64, 32)
OFF_W1A = OFF_WM + FLAT_DIM              # (32, 64)
OFF_W1B = OFF_W1A + MAP_FEATURE_DIM      # (16, 64)
OFF_WF2 = OFF_W1B + AUX_PAD              # (64, 32)
OFF_WF3 = OFF_WF2 + H1                   # (32, 16)
OFF_WH = OFF_WF3 + H2                    # (16, 4)
W_ROWS = OFF_WH + H3                     # 528


# ------------------ host-side im2col index tables (numpy, static) -----------
def _build_im2col_indices():
    """Row-group order (per batch element):
         (ph1, pw1, dh2, dw2, ph2, pw2, i2, j2)  ->  576 groups.
    Returns tap indices (576, 9) into the (5,1)-over-padded map and a validity
    flag (576,) that is 0 where the conv2 window reads its zero padding.
    The extra 4 rows/cols of left padding make all out-of-range conv2-halo
    reads land on real zeros, so invalid rows are exactly zero."""
    n = 4 * 9 * 4 * POOL2 * POOL2
    h_idx = np.zeros((n, 9), np.int32)
    w_idx = np.zeros((n, 9), np.int32)
    valid = np.zeros((n,), np.float32)
    r = 0
    for ph1 in range(2):
        for pw1 in range(2):
            for dh2 in range(3):
                for dw2 in range(3):
                    for ph2 in range(2):
                        for pw2 in range(2):
                            for i2 in range(POOL2):
                                for j2 in range(POOL2):
                                    hin = 4 * i2 + 2 * ph2 + dh2 - 1
                                    win = 4 * j2 + 2 * pw2 + dw2 - 1
                                    ok = (0 <= hin < POOL1) and (0 <= win < POOL1)
                                    valid[r] = 1.0 if ok else 0.0
                                    for dh1 in range(3):
                                        for dw1 in range(3):
                                            t1 = dh1 * 3 + dw1
                                            h_idx[r, t1] = 4 * hin + 2 * ph1 + dh1 + 4
                                            w_idx[r, t1] = 4 * win + 2 * pw1 + dw1 + 4
                                    r += 1
    return h_idx, w_idx, valid


_H_IDX, _W_IDX, _VALID = _build_im2col_indices()
N_ROW_GROUPS = _H_IDX.shape[0]           # 576
ROWS1 = N_ROW_GROUPS * BATCH_PAD         # 4608


# ------------------------------ the fused kernel -----------------------------
def _policy_fused_kernel(cols1_ref, aux_ref, w_ref, b_ref, o_ref):
    bf16 = jnp.bfloat16
    f32 = jnp.float32

    # ---- conv1 (+bias via the ones-column) + ReLU on replicated im2col rows
    y1 = jnp.dot(cols1_ref[...], w_ref[OFF_W1:OFF_W1 + K1_PAD, :C1],
                 preferred_element_type=f32)
    y1 = jnp.maximum(y1, 0.0)                                  # (4608, 32) f32
    # ---- 2x2 max-pool #1: max over the 4 conv1 pool-phase row blocks
    n1 = y1.shape[0] // 4                                      # 1152
    p1 = jnp.maximum(jnp.maximum(y1[:n1], y1[n1:2 * n1]),
                     jnp.maximum(y1[2 * n1:3 * n1], y1[3 * n1:]))
    p1 = p1.astype(bf16)                   # rows = (tap2, conv2-phase, pos2, b)

    # ---- conv2 as ONE dot: lane-concat the 9 contiguous tap slabs of p1
    npos2 = n1 // 9                                            # 128
    cols2 = jnp.concatenate(
        [p1[t * npos2:(t + 1) * npos2, :] for t in range(9)], axis=1)   # (128, 288)
    y2 = jnp.dot(cols2, w_ref[OFF_W2:OFF_W2 + 9 * C1, :C2],
                 preferred_element_type=f32)
    y2 = jnp.maximum(y2 + b_ref[0:1, :C2], 0.0)                # (128, 16) f32
    # ---- 2x2 max-pool #2: max over the 4 conv2 pool-phase row blocks
    g = npos2 // 4                                             # 32
    p2 = jnp.maximum(jnp.maximum(y2[:g], y2[g:2 * g]),
                     jnp.maximum(y2[2 * g:3 * g], y2[3 * g:])) # rows = (pos2, b)

    # ---- HWC flatten (spatial groups -> per-batch lane blocks) + fcmap: ONE dot
    bp = aux_ref.shape[0]
    flat = jnp.concatenate(
        [p2[k * bp:(k + 1) * bp, :] for k in range(POOL2 * POOL2)], axis=1)
    mf = jnp.dot(flat.astype(bf16), w_ref[OFF_WM:OFF_WM + FLAT_DIM, :MAP_FEATURE_DIM],
                 preferred_element_type=f32)
    mf = jnp.maximum(mf + b_ref[1:2, :MAP_FEATURE_DIM], 0.0)   # (8, 32)

    # ---- FC trunk; concat(map_feat, poses, lidars, goal) as a split matmul
    h = jnp.dot(mf.astype(bf16), w_ref[OFF_W1A:OFF_W1A + MAP_FEATURE_DIM, :H1],
                preferred_element_type=f32)
    h = h + jnp.dot(aux_ref[...].astype(bf16), w_ref[OFF_W1B:OFF_W1B + AUX_PAD, :H1],
                    preferred_element_type=f32)
    h = jnp.maximum(h + b_ref[2:3, :H1], 0.0)
    h = jnp.maximum(jnp.dot(h.astype(bf16), w_ref[OFF_WF2:OFF_WF2 + H1, :H2],
                            preferred_element_type=f32) + b_ref[3:4, :H2], 0.0)
    h = jnp.maximum(jnp.dot(h.astype(bf16), w_ref[OFF_WF3:OFF_WF3 + H2, :H3],
                            preferred_element_type=f32) + b_ref[4:5, :H3], 0.0)

    # ---- fused heads: lanes [0:A) = mu, [A:2A) = log_std (clamped)
    heads = jnp.dot(h.astype(bf16), w_ref[OFF_WH:OFF_WH + H3, :2 * ACTION_DIM],
                    preferred_element_type=f32) + b_ref[5:6, :2 * ACTION_DIM]
    lane = lax.broadcasted_iota(jnp.int32, heads.shape, 1)
    clamped = jnp.clip(heads, LOG_SIG_MIN, LOG_SIG_MAX)
    o_ref[...] = jnp.where(lane >= ACTION_DIM, clamped, heads).astype(o_ref.dtype)


def _full(shape):
    return pl.BlockSpec(shape, lambda i: (0, 0))


def policy_fused(cols1, aux, wblob, bblob):
    return pl.pallas_call(
        _policy_fused_kernel,
        out_shape=jax.ShapeDtypeStruct((BATCH_PAD, 2 * ACTION_DIM), jnp.float32),
        grid=(1,),
        in_specs=[_full(cols1.shape), _full(aux.shape),
                  _full(wblob.shape), _full(bblob.shape)],
        out_specs=_full((BATCH_PAD, 2 * ACTION_DIM)),
        compiler_params=pltpu.CompilerParams(dimension_semantics=("arbitrary",)),
    )(cols1, aux, wblob, bblob)


# ------------------------- weight / bias blob packing ------------------------
def _pack_params(p):
    """One bf16 weight blob (528, 64) + one f32 bias blob (8, 64) = 2 DMAs."""
    def pad64(w):
        return jnp.pad(w, ((0, 0), (0, W_COLS - w.shape[1])))

    w1 = jnp.zeros((K1_PAD, C1), jnp.float32)
    w1 = w1.at[:9].set(p["conv1_w"]).at[9].set(p["conv1_b"])   # bias on ones-col row
    w1b = jnp.pad(p["fc1_w"][MAP_FEATURE_DIM:], ((0, AUX_PAD - AUX_DIM), (0, 0)))
    wh = jnp.concatenate([p["mu_w"], p["ls_w"]], axis=1)       # fused heads (16, 4)
    wblob = jnp.concatenate(
        [pad64(w1), pad64(p["conv2_w"]), pad64(p["fcmap_w"]),
         pad64(p["fc1_w"][:MAP_FEATURE_DIM]), pad64(w1b),
         pad64(p["fc2_w"]), pad64(p["fc3_w"]), pad64(wh)],
        axis=0).astype(jnp.bfloat16)

    def pad_b(b):
        return jnp.pad(b, (0, W_COLS - b.shape[0]))

    zero = jnp.zeros((W_COLS,), jnp.float32)
    bblob = jnp.stack(
        [pad_b(p["conv2_b"]), pad_b(p["fcmap_b"]), pad_b(p["fc1_b"]),
         pad_b(p["fc2_b"]), pad_b(p["fc3_b"]),
         pad_b(jnp.concatenate([p["mu_b"], p["ls_b"]])), zero, zero], axis=0)
    return wblob, bblob


# ------------------------------ forward pass ---------------------------------
def policy_forward(maps, poses, lidars, goal, p):
    """maps: (B, MAP_SIZE, MAP_SIZE) f32; poses (B,3); lidars (B,8); goal (2,)."""
    B = maps.shape[0]
    bp = BATCH_PAD

    # conv1 im2col (host-side glue): one gather into the over-padded map.
    # Lane 9 is the ones/valid column (applies conv1 bias, zeroes conv2 padding).
    maps_p = jnp.zeros((bp, MAP_SIZE, MAP_SIZE), jnp.float32).at[:B].set(maps)
    xp = jnp.pad(maps_p, ((0, 0), (5, 1), (5, 1)))             # (bp, 38, 38)
    taps = xp[:, _H_IDX, _W_IDX]                               # (bp, 576, 9)
    taps = jnp.transpose(taps, (1, 0, 2)).reshape(ROWS1, 9)
    ones = jnp.broadcast_to(jnp.asarray(_VALID)[:, None, None],
                            (N_ROW_GROUPS, bp, 1)).reshape(ROWS1, 1)
    cols1 = jnp.pad(jnp.concatenate([taps, ones], axis=1),
                    ((0, 0), (0, K1_PAD - 10))).astype(jnp.bfloat16)

    goal_b = jnp.broadcast_to(goal[None, :], (B, GOAL_DIM))
    aux = jnp.concatenate([poses, lidars, goal_b], axis=1)     # (B, 13)
    aux_p = jnp.zeros((bp, AUX_PAD), jnp.float32).at[:B, :AUX_DIM].set(aux)

    wblob, bblob = _pack_params(p)
    out = policy_fused(cols1, aux_p, wblob, bblob)[:B]
    return out[:, :ACTION_DIM], out[:, ACTION_DIM:]


# --------------------------- plain-JAX reference -----------------------------
def _ref_pool(y):  # NCHW 2x2 / stride-2 max-pool
    b, c, h, w = y.shape
    return y.reshape(b, c, h // 2, 2, w // 2, 2).max(axis=(3, 5))


def reference_forward(maps, poses, lidars, goal, p):
    B = maps.shape[0]
    x = maps[:, None, :, :]
    dn = ("NCHW", "OIHW", "NCHW")
    w1 = p["conv1_w"].T.reshape(C1, 1, 3, 3)
    y = lax.conv_general_dilated(x, w1, (2, 2), ((1, 1), (1, 1)),
                                 dimension_numbers=dn)
    y = _ref_pool(jax.nn.relu(y + p["conv1_b"][None, :, None, None]))
    w2 = p["conv2_w"].reshape(3, 3, C1, C2).transpose(3, 2, 0, 1)
    y = lax.conv_general_dilated(y, w2, (2, 2), ((1, 1), (1, 1)),
                                 dimension_numbers=dn)
    y = _ref_pool(jax.nn.relu(y + p["conv2_b"][None, :, None, None]))
    flat = y.transpose(0, 2, 3, 1).reshape(B, -1)    # HWC flatten (matches fcmap_w)
    mf = jax.nn.relu(flat @ p["fcmap_w"] + p["fcmap_b"])
    goal_b = jnp.broadcast_to(goal[None, :], (B, GOAL_DIM))
    inp = jnp.concatenate([mf, poses, lidars, goal_b], axis=1)
    h = jax.nn.relu(inp @ p["fc1_w"] + p["fc1_b"])
    h = jax.nn.relu(h @ p["fc2_w"] + p["fc2_b"])
    h = jax.nn.relu(h @ p["fc3_w"] + p["fc3_b"])
    mu = h @ p["mu_w"] + p["mu_b"]
    ls = jnp.clip(h @ p["ls_w"] + p["ls_b"], LOG_SIG_MIN, LOG_SIG_MAX)
    return mu, ls


# ------------------------------ parameter init -------------------------------
def init_params(key):
    def lin(k, fan_in, fan_out):
        k1, k2 = jax.random.split(k)
        bound = 1.0 / jnp.sqrt(jnp.float32(fan_in))
        w = jax.random.uniform(k1, (fan_in, fan_out), jnp.float32, -bound, bound)
        b = jax.random.uniform(k2, (fan_out,), jnp.float32, -bound, bound)
        return w, b

    keys = jax.random.split(key, 8)
    p = {}
    p["conv1_w"], p["conv1_b"] = lin(keys[0], 9, C1)           # rows = (kh*3+kw)
    p["conv2_w"], p["conv2_b"] = lin(keys[1], 9 * C1, C2)      # rows = (kh, kw, cin)
    p["fcmap_w"], p["fcmap_b"] = lin(keys[2], FLAT_DIM, MAP_FEATURE_DIM)
    p["fc1_w"], p["fc1_b"] = lin(keys[3], STATE_DIM, H1)
    p["fc2_w"], p["fc2_b"] = lin(keys[4], H1, H2)
    p["fc3_w"], p["fc3_b"] = lin(keys[5], H2, H3)
    p["mu_w"], p["mu_b"] = lin(keys[6], H3, ACTION_DIM)
    p["ls_w"], p["ls_b"] = lin(keys[7], H3, ACTION_DIM)
    return p


# ----------------------------------- main ------------------------------------
if __name__ == "__main__":
    key = jax.random.PRNGKey(0)
    kp, km, kpo, kl, kg = jax.random.split(key, 5)
    params = init_params(kp)

    B = 2
    maps = jax.random.uniform(km, (B, MAP_SIZE, MAP_SIZE), jnp.float32)
    poses = jax.random.normal(kpo, (B, POSE_DIM), jnp.float32)
    lidars = jax.random.uniform(kl, (B, LIDAR_DIM), jnp.float32)
    goal = jax.random.normal(kg, (GOAL_DIM,), jnp.float32)

    mu, log_std = jax.jit(policy_forward)(maps, poses, lidars, goal, params)
    jax.block_until_ready((mu, log_std))

    assert mu.shape == (B, ACTION_DIM) and log_std.shape == (B, ACTION_DIM)
    assert bool(jnp.all(log_std >= LOG_SIG_MIN)) and bool(jnp.all(log_std <= LOG_SIG_MAX))

    # cross-check against a plain-JAX/XLA reference (tolerance accounts for the
    # bf16 MXU operands in the kernel vs. XLA's default-precision convs/dots)
    mu_ref, ls_ref = jax.jit(reference_forward)(maps, poses, lidars, goal, params)
    assert float(jnp.max(jnp.abs(mu - mu_ref))) < 5e-2
    assert float(jnp.max(jnp.abs(log_std - ls_ref))) < 5e-2

    print("KERNEL_OK")
</pallas_src>

<mosaic_0001>
module attributes {stable_mosaic.version = 11 : i64} {
  func.func @_policy_fused_kernel(%arg0: i32, %arg1: memref<4608x16xbf16, #tpu.memory_space<vmem>>, %arg2: memref<8x16xf32, #tpu.memory_space<vmem>>, %arg3: memref<528x64xbf16, #tpu.memory_space<vmem>>, %arg4: memref<8x64xf32, #tpu.memory_space<vmem>>, %arg5: memref<8x4xf32, #tpu.memory_space<vmem>>) attributes {dimension_semantics = [#tpu.dimension_semantics<arbitrary>], iteration_bounds = array<i64: 1>, scalar_prefetch = 0 : i64, scratch_operands = 0 : i64, tpu.core_type = #tpu.core_type<tc>, window_params = [{pipeline_mode = #tpu.pipeline_mode<synchronous>, transform_indices = @transform_0, window_bounds = array<i64: 4608, 16>}, {pipeline_mode = #tpu.pipeline_mode<synchronous>, transform_indices = @transform_1, window_bounds = array<i64: 8, 16>}, {pipeline_mode = #tpu.pipeline_mode<synchronous>, transform_indices = @transform_2, window_bounds = array<i64: 528, 64>}, {pipeline_mode = #tpu.pipeline_mode<synchronous>, transform_indices = @transform_3, window_bounds = array<i64: 8, 64>}, {pipeline_mode = #tpu.pipeline_mode<synchronous>, transform_indices = @transform_4, window_bounds = array<i64: 8, 4>}]} {
    %c0 = arith.constant 0 : index
    %c0_0 = arith.constant 0 : index
    %0 = vector.load %arg1[%c0, %c0_0] : memref<4608x16xbf16, #tpu.memory_space<vmem>>, vector<4608x16xbf16>
    %c0_1 = arith.constant 0 : index
    %c0_2 = arith.constant 0 : index
    %1 = vector.load %arg3[%c0_1, %c0_2] : memref<528x64xbf16, #tpu.memory_space<vmem>>, vector<16x32xbf16>
    %cst = arith.constant dense<0.000000e+00> : vector<4608x32xf32>
    %2 = tpu.matmul %0, %1, %cst {dimension_numbers = #tpu.dot_dimension_numbers<[1], [0], [0], [1], [0, 0, 1, 1], [], []>} : vector<4608x16xbf16>, vector<16x32xbf16>, vector<4608x32xf32> -> vector<4608x32xf32>
    %cst_3 = arith.constant 0.000000e+00 : f32
    %3 = vector.broadcast %cst_3 : f32 to vector<4608x32xf32>
    %4 = arith.maximumf %2, %3 : vector<4608x32xf32>
    %5 = vector.extract_strided_slice %4 {offsets = [0, 0], sizes = [1152, 32], strides = [1, 1]} : vector<4608x32xf32> to vector<1152x32xf32>
    %6 = vector.extract_strided_slice %4 {offsets = [1152, 0], sizes = [1152, 32], strides = [1, 1]} : vector<4608x32xf32> to vector<1152x32xf32>
    %7 = arith.maximumf %5, %6 : vector<1152x32xf32>
    %8 = vector.extract_strided_slice %4 {offsets = [2304, 0], sizes = [1152, 32], strides = [1, 1]} : vector<4608x32xf32> to vector<1152x32xf32>
    %9 = vector.extract_strided_slice %4 {offsets = [3456, 0], sizes = [1152, 32], strides = [1, 1]} : vector<4608x32xf32> to vector<1152x32xf32>
    %10 = arith.maximumf %8, %9 : vector<1152x32xf32>
    %11 = arith.maximumf %7, %10 : vector<1152x32xf32>
    %12 = arith.truncf %11 : vector<1152x32xf32> to vector<1152x32xbf16>
    %13 = vector.extract_strided_slice %12 {offsets = [0, 0], sizes = [128, 32], strides = [1, 1]} : vector<1152x32xbf16> to vector<128x32xbf16>
    %14 = vector.extract_strided_slice %12 {offsets = [128, 0], sizes = [128, 32], strides = [1, 1]} : vector<1152x32xbf16> to vector<128x32xbf16>
    %15 = vector.extract_strided_slice %12 {offsets = [256, 0], sizes = [128, 32], strides = [1, 1]} : vector<1152x32xbf16> to vector<128x32xbf16>
    %16 = vector.extract_strided_slice %12 {offsets = [384, 0], sizes = [128, 32], strides = [1, 1]} : vector<1152x32xbf16> to vector<128x32xbf16>
    %17 = vector.extract_strided_slice %12 {offsets = [512, 0], sizes = [128, 32], strides = [1, 1]} : vector<1152x32xbf16> to vector<128x32xbf16>
    %18 = vector.extract_strided_slice %12 {offsets = [640, 0], sizes = [128, 32], strides = [1, 1]} : vector<1152x32xbf16> to vector<128x32xbf16>
    %19 = vector.extract_strided_slice %12 {offsets = [768, 0], sizes = [128, 32], strides = [1, 1]} : vector<1152x32xbf16> to vector<128x32xbf16>
    %20 = vector.extract_strided_slice %12 {offsets = [896, 0], sizes = [128, 32], strides = [1, 1]} : vector<1152x32xbf16> to vector<128x32xbf16>
    %21 = vector.extract_strided_slice %12 {offsets = [1024, 0], sizes = [128, 32], strides = [1, 1]} : vector<1152x32xbf16> to vector<128x32xbf16>
    %22 = tpu.concatenate %13, %14, %15, %16, %17, %18, %19, %20, %21 in 1 : vector<128x32xbf16>, vector<128x32xbf16>, vector<128x32xbf16>, vector<128x32xbf16>, vector<128x32xbf16>, vector<128x32xbf16>, vector<128x32xbf16>, vector<128x32xbf16>, vector<128x32xbf16> -> vector<128x288xbf16>
    %c16 = arith.constant 16 : index
    %c0_4 = arith.constant 0 : index
    %23 = vector.load %arg3[%c16, %c0_4] : memref<528x64xbf16, #tpu.memory_space<vmem>>, vector<288x16xbf16>
    %cst_5 = arith.constant dense<0.000000e+00> : vector<128x16xf32>
    %24 = tpu.matmul %22, %23, %cst_5 {dimension_numbers = #tpu.dot_dimension_numbers<[1], [0], [0], [1], [0, 0, 1, 1], [], []>} : vector<128x288xbf16>, vector<288x16xbf16>, vector<128x16xf32> -> vector<128x16xf32>
    %c0_6 = arith.constant 0 : index
    %c0_7 = arith.constant 0 : index
    %25 = vector.load %arg4[%c0_6, %c0_7] : memref<8x64xf32, #tpu.memory_space<vmem>>, vector<1x16xf32>
    %26 = vector.broadcast %25 : vector<1x16xf32> to vector<128x16xf32>
    %27 = arith.addf %24, %26 : vector<128x16xf32>
    %cst_8 = arith.constant 0.000000e+00 : f32
    %28 = vector.broadcast %cst_8 : f32 to vector<128x16xf32>
    %29 = arith.maximumf %27, %28 : vector<128x16xf32>
    %30 = vector.extract_strided_slice %29 {offsets = [0, 0], sizes = [32, 16], strides = [1, 1]} : vector<128x16xf32> to vector<32x16xf32>
    %31 = vector.extract_strided_slice %29 {offsets = [32, 0], sizes = [32, 16], strides = [1, 1]} : vector<128x16xf32> to vector<32x16xf32>
    %32 = arith.maximumf %30, %31 : vector<32x16xf32>
    %33 = vector.extract_strided_slice %29 {offsets = [64, 0], sizes = [32, 16], strides = [1, 1]} : vector<128x16xf32> to vector<32x16xf32>
    %34 = vector.extract_strided_slice %29 {offsets = [96, 0], sizes = [32, 16], strides = [1, 1]} : vector<128x16xf32> to vector<32x16xf32>
    %35 = arith.maximumf %33, %34 : vector<32x16xf32>
    %36 = arith.maximumf %32, %35 : vector<32x16xf32>
    %37 = vector.extract_strided_slice %36 {offsets = [0, 0], sizes = [8, 16], strides = [1, 1]} : vector<32x16xf32> to vector<8x16xf32>
    %38 = vector.extract_strided_slice %36 {offsets = [8, 0], sizes = [8, 16], strides = [1, 1]} : vector<32x16xf32> to vector<8x16xf32>
    %39 = vector.extract_strided_slice %36 {offsets = [16, 0], sizes = [8, 16], strides = [1, 1]} : vector<32x16xf32> to vector<8x16xf32>
    %40 = vector.extract_strided_slice %36 {offsets = [24, 0], sizes = [8, 16], strides = [1, 1]} : vector<32x16xf32> to vector<8x16xf32>
    %41 = tpu.concatenate %37, %38, %39, %40 in 1 : vector<8x16xf32>, vector<8x16xf32>, vector<8x16xf32>, vector<8x16xf32> -> vector<8x64xf32>
    %42 = arith.truncf %41 : vector<8x64xf32> to vector<8x64xbf16>
    %c304 = arith.constant 304 : index
    %c0_9 = arith.constant 0 : index
    %43 = vector.load %arg3[%c304, %c0_9] : memref<528x64xbf16, #tpu.memory_space<vmem>>, vector<64x32xbf16>
    %cst_10 = arith.constant dense<0.000000e+00> : vector<8x32xf32>
    %44 = tpu.matmul %42, %43, %cst_10 {dimension_numbers = #tpu.dot_dimension_numbers<[1], [0], [0], [1], [0, 0, 1, 1], [], []>} : vector<8x64xbf16>, vector<64x32xbf16>, vector<8x32xf32> -> vector<8x32xf32>
    %c1 = arith.constant 1 : index
    %c0_11 = arith.constant 0 : index
    %45 = vector.load %arg4[%c1, %c0_11] : memref<8x64xf32, #tpu.memory_space<vmem>>, vector<1x32xf32>
    %46 = vector.broadcast %45 : vector<1x32xf32> to vector<8x32xf32>
    %47 = arith.addf %44, %46 : vector<8x32xf32>
    %cst_12 = arith.constant 0.000000e+00 : f32
    %48 = vector.broadcast %cst_12 : f32 to vector<8x32xf32>
    %49 = arith.maximumf %47, %48 : vector<8x32xf32>
    %50 = arith.truncf %49 : vector<8x32xf32> to vector<8x32xbf16>
    %c368 = arith.constant 368 : index
    %c0_13 = arith.constant 0 : index
    %51 = vector.load %arg3[%c368, %c0_13] : memref<528x64xbf16, #tpu.memory_space<vmem>>, vector<32x64xbf16>
    %cst_14 = arith.constant dense<0.000000e+00> : vector<8x64xf32>
    %52 = tpu.matmul %50, %51, %cst_14 {dimension_numbers = #tpu.dot_dimension_numbers<[1], [0], [0], [1], [0, 0, 1, 1], [], []>} : vector<8x32xbf16>, vector<32x64xbf16>, vector<8x64xf32> -> vector<8x64xf32>
    %c0_15 = arith.constant 0 : index
    %c0_16 = arith.constant 0 : index
    %53 = vector.load %arg2[%c0_15, %c0_16] : memref<8x16xf32, #tpu.memory_space<vmem>>, vector<8x16xf32>
    %54 = arith.truncf %53 : vector<8x16xf32> to vector<8x16xbf16>
    %c400 = arith.constant 400 : index
    %c0_17 = arith.constant 0 : index
    %55 = vector.load %arg3[%c400, %c0_17] : memref<528x64xbf16, #tpu.memory_space<vmem>>, vector<16x64xbf16>
    %cst_18 = arith.constant dense<0.000000e+00> : vector<8x64xf32>
    %56 = tpu.matmul %54, %55, %cst_18 {dimension_numbers = #tpu.dot_dimension_numbers<[1], [0], [0], [1], [0, 0, 1, 1], [], []>} : vector<8x16xbf16>, vector<16x64xbf16>, vector<8x64xf32> -> vector<8x64xf32>
    %57 = arith.addf %52, %56 : vector<8x64xf32>
    %c2 = arith.constant 2 : index
    %c0_19 = arith.constant 0 : index
    %58 = vector.load %arg4[%c2, %c0_19] : memref<8x64xf32, #tpu.memory_space<vmem>>, vector<1x64xf32>
    %59 = vector.broadcast %58 : vector<1x64xf32> to vector<8x64xf32>
    %60 = arith.addf %57, %59 : vector<8x64xf32>
    %cst_20 = arith.constant 0.000000e+00 : f32
    %61 = vector.broadcast %cst_20 : f32 to vector<8x64xf32>
    %62 = arith.maximumf %60, %61 : vector<8x64xf32>
    %63 = arith.truncf %62 : vector<8x64xf32> to vector<8x64xbf16>
    %c416 = arith.constant 416 : index
    %c0_21 = arith.constant 0 : index
    %64 = vector.load %arg3[%c416, %c0_21] : memref<528x64xbf16, #tpu.memory_space<vmem>>, vector<64x32xbf16>
    %cst_22 = arith.constant dense<0.000000e+00> : vector<8x32xf32>
    %65 = tpu.matmul %63, %64, %cst_22 {dimension_numbers = #tpu.dot_dimension_numbers<[1], [0], [0], [1], [0, 0, 1, 1], [], []>} : vector<8x64xbf16>, vector<64x32xbf16>, vector<8x32xf32> -> vector<8x32xf32>
    %c3 = arith.constant 3 : index
    %c0_23 = arith.constant 0 : index
    %66 = vector.load %arg4[%c3, %c0_23] : memref<8x64xf32, #tpu.memory_space<vmem>>, vector<1x32xf32>
    %67 = vector.broadcast %66 : vector<1x32xf32> to vector<8x32xf32>
    %68 = arith.addf %65, %67 : vector<8x32xf32>
    %cst_24 = arith.constant 0.000000e+00 : f32
    %69 = vector.broadcast %cst_24 : f32 to vector<8x32xf32>
    %70 = arith.maximumf %68, %69 : vector<8x32xf32>
    %71 = arith.truncf %70 : vector<8x32xf32> to vector<8x32xbf16>
    %c480 = arith.constant 480 : index
    %c0_25 = arith.constant 0 : index
    %72 = vector.load %arg3[%c480, %c0_25] : memref<528x64xbf16, #tpu.memory_space<vmem>>, vector<32x16xbf16>
    %cst_26 = arith.constant dense<0.000000e+00> : vector<8x16xf32>
    %73 = tpu.matmul %71, %72, %cst_26 {dimension_numbers = #tpu.dot_dimension_numbers<[1], [0], [0], [1], [0, 0, 1, 1], [], []>} : vector<8x32xbf16>, vector<32x16xbf16>, vector<8x16xf32> -> vector<8x16xf32>
    %c4 = arith.constant 4 : index
    %c0_27 = arith.constant 0 : index
    %74 = vector.load %arg4[%c4, %c0_27] : memref<8x64xf32, #tpu.memory_space<vmem>>, vector<1x16xf32>
    %75 = vector.broadcast %74 : vector<1x16xf32> to vector<8x16xf32>
    %76 = arith.addf %73, %75 : vector<8x16xf32>
    %cst_28 = arith.constant 0.000000e+00 : f32
    %77 = vector.broadcast %cst_28 : f32 to vector<8x16xf32>
    %78 = arith.maximumf %76, %77 : vector<8x16xf32>
    %79 = arith.truncf %78 : vector<8x16xf32> to vector<8x16xbf16>
    %c512 = arith.constant 512 : index
    %c0_29 = arith.constant 0 : index
    %80 = vector.load %arg3[%c512, %c0_29] : memref<528x64xbf16, #tpu.memory_space<vmem>>, vector<16x4xbf16>
    %cst_30 = arith.constant dense<0.000000e+00> : vector<8x4xf32>
    %81 = tpu.matmul %79, %80, %cst_30 {dimension_numbers = #tpu.dot_dimension_numbers<[1], [0], [0], [1], [0, 0, 1, 1], [], []>} : vector<8x16xbf16>, vector<16x4xbf16>, vector<8x4xf32> -> vector<8x4xf32>
    %c5 = arith.constant 5 : index
    %c0_31 = arith.constant 0 : index
    %82 = vector.load %arg4[%c5, %c0_31] : memref<8x64xf32, #tpu.memory_space<vmem>>, vector<1x4xf32>
    %83 = vector.broadcast %82 : vector<1x4xf32> to vector<8x4xf32>
    %84 = arith.addf %81, %83 : vector<8x4xf32>
    %85 = tpu.iota {dimensions = array<i32: 1>} : vector<8x4xi32>
    %cst_32 = arith.constant -2.000000e+01 : f32
    %cst_33 = arith.constant 2.000000e+00 : f32
    %86 = vector.broadcast %cst_32 : f32 to vector<8x4xf32>
    %87 = arith.maximumf %86, %84 : vector<8x4xf32>
    %88 = vector.broadcast %cst_33 : f32 to vector<8x4xf32>
    %89 = arith.minimumf %88, %87 : vector<8x4xf32>
    %c2_i32 = arith.constant 2 : i32
    %90 = vector.broadcast %c2_i32 : i32 to vector<8x4xi32>
    %91 = arith.cmpi sge, %85, %90 : vector<8x4xi32>
    %92 = arith.select %91, %89, %84 : vector<8x4xi1>, vector<8x4xf32>
    %c0_34 = arith.constant 0 : index
    %c0_35 = arith.constant 0 : index
    %93 = vector.load %arg5[%c0_34, %c0_35] : memref<8x4xf32, #tpu.memory_space<vmem>>, vector<8x4xf32>
    tpu.vector_store %arg5[%c0_34, %c0_35], %92 {strides = array<i32>} : memref<8x4xf32, #tpu.memory_space<vmem>>, vector<8x4xf32>,
    return
  }
  func.func @transform_0(%arg0: i32) -> (i32, i32) {
    %c0_i32 = arith.constant 0 : i32
    %c0_i32_0 = arith.constant 0 : i32
    %c0_i32_1 = arith.constant 0 : i32
    return %c0_i32, %c0_i32_0 : i32, i32
  }
  func.func @transform_1(%arg0: i32) -> (i32, i32) {
    %c0_i32 = arith.constant 0 : i32
    %c0_i32_0 = arith.constant 0 : i32
    %c0_i32_1 = arith.constant 0 : i32
    return %c0_i32, %c0_i32_0 : i32, i32
  }
  func.func @transform_2(%arg0: i32) -> (i32, i32) {
    %c0_i32 = arith.constant 0 : i32
    %c0_i32_0 = arith.constant 0 : i32
    %c0_i32_1 = arith.constant 0 : i32
    return %c0_i32, %c0_i32_0 : i32, i32
  }
  func.func @transform_3(%arg0: i32) -> (i32, i32) {
    %c0_i32 = arith.constant 0 : i32
    %c0_i32_0 = arith.constant 0 : i32
    %c0_i32_1 = arith.constant 0 : i32
    return %c0_i32, %c0_i32_0 : i32, i32
  }
  func.func @transform_4(%arg0: i32) -> (i32, i32) {
    %c0_i32 = arith.constant 0 : i32
    %c0_i32_0 = arith.constant 0 : i32
    %c0_i32_1 = arith.constant 0 : i32
    return %c0_i32, %c0_i32_0 : i32, i32
  }
}

</mosaic_0001>

<bundles_post_ra>
// kernel: policy_forward.1
= control target key start
LH: loop header
LB: loop body
LE: loop exit
PB: predicated region body
PF: predicated region fallthrough
CT: control target
= control target key end

     0   :  { %vm2042_vm0 = vcmask 130048   ;;  %s9421_s19 = smov 96   ;;  %s9423_s21 = smov 64   ;;  %vm6468_vm1 = vcmask 261120   ;;  %vm6493_vm2 = vcmask 523264   ;;  %vm6510_vm3 = vcmask 785408   ;;  %s12368_s2 = inlined_call_operand.vmem [shape: bf16[528,64], index: 2, kind: input, shape index: {}]   ;;  %s12369_s0 = inlined_call_operand.vmem [shape: bf16[4608,16], index: 0, kind: input, shape index: {}]   ;;  %s12370_s3 = inlined_call_operand.vmem [shape: f32[8,64], index: 3, kind: input, shape index: {}]   ;;  %s12371_s1 = inlined_call_operand.vmem [shape: f32[8,16], index: 1, kind: input, shape index: {}]   ;;  %s12372_s4 = inlined_call_operand.vmem [shape: f32[8,4], index: 4, kind: output, shape index: {}]  }
   0x1   :  { %v9100_v0 = vld [vmem:[%s12368_s2] sm:$0xff]   ;;  %v9103_v3 = vld [vmem:[%s12369_s0 + $0x8] sm:$0xff]   ;;  %v9105_v5 = vld [vmem:[%s12369_s0 + $0x10] sm:$0xff]   ;;  %vm9425_vm4 = vmmov 0   ;;  %s9426_s17 = smov 16   ;;  %s9427_s18 = smov 48  }
   0x2   :  { %v9101_v1 = vld [vmem:[%s12369_s0] sm:$0xff]   ;;  %8441 = vmatprep.subr.bf16.mxu0 %v9100_v0  ;;  %9091 = vmatprep.subr.bf16.mxu1 %v9100_v0  ;;  %v9104_v4 = vld [vmem:[%s12369_s0 + $0x528] sm:$0xff]   ;;  %v9106_v6 = vld [vmem:[%s12369_s0 + $0x530] sm:$0xff]   ;;  %vm7008_vm5 = vcmask 392192   ;;  %vm7423_vm7 = vcmask 31744  }
   0x3   :  { %v9102_v2 = vld [vmem:[%s12369_s0 + $0x520] sm:$0xff]   ;;  %8442 = vmatpush3.bf16.msra.mxu0 %v9100_v0  ;;  %9092 = vmatpush3.bf16.msra.mxu1 %v9100_v0  ;;  %v9107_v7 = vld [vmem:[%s12369_s0 + $0x18] sm:$0xff]   ;;  %v9111_v11 = vld [vmem:[%s12369_s0 + $0x28] sm:$0xff]  }
   0x4   :  { %8443 = vmatprep.mubr.msk.bf16.mxu0 %vm2042_vm0, %v9101_v1  ;;  %8771 = vmatprep.mubr.msk.bf16.mxu1 %vm2042_vm0, %v9102_v2  ;;  %v9108_v8 = vld [vmem:[%s12369_s0 + $0x538] sm:$0xff]   ;;  %v9109_v9 = vld [vmem:[%s12369_s0 + $0x20] sm:$0xff]   ;;  %v9112_v12 = vld [vmem:[%s12369_s0 + $0x548] sm:$0xff]  }
   0x5   :  { %v9110_v10 = vld [vmem:[%s12369_s0 + $0x540] sm:$0xff]   ;;  %v9113_v13 = vld [vmem:[%s12369_s0 + $0x30] sm:$0xff]   ;;  %v9115_v15 = vld [vmem:[%s12369_s0 + $0x38] sm:$0xff]  }
   0x6   :  { %8444 = vmatmul.mubr.msk.bf16.vlgmr.msra.gmra.mrb[0].mxu0 %vm2042_vm0, %v9103_v3  ;;  %8772 = vmatmul.mubr.msk.bf16.vlgmr.msra.gmra.mrb[0].mxu1 %vm2042_vm0, %v9104_v4  ;;  %v9114_v14 = vld [vmem:[%s12369_s0 + $0x550] sm:$0xff]   ;;  %v9116_v16 = vld [vmem:[%s12369_s0 + $0x558] sm:$0xff]   ;;  %v9117_v17 = vld [vmem:[%s12369_s0 + $0x40] sm:$0xff]  }
   0x7   :  { %8447 = vmatprep.mubr.msk.bf16.mxu0 %vm2042_vm0, %v9105_v5  ;;  %8775 = vmatprep.mubr.msk.bf16.mxu1 %vm2042_vm0, %v9106_v6  ;;  %v9118_v18 = vld [vmem:[%s12369_s0 + $0x560] sm:$0xff]   ;;  %v9119_v19 = vld [vmem:[%s12369_s0 + $0x48] sm:$0xff]   ;;  %v9121_v21 = vld [vmem:[%s12369_s0 + $0x50] sm:$0xff]  }
   0x8   :  { %v9120_v20 = vld [vmem:[%s12369_s0 + $0x568] sm:$0xff]   ;;  %v9122_v22 = vld [vmem:[%s12369_s0 + $0x570] sm:$0xff]   ;;  %v9123_v23 = vld [vmem:[%s12369_s0 + $0x58] sm:$0xff]  }
   0x9   :  { %v9124_v24 = vld [vmem:[%s12369_s0 + $0x578] sm:$0xff]   ;;  %v9125_v25 = vld [vmem:[%s12369_s0 + $0x60] sm:$0xff]   ;;  %v9127_v27 = vld [vmem:[%s12369_s0 + $0x68] sm:$0xff]  }
   0xa   :  { %v9126_v26 = vld [vmem:[%s12369_s0 + $0x580] sm:$0xff]   ;;  %v9128_v28 = vld [vmem:[%s12369_s0 + $0x588] sm:$0xff]   ;;  %v9129_v29 = vld [vmem:[%s12369_s0 + $0x70] sm:$0xff]  }
   0xb   :  { %v9130_v30 = vld [vmem:[%s12369_s0 + $0x590] sm:$0xff]   ;;  %v9131_v31 = vld [vmem:[%s12369_s0 + $0x78] sm:$0xff]   ;;  %v9133_v33 = vld [vmem:[%s12369_s0 + $0x80] sm:$0xff]  }
   0xc   :  { %v9132_v32 = vld [vmem:[%s12369_s0 + $0x598] sm:$0xff]   ;;  %v9134_v34 = vld [vmem:[%s12369_s0 + $0x5a0] sm:$0xff]   ;;  %v9135_v35 = vld [vmem:[%s12369_s0 + $0x88] sm:$0xff]  }
   0xd   :  { %v9136_v36 = vld [vmem:[%s12369_s0 + $0x5a8] sm:$0xff]   ;;  %v9137_v37 = vld [vmem:[%s12369_s0 + $0x90] sm:$0xff]   ;;  %v9139_v39 = vld [vmem:[%s12369_s0 + $0x98] sm:$0xff]  }
   0xe   :  { %8448 = vmatmul.mubr.msk.bf16.gmra.mrb[4].mxu0 %vm2042_vm0, %v9107_v7  ;;  %8776 = vmatmul.mubr.msk.bf16.gmra.mrb[4].mxu1 %vm2042_vm0, %v9108_v8  ;;  %v9138_v38 = vld [vmem:[%s12369_s0 + $0x5b0] sm:$0xff]   ;;  %v9140_v40 = vld [vmem:[%s12369_s0 + $0x5b8] sm:$0xff]   ;;  %v9141_v41 = vld [vmem:[%s12369_s0 + $0xa0] sm:$0xff]  }
   0xf   :  { %8451 = vmatprep.mubr.msk.bf16.mxu0 %vm2042_vm0, %v9109_v9  ;;  %8779 = vmatprep.mubr.msk.bf16.mxu1 %vm2042_vm0, %v9110_v10  ;;  %v9142_v42 = vld [vmem:[%s12369_s0 + $0x5c0] sm:$0xff]   ;;  %v9143_v43 = vld [vmem:[%s12369_s0 + $0xa8] sm:$0xff]   ;;  %v9145_v45 = vld [vmem:[%s12369_s0 + $0xb0] sm:$0xff]  }
  0x10   :  { %v9144_v44 = vld [vmem:[%s12369_s0 + $0x5c8] sm:$0xff]   ;;  %v9146_v46 = vld [vmem:[%s12369_s0 + $0x5d0] sm:$0xff]   ;;  %v9147_v47 = vld [vmem:[%s12369_s0 + $0xb8] sm:$0xff]  }
  0x11   :  { %v9148_v48 = vld [vmem:[%s12369_s0 + $0x5d8] sm:$0xff]   ;;  %v9149_v49 = vld [vmem:[%s12369_s0 + $0xc0] sm:$0xff]   ;;  %v9151_v51 = vld [vmem:[%s12369_s0 + $0xc8] sm:$0xff]  }
  0x12   :  { %v9150_v50 = vld [vmem:[%s12369_s0 + $0x5e0] sm:$0xff]   ;;  %v9152_v52 = vld [vmem:[%s12369_s0 + $0x5e8] sm:$0xff]   ;;  %v9153_v53 = vld [vmem:[%s12369_s0 + $0xd0] sm:$0xff]  }
  0x13   :  { %v9154_v54 = vld [vmem:[%s12369_s0 + $0x5f0] sm:$0xff]   ;;  %v9155_v55 = vld [vmem:[%s12369_s0 + $0xd8] sm:$0xff]   ;;  %v9157_v57 = vld [vmem:[%s12369_s0 + $0xe0] sm:$0xff]  }
  0x14   :  { %v9156_v56 = vld [vmem:[%s12369_s0 + $0x5f8] sm:$0xff]   ;;  %v9158_v58 = vld [vmem:[%s12369_s0 + $0x600] sm:$0xff]   ;;  %v9159_v59 = vld [vmem:[%s12369_s0 + $0xe8] sm:$0xff]  }
  0x15   :  { %v9160_v60 = vld [vmem:[%s12369_s0 + $0x608] sm:$0xff]   ;;  %v9161_v61 = vld [vmem:[%s12369_s0 + $0xf0] sm:$0xff]   ;;  %v9163_v63 = vld [vmem:[%s12369_s0 + $0xf8] sm:$0xff]  }
  0x16   :  { %8452 = vmatmul.mubr.msk.bf16.gmra.mrb[8].mxu0 %vm2042_vm0, %v9111_v11  ;;  %8780 = vmatmul.mubr.msk.bf16.gmra.mrb[8].mxu1 %vm2042_vm0, %v9112_v12  ;;  %v9162_v62 = vld [vmem:[%s12369_s0 + $0x610] sm:$0xff]   ;;  %v9164_v0 = vld [vmem:[%s12369_s0 + $0x618] sm:$0xff]   ;;  %v9165_v1 = vld [vmem:[%s12369_s0 + $0x100] sm:$0xff]  }
  0x17   :  { %8455 = vmatprep.mubr.msk.bf16.mxu0 %vm2042_vm0, %v9113_v13  ;;  %8783 = vmatprep.mubr.msk.bf16.mxu1 %vm2042_vm0, %v9114_v14  ;;  %v9166_v2 = vld [vmem:[%s12369_s0 + $0x620] sm:$0xff]   ;;  %v9167_v3 = vld [vmem:[%s12369_s0 + $0x108] sm:$0xff]   ;;  %v9169_v5 = vld [vmem:[%s12369_s0 + $0x110] sm:$0xff]  }
  0x18   :  { %v9168_v4 = vld [vmem:[%s12369_s0 + $0x628] sm:$0xff]   ;;  %v9170_v6 = vld [vmem:[%s12369_s0 + $0x630] sm:$0xff]   ;;  %v9171_v7 = vld [vmem:[%s12369_s0 + $0x118] sm:$0xff]  }
  0x19   :  { %v9172_v8 = vld [vmem:[%s12369_s0 + $0x638] sm:$0xff]   ;;  %v9173_v9 = vld [vmem:[%s12369_s0 + $0x120] sm:$0xff]   ;;  %v9175_v11 = vld [vmem:[%s12369_s0 + $0x128] sm:$0xff]  }
  0x1a   :  { %v9174_v10 = vld [vmem:[%s12369_s0 + $0x640] sm:$0xff]   ;;  %v9176_v12 = vld [vmem:[%s12369_s0 + $0x648] sm:$0xff]   ;;  %v9177_v13 = vld [vmem:[%s12369_s0 + $0x130] sm:$0xff]  }
  0x1b   :  { %v9178_v14 = vld [vmem:[%s12369_s0 + $0x650] sm:$0xff]  }
  0x1e   :  { %8456 = vmatmul.mubr.msk.bf16.gmra.mrb[12].mxu0 %vm2042_vm0, %v9115_v15  ;;  %8784 = vmatmul.mubr.msk.bf16.gmra.mrb[12].mxu1 %vm2042_vm0, %v9116_v16  ;;  %v9179_v15 = vld [vmem:[%s12369_s0 + $0x138] sm:$0xff]  }
  0x1f   :  { %8459 = vmatprep.mubr.msk.bf16.mxu0 %vm2042_vm0, %v9117_v17  ;;  %8787 = vmatprep.mubr.msk.bf16.mxu1 %vm2042_vm0, %v9118_v18  ;;  %v9180_v16 = vld [vmem:[%s12369_s0 + $0x658] sm:$0xff]   ;;  %v9181_v17 = vld [vmem:[%s12369_s0 + $0x140] sm:$0xff]  }
  0x20   :  { %v9182_v18 = vld [vmem:[%s12369_s0 + $0x660] sm:$0xff]  }
  0x26   :  { %8460 = vmatmul.mubr.msk.bf16.gmra.mrb[16].mxu0 %vm2042_vm0, %v9119_v19  ;;  %8788 = vmatmul.mubr.msk.bf16.gmra.mrb[16].mxu1 %vm2042_vm0, %v9120_v20  ;;  %v9183_v19 = vld [vmem:[%s12369_s0 + $0x148] sm:$0xff]  }
  0x27   :  { %8463 = vmatprep.mubr.msk.bf16.mxu0 %vm2042_vm0, %v9121_v21  ;;  %8791 = vmatprep.mubr.msk.bf16.mxu1 %vm2042_vm0, %v9122_v22  ;;  %v9184_v20 = vld [vmem:[%s12369_s0 + $0x668] sm:$0xff]   ;;  %v9185_v21 = vld [vmem:[%s12369_s0 + $0x150] sm:$0xff]  }
  0x28   :  { %v9186_v22 = vld [vmem:[%s12369_s0 + $0x670] sm:$0xff]  }
  0x2e   :  { %8464 = vmatmul.mubr.msk.bf16.gmra.mrb[20].mxu0 %vm2042_vm0, %v9123_v23  ;;  %8792 = vmatmul.mubr.msk.bf16.gmra.mrb[20].mxu1 %vm2042_vm0, %v9124_v24  ;;  %v9187_v23 = vld [vmem:[%s12369_s0 + $0x158] sm:$0xff]  }
  0x2f   :  { %8467 = vmatprep.mubr.msk.bf16.mxu0 %vm2042_vm0, %v9125_v25  ;;  %8795 = vmatprep.mubr.msk.bf16.mxu1 %vm2042_vm0, %v9126_v26  ;;  %v9188_v24 = vld [vmem:[%s12369_s0 + $0x678] sm:$0xff]   ;;  %v9189_v25 = vld [vmem:[%s12369_s0 + $0x160] sm:$0xff]  }
  0x30   :  { %v9190_v26 = vld [vmem:[%s12369_s0 + $0x680] sm:$0xff]  }
  0x36   :  { %8468 = vmatmul.mubr.msk.bf16.gmra.mrb[24].mxu0 %vm2042_vm0, %v9127_v27  ;;  %8796 = vmatmul.mubr.msk.bf16.gmra.mrb[24].mxu1 %vm2042_vm0, %v9128_v28  ;;  %v9191_v27 = vld [vmem:[%s12369_s0 + $0x168] sm:$0xff]  }
  0x37   :  { %8471 = vmatprep.mubr.msk.bf16.mxu0 %vm2042_vm0, %v9129_v29  ;;  %8799 = vmatprep.mubr.msk.bf16.mxu1 %vm2042_vm0, %v9130_v30  ;;  %v9192_v28 = vld [vmem:[%s12369_s0 + $0x688] sm:$0xff]   ;;  %v9193_v29 = vld [vmem:[%s12369_s0 + $0x170] sm:$0xff]  }
  0x38   :  { %v9194_v30 = vld [vmem:[%s12369_s0 + $0x690] sm:$0xff]  }
  0x3e   :  { %8472 = vmatmul.mubr.msk.bf16.gmra.mrb[28].mxu0 %vm2042_vm0, %v9131_v31  ;;  %8800 = vmatmul.mubr.msk.bf16.gmra.mrb[28].mxu1 %vm2042_vm0, %v9132_v32  ;;  %v9195_v31 = vld [vmem:[%s12369_s0 + $0x178] sm:$0xff]  }
  0x3f   :  { %8475 = vmatprep.mubr.msk.bf16.mxu0 %vm2042_vm0, %v9133_v33  ;;  %8803 = vmatprep.mubr.msk.bf16.mxu1 %vm2042_vm0, %v9134_v34  ;;  %v9196_v32 = vld [vmem:[%s12369_s0 + $0x698] sm:$0xff]   ;;  %v9197_v33 = vld [vmem:[%s12369_s0 + $0x180] sm:$0xff]  }
  0x40   :  { %v9198_v34 = vld [vmem:[%s12369_s0 + $0x6a0] sm:$0xff]  }
  0x46   :  { %8476 = vmatmul.mubr.msk.bf16.gmra.mrb[32].mxu0 %vm2042_vm0, %v9135_v35  ;;  %8804 = vmatmul.mubr.msk.bf16.gmra.mrb[32].mxu1 %vm2042_vm0, %v9136_v36  ;;  %v9199_v35 = vld [vmem:[%s12369_s0 + $0x188] sm:$0xff]  }
  0x47   :  { %8479 = vmatprep.mubr.msk.bf16.mxu0 %vm2042_vm0, %v9137_v37  ;;  %8807 = vmatprep.mubr.msk.bf16.mxu1 %vm2042_vm0, %v9138_v38  ;;  %v9200_v36 = vld [vmem:[%s12369_s0 + $0x6a8] sm:$0xff]   ;;  %v9201_v37 = vld [vmem:[%s12369_s0 + $0x190] sm:$0xff]  }
  0x48   :  { %v9202_v38 = vld [vmem:[%s12369_s0 + $0x6b0] sm:$0xff]  }
  0x4e   :  { %8480 = vmatmul.mubr.msk.bf16.gmra.mrb[36].mxu0 %vm2042_vm0, %v9139_v39  ;;  %8808 = vmatmul.mubr.msk.bf16.gmra.mrb[36].mxu1 %vm2042_vm0, %v9140_v40  ;;  %v9203_v39 = vld [vmem:[%s12369_s0 + $0x198] sm:$0xff]  }
  0x4f   :  { %8483 = vmatprep.mubr.msk.bf16.mxu0 %vm2042_vm0, %v9141_v41  ;;  %8811 = vmatprep.mubr.msk.bf16.mxu1 %vm2042_vm0, %v9142_v42  ;;  %v9204_v40 = vld [vmem:[%s12369_s0 + $0x6b8] sm:$0xff]   ;;  %v9205_v41 = vld [vmem:[%s12369_s0 + $0x1a0] sm:$0xff]  }
  0x50   :  { %v9206_v42 = vld [vmem:[%s12369_s0 + $0x6c0] sm:$0xff]  }
  0x56   :  { %8484 = vmatmul.mubr.msk.bf16.gmra.mrb[40].mxu0 %vm2042_vm0, %v9143_v43  ;;  %8812 = vmatmul.mubr.msk.bf16.gmra.mrb[40].mxu1 %vm2042_vm0, %v9144_v44  ;;  %v9207_v43 = vld [vmem:[%s12369_s0 + $0x1a8] sm:$0xff]  }
  0x57   :  { %8487 = vmatprep.mubr.msk.bf16.mxu0 %vm2042_vm0, %v9145_v45  ;;  %8815 = vmatprep.mubr.msk.bf16.mxu1 %vm2042_vm0, %v9146_v46  ;;  %v9208_v44 = vld [vmem:[%s12369_s0 + $0x6c8] sm:$0xff]   ;;  %v9209_v45 = vld [vmem:[%s12369_s0 + $0x1b0] sm:$0xff]  }
  0x58   :  { %v9210_v46 = vld [vmem:[%s12369_s0 + $0x6d0] sm:$0xff]  }
  0x5e   :  { %8488 = vmatmul.mubr.msk.bf16.gmra.mrb[44].mxu0 %vm2042_vm0, %v9147_v47  ;;  %8816 = vmatmul.mubr.msk.bf16.gmra.mrb[44].mxu1 %vm2042_vm0, %v9148_v48  ;;  %v9211_v48 = vld [vmem:[%s12369_s0 + $0x1b8] sm:$0xff]  }
  0x5f   :  { %8491 = vmatprep.mubr.msk.bf16.mxu0 %vm2042_vm0, %v9149_v49  ;;  %8819 = vmatprep.mubr.msk.bf16.mxu1 %vm2042_vm0, %v9150_v50  ;;  %v9212_v50 = vld [vmem:[%s12369_s0 + $0x6d8] sm:$0xff]  }
  0x66   :  { %8492 = vmatmul.mubr.msk.bf16.gmra.mrb[48].mxu0 %vm2042_vm0, %v9151_v51  ;;  %8820 = vmatmul.mubr.msk.bf16.gmra.mrb[48].mxu1 %vm2042_vm0, %v9152_v52  ;;  %v9213_v52 = vld [vmem:[%s12369_s0 + $0x1c0] sm:$0xff]  }
  0x67   :  { %8495 = vmatprep.mubr.msk.bf16.mxu0 %vm2042_vm0, %v9153_v53  ;;  %8823 = vmatprep.mubr.msk.bf16.mxu1 %vm2042_vm0, %v9154_v54  ;;  %v9214_v53 = vld [vmem:[%s12369_s0 + $0x6e0] sm:$0xff]  }
  0x6e   :  { %8496 = vmatmul.mubr.msk.bf16.gmra.mrb[52].mxu0 %vm2042_vm0, %v9155_v55  ;;  %8824 = vmatmul.mubr.msk.bf16.gmra.mrb[52].mxu1 %vm2042_vm0, %v9156_v56  ;;  %v9215_v56 = vld [vmem:[%s12369_s0 + $0x1c8] sm:$0xff]  }
  0x6f   :  { %8499 = vmatprep.mubr.msk.bf16.mxu0 %vm2042_vm0, %v9157_v57  ;;  %8827 = vmatprep.mubr.msk.bf16.mxu1 %vm2042_vm0, %v9158_v58  ;;  %v9216_v58 = vld [vmem:[%s12369_s0 + $0x6e8] sm:$0xff]  }
  0x76   :  { %8500 = vmatmul.mubr.msk.bf16.gmra.mrb[56].mxu0 %vm2042_vm0, %v9159_v59  ;;  %8828 = vmatmul.mubr.msk.bf16.gmra.mrb[56].mxu1 %vm2042_vm0, %v9160_v60  ;;  %v9217_v60 = vld [vmem:[%s12369_s0 + $0x1d0] sm:$0xff]  }
  0x77   :  { %8503 = vmatprep.mubr.msk.bf16.mxu0 %vm2042_vm0, %v9161_v61  ;;  %8831 = vmatprep.mubr.msk.bf16.mxu1 %vm2042_vm0, %v9162_v62  ;;  %v9218_v61 = vld [vmem:[%s12369_s0 + $0x6f0] sm:$0xff]  }
  0x7e   :  { %8504 = vmatmul.mubr.msk.bf16.gmra.mrb[60].mxu0 %vm2042_vm0, %v9163_v63  ;;  %8832 = vmatmul.mubr.msk.bf16.gmra.mrb[60].mxu1 %vm2042_vm0, %v9164_v0 }
  0x7f   :  { %8507 = vmatprep.mubr.msk.bf16.mxu0 %vm2042_vm0, %v9165_v1  ;;  %8835 = vmatprep.mubr.msk.bf16.mxu1 %vm2042_vm0, %v9166_v2  ;;  %v9219_v2 = vld [vmem:[%s12369_s0 + $0x1d8] sm:$0xff]  }
  0x86   :  { %8508 = vmatmul.mubr.msk.bf16.gmra.mrb[64].mxu0 %vm2042_vm0, %v9167_v3  ;;  %8836 = vmatmul.mubr.msk.bf16.gmra.mrb[64].mxu1 %vm2042_vm0, %v9168_v4  ;;  %v9220_v3 = vld [vmem:[%s12369_s0 + $0x6f8] sm:$0xff]  }
  0x87   :  { %8511 = vmatprep.mubr.msk.bf16.mxu0 %vm2042_vm0, %v9169_v5  ;;  %8839 = vmatprep.mubr.msk.bf16.mxu1 %vm2042_vm0, %v9170_v6  ;;  %v9221_v6 = vld [vmem:[%s12369_s0 + $0x1e0] sm:$0xff]  }
  0x8e   :  { %8512 = vmatmul.mubr.msk.bf16.gmra.mrb[68].mxu0 %vm2042_vm0, %v9171_v7  ;;  %8840 = vmatmul.mubr.msk.bf16.gmra.mrb[68].mxu1 %vm2042_vm0, %v9172_v8  ;;  %v9222_v7 = vld [vmem:[%s12369_s0 + $0x700] sm:$0xff]  }
  0x8f   :  { %8515 = vmatprep.mubr.msk.bf16.mxu0 %vm2042_vm0, %v9173_v9  ;;  %8843 = vmatprep.mubr.msk.bf16.mxu1 %vm2042_vm0, %v9174_v10 }
  0x96   :  { %8516 = vmatmul.mubr.msk.bf16.gmra.mrb[72].mxu0 %vm2042_vm0, %v9175_v11  ;;  %8844 = vmatmul.mubr.msk.bf16.gmra.mrb[72].mxu1 %vm2042_vm0, %v9176_v12 }
  0x97   :  { %8519 = vmatprep.mubr.msk.bf16.mxu0 %vm2042_vm0, %v9177_v13  ;;  %8847 = vmatprep.mubr.msk.bf16.mxu1 %vm2042_vm0, %v9178_v14 }
  0x9e   :  { %8520 = vmatmul.mubr.msk.bf16.gmra.mrb[76].mxu0 %vm2042_vm0, %v9179_v15  ;;  %8848 = vmatmul.mubr.msk.bf16.gmra.mrb[76].mxu1 %vm2042_vm0, %v9180_v16 }
  0x9f   :  { %8523 = vmatprep.mubr.msk.bf16.mxu0 %vm2042_vm0, %v9181_v17  ;;  %8851 = vmatprep.mubr.msk.bf16.mxu1 %vm2042_vm0, %v9182_v18  ;;  %v9223_v18 = vld [vmem:[%s12369_s0 + $0x1e8] sm:$0xff]  }
  0xa6   :  { %8524 = vmatmul.mubr.msk.bf16.gmra.mrb[80].mxu0 %vm2042_vm0, %v9183_v19  ;;  %8852 = vmatmul.mubr.msk.bf16.gmra.mrb[80].mxu1 %vm2042_vm0, %v9184_v20  ;;  %v9224_v19 = vld [vmem:[%s12369_s0 + $0x708] sm:$0xff]  }
  0xa7   :  { %8527 = vmatprep.mubr.msk.bf16.mxu0 %vm2042_vm0, %v9185_v21  ;;  %8855 = vmatprep.mubr.msk.bf16.mxu1 %vm2042_vm0, %v9186_v22  ;;  %v9225_v22 = vld [vmem:[%s12369_s0 + $0x1f0] sm:$0xff]  }
  0xae   :  { %8528 = vmatmul.mubr.msk.bf16.gmra.mrb[84].mxu0 %vm2042_vm0, %v9187_v23  ;;  %8856 = vmatmul.mubr.msk.bf16.gmra.mrb[84].mxu1 %vm2042_vm0, %v9188_v24  ;;  %v9226_v23 = vld [vmem:[%s12369_s0 + $0x710] sm:$0xff]  }
  0xaf   :  { %8531 = vmatprep.mubr.msk.bf16.mxu0 %vm2042_vm0, %v9189_v25  ;;  %8859 = vmatprep.mubr.msk.bf16.mxu1 %vm2042_vm0, %v9190_v26 }
  0xb6   :  { %8532 = vmatmul.mubr.msk.bf16.gmra.mrb[88].mxu0 %vm2042_vm0, %v9191_v27  ;;  %8860 = vmatmul.mubr.msk.bf16.gmra.mrb[88].mxu1 %vm2042_vm0, %v9192_v28 }
  0xb7   :  { %8535 = vmatprep.mubr.msk.bf16.mxu0 %vm2042_vm0, %v9193_v29  ;;  %8863 = vmatprep.mubr.msk.bf16.mxu1 %vm2042_vm0, %v9194_v30 }
  0xbe   :  { %8536 = vmatmul.mubr.msk.bf16.gmra.mrb[92].mxu0 %vm2042_vm0, %v9195_v31  ;;  %8864 = vmatmul.mubr.msk.bf16.gmra.mrb[92].mxu1 %vm2042_vm0, %v9196_v32 }
  0xbf   :  { %8539 = vmatprep.mubr.msk.bf16.mxu0 %vm2042_vm0, %v9197_v33  ;;  %8867 = vmatprep.mubr.msk.bf16.mxu1 %vm2042_vm0, %v9198_v34  ;;  %v9227_v34 = vld [vmem:[%s12369_s0 + $0x1f8] sm:$0xff]  }
  0xc6   :  { %8540 = vmatmul.mubr.msk.bf16.gmra.mrb[96].mxu0 %vm2042_vm0, %v9199_v35  ;;  %8868 = vmatmul.mubr.msk.bf16.gmra.mrb[96].mxu1 %vm2042_vm0, %v9200_v36  ;;  %v9228_v35 = vld [vmem:[%s12369_s0 + $0x718] sm:$0xff]  }
  0xc7   :  { %8543 = vmatprep.mubr.msk.bf16.mxu0 %vm2042_vm0, %v9201_v37  ;;  %8871 = vmatprep.mubr.msk.bf16.mxu1 %vm2042_vm0, %v9202_v38  ;;  %v9229_v38 = vld [vmem:[%s12369_s0 + $0x200] sm:$0xff]  }
  0xce   :  { %8544 = vmatmul.mubr.msk.bf16.gmra.mrb[100].mxu0 %vm2042_vm0, %v9203_v39  ;;  %8872 = vmatmul.mubr.msk.bf16.gmra.mrb[100].mxu1 %vm2042_vm0, %v9204_v40  ;;  %v9230_v39 = vld [vmem:[%s12369_s0 + $0x720] sm:$0xff]  }
  0xcf   :  { %8547 = vmatprep.mubr.msk.bf16.mxu0 %vm2042_vm0, %v9205_v41  ;;  %8875 = vmatprep.mubr.msk.bf16.mxu1 %vm2042_vm0, %v9206_v42 }
  0xd6   :  { %8548 = vmatmul.mubr.msk.bf16.gmra.mrb[104].mxu0 %vm2042_vm0, %v9207_v43  ;;  %8876 = vmatmul.mubr.msk.bf16.gmra.mrb[104].mxu1 %vm2042_vm0, %v9208_v44 }
  0xd7   :  { %8551 = vmatprep.mubr.msk.bf16.mxu0 %vm2042_vm0, %v9209_v45  ;;  %8879 = vmatprep.mubr.msk.bf16.mxu1 %vm2042_vm0, %v9210_v46  ;;  %v9231_v46 = vld [vmem:[%s12369_s0 + $0x208] sm:$0xff]  }
  0xd9   :  { %v9896_v47 = vpop.f32.mrb[0].mxu0  ;;  %v9946_v0 = vpop.f32.mrb[0].mxu1 }
  0xda   :  { %v9901_v49 = vpop.f32.mrb[1].mxu0  ;;  %v9956_v4 = vpop.f32.mrb[1].mxu1 }
  0xdb   :  { %v9906_v51 = vpop.f32.mrb[2].mxu0  ;;  %v9966_v8 = vpop.f32.mrb[2].mxu1 }
  0xdc   :  { %v9914_v54 = vpop.f32.mrb[3].mxu0  ;;  %v9970_v10 = vpop.f32.mrb[3].mxu1 }
  0xde   :  { %8552 = vmatmul.mubr.msk.bf16.gmra.mrb[108].mxu0 %vm2042_vm0, %v9211_v48  ;;  %8880 = vmatmul.mubr.msk.bf16.gmra.mrb[108].mxu1 %vm2042_vm0, %v9212_v50  ;;  %v9232_v48 = vld [vmem:[%s12369_s0 + $0x728] sm:$0xff]  }
  0xdf   :  { %8555 = vmatprep.mubr.msk.bf16.mxu0 %vm2042_vm0, %v9213_v52  ;;  %8883 = vmatprep.mubr.msk.bf16.mxu1 %vm2042_vm0, %v9214_v53  ;;  %v9233_v53 = vld [vmem:[%s12369_s0 + $0x210] sm:$0xff]  }
  0xe1   :  { %v9920_v55 = vpop.f32.mrb[4].mxu0  ;;  %v9972_v11 = vpop.f32.mrb[4].mxu1 }
  0xe2   :  { %v9925_v57 = vpop.f32.mrb[5].mxu0  ;;  %v9976_v12 = vpop.f32.mrb[5].mxu1 }
  0xe3   :  { %v9930_v59 = vpop.f32.mrb[6].mxu0  ;;  %v9980_v13 = vpop.f32.mrb[6].mxu1 }
  0xe4   :  { %v9938_v62 = vpop.f32.mrb[7].mxu0  ;;  %v9982_v14 = vpop.f32.mrb[7].mxu1 }
  0xe6   :  { %8556 = vmatmul.mubr.msk.bf16.gmra.mrb[112].mxu0 %vm2042_vm0, %v9215_v56  ;;  %8884 = vmatmul.mubr.msk.bf16.gmra.mrb[112].mxu1 %vm2042_vm0, %v9216_v58  ;;  %v9234_v56 = vld [vmem:[%s12369_s0 + $0x730] sm:$0xff]  }
  0xe7   :  { %8559 = vmatprep.mubr.msk.bf16.mxu0 %vm2042_vm0, %v9217_v60  ;;  %8887 = vmatprep.mubr.msk.bf16.mxu1 %vm2042_vm0, %v9218_v61 }
  0xe9   :  { %v9944_v63 = vpop.f32.mrb[8].mxu0  ;;  %v9986_v16 = vpop.f32.mrb[8].mxu1 }
  0xea   :  { %v9948_v1 = vpop.f32.mrb[9].mxu0  ;;  %v9996_v20 = vpop.f32.mrb[9].mxu1 }
  0xeb   :  { %v9958_v5 = vpop.f32.mrb[10].mxu0  ;;  %v10006_v24 = vpop.f32.mrb[10].mxu1 }
  0xec   :  { %v9968_v9 = vpop.f32.mrb[11].mxu0  ;;  %v10010_v26 = vpop.f32.mrb[11].mxu1 }
  0xee   :  { %8560 = vmatmul.mubr.msk.bf16.gmra.mrb[116].mxu0 %vm2042_vm0, %v9219_v2  ;;  %8888 = vmatmul.mubr.msk.bf16.gmra.mrb[116].mxu1 %vm2042_vm0, %v9220_v3 }
  0xef   :  { %8563 = vmatprep.mubr.msk.bf16.mxu0 %vm2042_vm0, %v9221_v6  ;;  %8891 = vmatprep.mubr.msk.bf16.mxu1 %vm2042_vm0, %v9222_v7  ;;  %v9235_v7 = vld [vmem:[%s12369_s0 + $0x218] sm:$0xff]  }
  0xf1   :  { %v9984_v15 = vpop.f32.mrb[12].mxu0  ;;  %v10012_v27 = vpop.f32.mrb[12].mxu1 }
  0xf2   :  { %v9988_v17 = vpop.f32.mrb[13].mxu0  ;;  %v10016_v28 = vpop.f32.mrb[13].mxu1 }
  0xf3   :  { %v9998_v21 = vpop.f32.mrb[14].mxu0  ;;  %v10020_v29 = vpop.f32.mrb[14].mxu1 }
  0xf4   :  { %v10008_v25 = vpop.f32.mrb[15].mxu0  ;;  %v10022_v30 = vpop.f32.mrb[15].mxu1 }
  0xf6   :  { %8564 = vmatmul.mubr.msk.bf16.gmra.mrb[120].mxu0 %vm2042_vm0, %v9223_v18  ;;  %8892 = vmatmul.mubr.msk.bf16.gmra.mrb[120].mxu1 %vm2042_vm0, %v9224_v19  ;;  %v9236_v18 = vld [vmem:[%s12369_s0 + $0x738] sm:$0xff]  }
  0xf7   :  { %8567 = vmatprep.mubr.msk.bf16.mxu0 %vm2042_vm0, %v9225_v22  ;;  %8895 = vmatprep.mubr.msk.bf16.mxu1 %vm2042_vm0, %v9226_v23  ;;  %v9237_v23 = vld [vmem:[%s12369_s0 + $0x220] sm:$0xff]  }
  0xf9   :  { %v10024_v31 = vpop.f32.mrb[16].mxu0  ;;  %v10026_v32 = vpop.f32.mrb[16].mxu1 }
  0xfa   :  { %v10028_v33 = vpop.f32.mrb[17].mxu0  ;;  %v10036_v36 = vpop.f32.mrb[17].mxu1 }
  0xfb   :  { %v10038_v37 = vpop.f32.mrb[18].mxu0  ;;  %v10046_v40 = vpop.f32.mrb[18].mxu1 }
  0xfc   :  { %v10048_v41 = vpop.f32.mrb[19].mxu0  ;;  %v10050_v42 = vpop.f32.mrb[19].mxu1 }
  0xfe   :  { %8568 = vmatmul.mubr.msk.bf16.gmra.mrb[124].mxu0 %vm2042_vm0, %v9227_v34  ;;  %8896 = vmatmul.mubr.msk.bf16.gmra.mrb[124].mxu1 %vm2042_vm0, %v9228_v35  ;;  %v9238_v34 = vld [vmem:[%s12369_s0 + $0x740] sm:$0xff]  }
  0xff   :  { %8571 = vmatprep.mubr.msk.bf16.mxu0 %vm2042_vm0, %v9229_v38  ;;  %8899 = vmatprep.mubr.msk.bf16.mxu1 %vm2042_vm0, %v9230_v39 }
 0x101   :  { %v10056_v43 = vpop.f32.mrb[20].mxu0  ;;  %v10058_v44 = vpop.f32.mrb[20].mxu1 }
 0x102   :  { %v10060_v45 = vpop.f32.mrb[21].mxu0  ;;  %v10068_v50 = vpop.f32.mrb[21].mxu1 }
 0x103   :  { %12373 = vst [vmem:[#allocation2_spill] sm:$0xff] %v10068_v50  ;;  %v10070_v52 = vpop.f32.mrb[22].mxu0  ;;  %v10078_v58 = vpop.f32.mrb[22].mxu1 }
 0x104   :  { %12374 = vst [vmem:[#allocation3_spill] sm:$0xff] %v10078_v58  ;;  %v10080_v60 = vpop.f32.mrb[23].mxu0  ;;  %v10082_v61 = vpop.f32.mrb[23].mxu1 }
 0x105   :  { %12375 = vst [vmem:[#allocation4_spill] sm:$0xff] %v10080_v60  ;;  %12376 = vst [vmem:[#allocation5_spill] sm:$0xff] %v10082_v61 }
 0x106   :  { %8572 = vmatmul.mubr.msk.bf16.gmra.mrb[128].mxu0 %vm2042_vm0, %v9231_v46  ;;  %8900 = vmatmul.mubr.msk.bf16.gmra.mrb[128].mxu1 %vm2042_vm0, %v9232_v48 }
 0x107   :  { %8575 = vmatprep.mubr.msk.bf16.mxu0 %vm2042_vm0, %v9233_v53  ;;  %8903 = vmatprep.mubr.msk.bf16.mxu1 %vm2042_vm0, %v9234_v56  ;;  %v9239_v56 = vld [vmem:[%s12369_s0 + $0x228] sm:$0xff]  }
 0x109   :  { %v10088_v2 = vpop.f32.mrb[24].mxu0  ;;  %v10090_v3 = vpop.f32.mrb[24].mxu1 }
 0x10a   :  { %12377 = vst [vmem:[#allocation6_spill] sm:$0xff] %v10088_v2  ;;  %12378 = vst [vmem:[#allocation7_spill] sm:$0xff] %v10090_v3  ;;  %v10092_v6 = vpop.f32.mrb[25].mxu0  ;;  %v10100_v19 = vpop.f32.mrb[25].mxu1 }
 0x10b   :  { %12379 = vst [vmem:[#allocation8_spill] sm:$0xff] %v10092_v6  ;;  %12380 = vst [vmem:[#allocation9_spill] sm:$0xff] %v10100_v19  ;;  %v10102_v22 = vpop.f32.mrb[26].mxu0  ;;  %v10110_v35 = vpop.f32.mrb[26].mxu1 }
 0x10c   :  { %12381 = vst [vmem:[#allocation10_spill] sm:$0xff] %v10102_v22  ;;  %12382 = vst [vmem:[#allocation11_spill] sm:$0xff] %v10110_v35  ;;  %v10112_v38 = vpop.f32.mrb[27].mxu0  ;;  %v10114_v39 = vpop.f32.mrb[27].mxu1 }
 0x10d   :  { %12383 = vst [vmem:[#allocation12_spill] sm:$0xff] %v10112_v38  ;;  %12384 = vst [vmem:[#allocation13_spill] sm:$0xff] %v10114_v39 }
 0x10e   :  { %8576 = vmatmul.mubr.msk.bf16.gmra.mrb[132].mxu0 %vm2042_vm0, %v9235_v7  ;;  %8904 = vmatmul.mubr.msk.bf16.gmra.mrb[132].mxu1 %vm2042_vm0, %v9236_v18  ;;  %v9240_v7 = vld [vmem:[%s12369_s0 + $0x748] sm:$0xff]  }
 0x10f   :  { %8579 = vmatprep.mubr.msk.bf16.mxu0 %vm2042_vm0, %v9237_v23  ;;  %8907 = vmatprep.mubr.msk.bf16.mxu1 %vm2042_vm0, %v9238_v34  ;;  %v9241_v23 = vld [vmem:[%s12369_s0 + $0x230] sm:$0xff]  }
 0x110   :  { %v9242_v34 = vld [vmem:[%s12369_s0 + $0x750] sm:$0xff]  }
 0x111   :  { %v10120_v46 = vpop.f32.mrb[28].mxu0  ;;  %v10122_v48 = vpop.f32.mrb[28].mxu1 }
 0x112   :  { %12385 = vst [vmem:[#allocation14_spill] sm:$0xff] %v10120_v46  ;;  %12386 = vst [vmem:[#allocation15_spill] sm:$0xff] %v10122_v48  ;;  %v10124_v53 = vpop.f32.mrb[29].mxu0  ;;  %v10132_v39 = vpop.f32.mrb[29].mxu1 }
 0x113   :  { %12387 = vst [vmem:[#allocation16_spill] sm:$0xff] %v10124_v53  ;;  %12388 = vst [vmem:[#allocation17_spill] sm:$0xff] %v10132_v39  ;;  %v10134_v18 = vpop.f32.mrb[30].mxu0  ;;  %v10142_v53 = vpop.f32.mrb[30].mxu1 }
 0x114   :  { %12389 = vst [vmem:[#allocation18_spill] sm:$0xff] %v10134_v18  ;;  %12390 = vst [vmem:[#allocation19_spill] sm:$0xff] %v10142_v53  ;;  %v10144_v48 = vpop.f32.mrb[31].mxu0  ;;  %v10146_v46 = vpop.f32.mrb[31].mxu1 }
 0x115   :  { %12391 = vst [vmem:[#allocation20_spill] sm:$0xff] %v10144_v48  ;;  %12392 = vst [vmem:[#allocation21_spill] sm:$0xff] %v10146_v46  ;;  %v9243_v48 = vld [vmem:[%s12369_s0 + $0x238] sm:$0xff]  }
 0x116   :  { %8580 = vmatmul.mubr.msk.bf16.gmra.mrb[136].mxu0 %vm2042_vm0, %v9239_v56  ;;  %8908 = vmatmul.mubr.msk.bf16.gmra.mrb[136].mxu1 %vm2042_vm0, %v9240_v7  ;;  %v9244_v56 = vld [vmem:[%s12369_s0 + $0x758] sm:$0xff]  }
 0x117   :  { %8583 = vmatprep.mubr.msk.bf16.mxu0 %vm2042_vm0, %v9241_v23  ;;  %8911 = vmatprep.mubr.msk.bf16.mxu1 %vm2042_vm0, %v9242_v34  ;;  %v9245_v23 = vld [vmem:[%s12369_s0 + $0x240] sm:$0xff]  }
 0x118   :  { %v9246_v34 = vld [vmem:[%s12369_s0 + $0x760] sm:$0xff]  }
 0x119   :  { %v10152_v39 = vpop.f32.mrb[32].mxu0  ;;  %v10154_v18 = vpop.f32.mrb[32].mxu1 }
 0x11a   :  { %12393 = vst [vmem:[#allocation22_spill] sm:$0xff] %v10152_v39  ;;  %12394 = vst [vmem:[#allocation23_spill] sm:$0xff] %v10154_v18  ;;  %v10156_v38 = vpop.f32.mrb[33].mxu0  ;;  %v10164_v46 = vpop.f32.mrb[33].mxu1 }
 0x11b   :  { %12395 = vst [vmem:[#allocation24_spill] sm:$0xff] %v10156_v38  ;;  %12396 = vst [vmem:[#allocation25_spill] sm:$0xff] %v10164_v46  ;;  %v10166_v7 = vpop.f32.mrb[34].mxu0  ;;  %v10174_v38 = vpop.f32.mrb[34].mxu1 }
 0x11c   :  { %12397 = vst [vmem:[#allocation26_spill] sm:$0xff] %v10166_v7  ;;  %12398 = vst [vmem:[#allocation27_spill] sm:$0xff] %v10174_v38  ;;  %v10176_v18 = vpop.f32.mrb[35].mxu0  ;;  %v10178_v39 = vpop.f32.mrb[35].mxu1 }
 0x11d   :  { %12399 = vst [vmem:[#allocation28_spill] sm:$0xff] %v10176_v18  ;;  %12400 = vst [vmem:[#allocation29_spill] sm:$0xff] %v10178_v39  ;;  %v9247_v18 = vld [vmem:[%s12369_s0 + $0x248] sm:$0xff]  }
 0x11e   :  { %8584 = vmatmul.mubr.msk.bf16.gmra.mrb[140].mxu0 %vm2042_vm0, %v9243_v48  ;;  %8912 = vmatmul.mubr.msk.bf16.gmra.mrb[140].mxu1 %vm2042_vm0, %v9244_v56  ;;  %v9248_v48 = vld [vmem:[%s12369_s0 + $0x768] sm:$0xff]  }
 0x11f   :  { %8587 = vmatprep.mubr.msk.bf16.mxu0 %vm2042_vm0, %v9245_v23  ;;  %8915 = vmatprep.mubr.msk.bf16.mxu1 %vm2042_vm0, %v9246_v34  ;;  %v9249_v23 = vld [vmem:[%s12369_s0 + $0x250] sm:$0xff]  }
 0x120   :  { %v9250_v34 = vld [vmem:[%s12369_s0 + $0x770] sm:$0xff]  }
 0x121   :  { %v10184_v46 = vpop.f32.mrb[36].mxu0  ;;  %v10186_v7 = vpop.f32.mrb[36].mxu1 }
 0x122   :  { %12401 = vst [vmem:[#allocation30_spill] sm:$0xff] %v10184_v46  ;;  %12402 = vst [vmem:[#allocation31_spill] sm:$0xff] %v10186_v7  ;;  %v10188_v53 = vpop.f32.mrb[37].mxu0  ;;  %v10196_v39 = vpop.f32.mrb[37].mxu1 }
 0x123   :  { %12403 = vst [vmem:[#allocation32_spill] sm:$0xff] %v10188_v53  ;;  %12404 = vst [vmem:[#allocation33_spill] sm:$0xff] %v10196_v39  ;;  %v10198_v56 = vpop.f32.mrb[38].mxu0  ;;  %v10206_v53 = vpop.f32.mrb[38].mxu1 }
 0x124   :  { %12405 = vst [vmem:[#allocation34_spill] sm:$0xff] %v10198_v56  ;;  %12406 = vst [vmem:[#allocation35_spill] sm:$0xff] %v10206_v53  ;;  %v10208_v7 = vpop.f32.mrb[39].mxu0  ;;  %v10210_v46 = vpop.f32.mrb[39].mxu1 }
 0x125   :  { %12407 = vst [vmem:[#allocation36_spill] sm:$0xff] %v10208_v7  ;;  %12408 = vst [vmem:[#allocation37_spill] sm:$0xff] %v10210_v46  ;;  %v9251_v7 = vld [vmem:[%s12369_s0 + $0x258] sm:$0xff]  }
 0x126   :  { %8588 = vmatmul.mubr.msk.bf16.gmra.mrb[144].mxu0 %vm2042_vm0, %v9247_v18  ;;  %8916 = vmatmul.mubr.msk.bf16.gmra.mrb[144].mxu1 %vm2042_vm0, %v9248_v48  ;;  %v9252_v18 = vld [vmem:[%s12369_s0 + $0x778] sm:$0xff]  }
 0x127   :  { %8591 = vmatprep.mubr.msk.bf16.mxu0 %vm2042_vm0, %v9249_v23  ;;  %8919 = vmatprep.mubr.msk.bf16.mxu1 %vm2042_vm0, %v9250_v34  ;;  %v9253_v23 = vld [vmem:[%s12369_s0 + $0x260] sm:$0xff]  }
 0x128   :  { %v9254_v34 = vld [vmem:[%s12369_s0 + $0x780] sm:$0xff]  }
 0x129   :  { %v10216_v39 = vpop.f32.mrb[40].mxu0  ;;  %v10218_v56 = vpop.f32.mrb[40].mxu1 }
 0x12a   :  { %12409 = vst [vmem:[#allocation38_spill] sm:$0xff] %v10216_v39  ;;  %12410 = vst [vmem:[#allocation39_spill] sm:$0xff] %v10218_v56  ;;  %v10220_v38 = vpop.f32.mrb[41].mxu0  ;;  %v10228_v46 = vpop.f32.mrb[41].mxu1 }
 0x12b   :  { %12411 = vst [vmem:[#allocation40_spill] sm:$0xff] %v10220_v38  ;;  %12412 = vst [vmem:[#allocation41_spill] sm:$0xff] %v10228_v46  ;;  %v10230_v48 = vpop.f32.mrb[42].mxu0  ;;  %v10238_v38 = vpop.f32.mrb[42].mxu1 }
 0x12c   :  { %12413 = vst [vmem:[#allocation42_spill] sm:$0xff] %v10230_v48  ;;  %12414 = vst [vmem:[#allocation43_spill] sm:$0xff] %v10238_v38  ;;  %v10240_v56 = vpop.f32.mrb[43].mxu0  ;;  %v10242_v39 = vpop.f32.mrb[43].mxu1 }
 0x12d   :  { %12415 = vst [vmem:[#allocation44_spill] sm:$0xff] %v10240_v56  ;;  %12416 = vst [vmem:[#allocation45_spill] sm:$0xff] %v10242_v39  ;;  %v9255_v56 = vld [vmem:[%s12369_s0 + $0x268] sm:$0xff]  }
 0x12e   :  { %8592 = vmatmul.mubr.msk.bf16.gmra.mrb[148].mxu0 %vm2042_vm0, %v9251_v7  ;;  %8920 = vmatmul.mubr.msk.bf16.gmra.mrb[148].mxu1 %vm2042_vm0, %v9252_v18  ;;  %v9256_v7 = vld [vmem:[%s12369_s0 + $0x788] sm:$0xff]  }
 0x12f   :  { %8595 = vmatprep.mubr.msk.bf16.mxu0 %vm2042_vm0, %v9253_v23  ;;  %8923 = vmatprep.mubr.msk.bf16.mxu1 %vm2042_vm0, %v9254_v34  ;;  %v9257_v23 = vld [vmem:[%s12369_s0 + $0x270] sm:$0xff]  }
 0x130   :  { %v9258_v34 = vld [vmem:[%s12369_s0 + $0x790] sm:$0xff]  }
 0x131   :  { %v10248_v46 = vpop.f32.mrb[44].mxu0  ;;  %v10250_v48 = vpop.f32.mrb[44].mxu1 }
 0x132   :  { %12417 = vst [vmem:[#allocation46_spill] sm:$0xff] %v10248_v46  ;;  %12418 = vst [vmem:[#allocation47_spill] sm:$0xff] %v10250_v48  ;;  %v10252_v53 = vpop.f32.mrb[45].mxu0  ;;  %v10260_v39 = vpop.f32.mrb[45].mxu1 }
 0x133   :  { %12419 = vst [vmem:[#allocation48_spill] sm:$0xff] %v10252_v53  ;;  %12420 = vst [vmem:[#allocation49_spill] sm:$0xff] %v10260_v39  ;;  %v10262_v18 = vpop.f32.mrb[46].mxu0  ;;  %v10270_v48 = vpop.f32.mrb[46].mxu1 }
 0x134   :  { %12421 = vst [vmem:[#allocation50_spill] sm:$0xff] %v10262_v18  ;;  %12422 = vst [vmem:[#allocation51_spill] sm:$0xff] %v10270_v48  ;;  %v10272_v53 = vpop.f32.mrb[47].mxu0  ;;  %v10274_v46 = vpop.f32.mrb[47].mxu1 }
 0x135   :  { %12423 = vst [vmem:[#allocation52_spill] sm:$0xff] %v10272_v53  ;;  %12424 = vst [vmem:[#allocation53_spill] sm:$0xff] %v10274_v46  ;;  %v9259_v53 = vld [vmem:[%s12369_s0 + $0x278] sm:$0xff]  }
 0x136   :  { %8596 = vmatmul.mubr.msk.bf16.gmra.mrb[152].mxu0 %vm2042_vm0, %v9255_v56  ;;  %8924 = vmatmul.mubr.msk.bf16.gmra.mrb[152].mxu1 %vm2042_vm0, %v9256_v7  ;;  %v9260_v56 = vld [vmem:[%s12369_s0 + $0x798] sm:$0xff]  }
 0x137   :  { %8599 = vmatprep.mubr.msk.bf16.mxu0 %vm2042_vm0, %v9257_v23  ;;  %8927 = vmatprep.mubr.msk.bf16.mxu1 %vm2042_vm0, %v9258_v34  ;;  %v9261_v23 = vld [vmem:[%s12369_s0 + $0x280] sm:$0xff]  }
 0x138   :  { %v9262_v34 = vld [vmem:[%s12369_s0 + $0x7a0] sm:$0xff]  }
 0x139   :  { %v10280_v39 = vpop.f32.mrb[48].mxu0  ;;  %v10282_v18 = vpop.f32.mrb[48].mxu1 }
 0x13a   :  { %12425 = vst [vmem:[#allocation54_spill] sm:$0xff] %v10280_v39  ;;  %12426 = vst [vmem:[#allocation55_spill] sm:$0xff] %v10282_v18  ;;  %v10284_v38 = vpop.f32.mrb[49].mxu0  ;;  %v10292_v46 = vpop.f32.mrb[49].mxu1 }
 0x13b   :  { %12427 = vst [vmem:[#allocation56_spill] sm:$0xff] %v10284_v38  ;;  %12428 = vst [vmem:[#allocation57_spill] sm:$0xff] %v10292_v46  ;;  %v10294_v7 = vpop.f32.mrb[50].mxu0  ;;  %v10302_v18 = vpop.f32.mrb[50].mxu1 }
 0x13c   :  { %12429 = vst [vmem:[#allocation58_spill] sm:$0xff] %v10294_v7  ;;  %12430 = vst [vmem:[#allocation59_spill] sm:$0xff] %v10302_v18  ;;  %v10304_v38 = vpop.f32.mrb[51].mxu0  ;;  %v10306_v39 = vpop.f32.mrb[51].mxu1 }
 0x13d   :  { %12431 = vst [vmem:[#allocation60_spill] sm:$0xff] %v10304_v38  ;;  %12432 = vst [vmem:[#allocation61_spill] sm:$0xff] %v10306_v39  ;;  %v9263_v38 = vld [vmem:[%s12369_s0 + $0x288] sm:$0xff]  }
 0x13e   :  { %8600 = vmatmul.mubr.msk.bf16.gmra.mrb[156].mxu0 %vm2042_vm0, %v9259_v53  ;;  %8928 = vmatmul.mubr.msk.bf16.gmra.mrb[156].mxu1 %vm2042_vm0, %v9260_v56  ;;  %v9264_v53 = vld [vmem:[%s12369_s0 + $0x7a8] sm:$0xff]  }
 0x13f   :  { %8603 = vmatprep.mubr.msk.bf16.mxu0 %vm2042_vm0, %v9261_v23  ;;  %8931 = vmatprep.mubr.msk.bf16.mxu1 %vm2042_vm0, %v9262_v34  ;;  %v9265_v23 = vld [vmem:[%s12369_s0 + $0x290] sm:$0xff]  }
 0x140   :  { %v9266_v34 = vld [vmem:[%s12369_s0 + $0x7b0] sm:$0xff]  }
 0x141   :  { %v10312_v46 = vpop.f32.mrb[52].mxu0  ;;  %v10314_v7 = vpop.f32.mrb[52].mxu1 }
 0x142   :  { %12433 = vst [vmem:[#allocation62_spill] sm:$0xff] %v10312_v46  ;;  %12434 = vst [vmem:[#allocation63_spill] sm:$0xff] %v10314_v7  ;;  %v10316_v48 = vpop.f32.mrb[53].mxu0  ;;  %v10324_v39 = vpop.f32.mrb[53].mxu1 }
 0x143   :  { %12435 = vst [vmem:[#allocation64_spill] sm:$0xff] %v10316_v48  ;;  %12436 = vst [vmem:[#allocation65_spill] sm:$0xff] %v10324_v39  ;;  %v10326_v56 = vpop.f32.mrb[54].mxu0  ;;  %v10334_v7 = vpop.f32.mrb[54].mxu1 }
 0x144   :  { %12437 = vst [vmem:[#allocation66_spill] sm:$0xff] %v10326_v56  ;;  %12438 = vst [vmem:[#allocation67_spill] sm:$0xff] %v10334_v7  ;;  %v10336_v48 = vpop.f32.mrb[55].mxu0  ;;  %v10338_v46 = vpop.f32.mrb[55].mxu1 }
 0x145   :  { %12439 = vst [vmem:[#allocation68_spill] sm:$0xff] %v10336_v48  ;;  %12440 = vst [vmem:[#allocation69_spill] sm:$0xff] %v10338_v46  ;;  %v9267_v48 = vld [vmem:[%s12369_s0 + $0x298] sm:$0xff]  }
 0x146   :  { %8604 = vmatmul.mubr.msk.bf16.gmra.mrb[160].mxu0 %vm2042_vm0, %v9263_v38  ;;  %8932 = vmatmul.mubr.msk.bf16.gmra.mrb[160].mxu1 %vm2042_vm0, %v9264_v53  ;;  %v9268_v38 = vld [vmem:[%s12369_s0 + $0x7b8] sm:$0xff]  }
 0x147   :  { %8607 = vmatprep.mubr.msk.bf16.mxu0 %vm2042_vm0, %v9265_v23  ;;  %8935 = vmatprep.mubr.msk.bf16.mxu1 %vm2042_vm0, %v9266_v34  ;;  %v9269_v23 = vld [vmem:[%s12369_s0 + $0x2a0] sm:$0xff]  }
 0x148   :  { %v9270_v34 = vld [vmem:[%s12369_s0 + $0x7c0] sm:$0xff]  }
 0x149   :  { %v10344_v39 = vpop.f32.mrb[56].mxu0  ;;  %v10346_v56 = vpop.f32.mrb[56].mxu1 }
 0x14a   :  { %12441 = vst [vmem:[#allocation70_spill] sm:$0xff] %v10344_v39  ;;  %12442 = vst [vmem:[#allocation71_spill] sm:$0xff] %v10346_v56  ;;  %v10348_v18 = vpop.f32.mrb[57].mxu0  ;;  %v10356_v46 = vpop.f32.mrb[57].mxu1 }
 0x14b   :  { %12443 = vst [vmem:[#allocation72_spill] sm:$0xff] %v10348_v18  ;;  %12444 = vst [vmem:[#allocation73_spill] sm:$0xff] %v10356_v46  ;;  %v10358_v53 = vpop.f32.mrb[58].mxu0  ;;  %v10366_v56 = vpop.f32.mrb[58].mxu1 }
 0x14c   :  { %12445 = vst [vmem:[#allocation74_spill] sm:$0xff] %v10358_v53  ;;  %12446 = vst [vmem:[#allocation75_spill] sm:$0xff] %v10366_v56  ;;  %v10368_v18 = vpop.f32.mrb[59].mxu0  ;;  %v10370_v39 = vpop.f32.mrb[59].mxu1 }
 0x14d   :  { %12447 = vst [vmem:[#allocation76_spill] sm:$0xff] %v10368_v18  ;;  %12448 = vst [vmem:[#allocation77_spill] sm:$0xff] %v10370_v39  ;;  %v9271_v18 = vld [vmem:[%s12369_s0 + $0x2a8] sm:$0xff]  }
 0x14e   :  { %8608 = vmatmul.mubr.msk.bf16.gmra.mrb[164].mxu0 %vm2042_vm0, %v9267_v48  ;;  %8936 = vmatmul.mubr.msk.bf16.gmra.mrb[164].mxu1 %vm2042_vm0, %v9268_v38  ;;  %v9272_v48 = vld [vmem:[%s12369_s0 + $0x7c8] sm:$0xff]  }
 0x14f   :  { %8611 = vmatprep.mubr.msk.bf16.mxu0 %vm2042_vm0, %v9269_v23  ;;  %8939 = vmatprep.mubr.msk.bf16.mxu1 %vm2042_vm0, %v9270_v34  ;;  %v9273_v23 = vld [vmem:[%s12369_s0 + $0x2b0] sm:$0xff]  }
 0x150   :  { %v9274_v34 = vld [vmem:[%s12369_s0 + $0x7d0] sm:$0xff]  }
 0x151   :  { %v10376_v53 = vpop.f32.mrb[60].mxu0  ;;  %v10378_v46 = vpop.f32.mrb[60].mxu1 }
 0x152   :  { %12449 = vst [vmem:[#allocation78_spill] sm:$0xff] %v10376_v53  ;;  %12450 = vst [vmem:[#allocation79_spill] sm:$0xff] %v10378_v46  ;;  %v10380_v7 = vpop.f32.mrb[61].mxu0  ;;  %v10388_v39 = vpop.f32.mrb[61].mxu1 }
 0x153   :  { %12451 = vst [vmem:[#allocation80_spill] sm:$0xff] %v10380_v7  ;;  %12452 = vst [vmem:[#allocation81_spill] sm:$0xff] %v10388_v39  ;;  %v10390_v38 = vpop.f32.mrb[62].mxu0  ;;  %v10398_v46 = vpop.f32.mrb[62].mxu1 }
 0x154   :  { %12453 = vst [vmem:[#allocation82_spill] sm:$0xff] %v10390_v38  ;;  %12454 = vst [vmem:[#allocation83_spill] sm:$0xff] %v10398_v46  ;;  %v10400_v7 = vpop.f32.mrb[63].mxu0  ;;  %v10402_v53 = vpop.f32.mrb[63].mxu1 }
 0x155   :  { %12455 = vst [vmem:[#allocation84_spill] sm:$0xff] %v10400_v7  ;;  %12456 = vst [vmem:[#allocation85_spill] sm:$0xff] %v10402_v53  ;;  %v9275_v7 = vld [vmem:[%s12369_s0 + $0x2b8] sm:$0xff]  }
 0x156   :  { %8612 = vmatmul.mubr.msk.bf16.gmra.mrb[168].mxu0 %vm2042_vm0, %v9271_v18  ;;  %8940 = vmatmul.mubr.msk.bf16.gmra.mrb[168].mxu1 %vm2042_vm0, %v9272_v48  ;;  %v9276_v18 = vld [vmem:[%s12369_s0 + $0x7d8] sm:$0xff]  }
 0x157   :  { %8615 = vmatprep.mubr.msk.bf16.mxu0 %vm2042_vm0, %v9273_v23  ;;  %8943 = vmatprep.mubr.msk.bf16.mxu1 %vm2042_vm0, %v9274_v34  ;;  %v9277_v23 = vld [vmem:[%s12369_s0 + $0x2c0] sm:$0xff]  }
 0x158   :  { %v9278_v34 = vld [vmem:[%s12369_s0 + $0x7e0] sm:$0xff]  }
 0x159   :  { %v10408_v39 = vpop.f32.mrb[64].mxu0  ;;  %v10410_v38 = vpop.f32.mrb[64].mxu1 }
 0x15a   :  { %12457 = vst [vmem:[#allocation86_spill] sm:$0xff] %v10408_v39  ;;  %12458 = vst [vmem:[#allocation87_spill] sm:$0xff] %v10410_v38  ;;  %v10412_v56 = vpop.f32.mrb[65].mxu0  ;;  %v10420_v53 = vpop.f32.mrb[65].mxu1 }
 0x15b   :  { %12459 = vst [vmem:[#allocation88_spill] sm:$0xff] %v10412_v56  ;;  %12460 = vst [vmem:[#allocation89_spill] sm:$0xff] %v10420_v53  ;;  %v10422_v48 = vpop.f32.mrb[66].mxu0  ;;  %v10430_v38 = vpop.f32.mrb[66].mxu1 }
 0x15c   :  { %12461 = vst [vmem:[#allocation90_spill] sm:$0xff] %v10422_v48  ;;  %12462 = vst [vmem:[#allocation91_spill] sm:$0xff] %v10430_v38  ;;  %v10432_v56 = vpop.f32.mrb[67].mxu0  ;;  %v10434_v39 = vpop.f32.mrb[67].mxu1 }
 0x15d   :  { %12463 = vst [vmem:[#allocation92_spill] sm:$0xff] %v10432_v56  ;;  %12464 = vst [vmem:[#allocation93_spill] sm:$0xff] %v10434_v39  ;;  %v9279_v56 = vld [vmem:[%s12369_s0 + $0x2c8] sm:$0xff]  }
 0x15e   :  { %8616 = vmatmul.mubr.msk.bf16.gmra.mrb[172].mxu0 %vm2042_vm0, %v9275_v7  ;;  %8944 = vmatmul.mubr.msk.bf16.gmra.mrb[172].mxu1 %vm2042_vm0, %v9276_v18  ;;  %v9280_v7 = vld [vmem:[%s12369_s0 + $0x7e8] sm:$0xff]  }
 0x15f   :  { %8619 = vmatprep.mubr.msk.bf16.mxu0 %vm2042_vm0, %v9277_v23  ;;  %8947 = vmatprep.mubr.msk.bf16.mxu1 %vm2042_vm0, %v9278_v34  ;;  %v9281_v23 = vld [vmem:[%s12369_s0 + $0x2d0] sm:$0xff]  }
 0x160   :  { %v9282_v34 = vld [vmem:[%s12369_s0 + $0x7f0] sm:$0xff]  }
 0x161   :  { %v10440_v53 = vpop.f32.mrb[68].mxu0  ;;  %v10442_v48 = vpop.f32.mrb[68].mxu1 }
 0x162   :  { %12465 = vst [vmem:[#allocation94_spill] sm:$0xff] %v10440_v53  ;;  %12466 = vst [vmem:[#allocation95_spill] sm:$0xff] %v10442_v48  ;;  %v10444_v46 = vpop.f32.mrb[69].mxu0  ;;  %v10452_v39 = vpop.f32.mrb[69].mxu1 }
 0x163   :  { %12467 = vst [vmem:[#allocation96_spill] sm:$0xff] %v10444_v46  ;;  %12468 = vst [vmem:[#allocation97_spill] sm:$0xff] %v10452_v39  ;;  %v10454_v18 = vpop.f32.mrb[70].mxu0  ;;  %v10462_v48 = vpop.f32.mrb[70].mxu1 }
 0x164   :  { %12469 = vst [vmem:[#allocation98_spill] sm:$0xff] %v10454_v18  ;;  %12470 = vst [vmem:[#allocation99_spill] sm:$0xff] %v10462_v48  ;;  %v10464_v46 = vpop.f32.mrb[71].mxu0  ;;  %v10466_v53 = vpop.f32.mrb[71].mxu1 }
 0x165   :  { %12471 = vst [vmem:[#allocation100_spill] sm:$0xff] %v10464_v46  ;;  %12472 = vst [vmem:[#allocation101_spill] sm:$0xff] %v10466_v53  ;;  %v9283_v46 = vld [vmem:[%s12369_s0 + $0x2d8] sm:$0xff]  }
 0x166   :  { %8620 = vmatmul.mubr.msk.bf16.gmra.mrb[176].mxu0 %vm2042_vm0, %v9279_v56  ;;  %8948 = vmatmul.mubr.msk.bf16.gmra.mrb[176].mxu1 %vm2042_vm0, %v9280_v7  ;;  %v9284_v56 = vld [vmem:[%s12369_s0 + $0x7f8] sm:$0xff]  }
 0x167   :  { %8623 = vmatprep.mubr.msk.bf16.mxu0 %vm2042_vm0, %v9281_v23  ;;  %8951 = vmatprep.mubr.msk.bf16.mxu1 %vm2042_vm0, %v9282_v34  ;;  %v9285_v23 = vld [vmem:[%s12369_s0 + $0x2e0] sm:$0xff]  }
 0x168   :  { %v9286_v34 = vld [vmem:[%s12369_s0 + $0x800] sm:$0xff]  }
 0x169   :  { %v10472_v39 = vpop.f32.mrb[72].mxu0  ;;  %v10474_v18 = vpop.f32.mrb[72].mxu1 }
 0x16a   :  { %12473 = vst [vmem:[#allocation102_spill] sm:$0xff] %v10472_v39  ;;  %12474 = vst [vmem:[#allocation103_spill] sm:$0xff] %v10474_v18  ;;  %v10476_v38 = vpop.f32.mrb[73].mxu0  ;;  %v10484_v53 = vpop.f32.mrb[73].mxu1 }
 0x16b   :  { %12475 = vst [vmem:[#allocation104_spill] sm:$0xff] %v10476_v38  ;;  %12476 = vst [vmem:[#allocation105_spill] sm:$0xff] %v10484_v53  ;;  %v10486_v7 = vpop.f32.mrb[74].mxu0  ;;  %v10494_v18 = vpop.f32.mrb[74].mxu1  ;;  %v9349_v53 = vld [vmem:[%s12368_s2 + $0x48] sm:$0xff]  }
 0x16c   :  { %12477 = vst [vmem:[#allocation106_spill] sm:$0xff] %v10486_v7  ;;  %12478 = vst [vmem:[#allocation107_spill] sm:$0xff] %v10494_v18  ;;  %v10496_v38 = vpop.f32.mrb[75].mxu0  ;;  %v10498_v39 = vpop.f32.mrb[75].mxu1  ;;  %v9350_v7 = vld [vmem:[%s12368_s2 + $0x8] sm:$0xff]   ;;  %8347 = vmatprep.subr.bf16.mxu1 %v9349_v53  ;;  %v9289_v53 = vld [vmem:[%s12369_s0 + $0x2f0] sm:$0xff]  }
 0x16d   :  { %12479 = vst [vmem:[#allocation108_spill] sm:$0xff] %v10496_v38  ;;  %12480 = vst [vmem:[#allocation109_spill] sm:$0xff] %v10498_v39  ;;  %8348 = vmatpush3.bf16.msra.mxu1 %v9350_v7  ;;  %v9288_v18 = vld [vmem:[%s12369_s0 + $0x808] sm:$0xff]   ;;  %v9290_v7 = vld [vmem:[%s12369_s0 + $0x810] sm:$0xff]  }
 0x16e   :  { %8624 = vmatmul.mubr.msk.bf16.gmra.mrb[180].mxu0 %vm2042_vm0, %v9283_v46  ;;  %8952 = vmatmul.mubr.msk.bf16.gmra.mrb[180].mxu1 %vm2042_vm0, %v9284_v56  ;;  %v9287_v56 = vld [vmem:[%s12369_s0 + $0x2e8] sm:$0xff]  }
 0x16f   :  { %8627 = vmatprep.mubr.msk.bf16.mxu0 %vm2042_vm0, %v9285_v23  ;;  %8955 = vmatprep.mubr.msk.bf16.mxu1 %vm2042_vm0, %v9286_v34 }
 0x171   :  { %v10510_v38 = vpop.f32.mrb[76].mxu0  ;;  %v10512_v39 = vpop.f32.mrb[76].mxu1 }
 0x172   :  { %12481 = vst [vmem:[#allocation110_spill] sm:$0xff] %v10510_v38  ;;  %12482 = vst [vmem:[#allocation111_spill] sm:$0xff] %v10512_v39  ;;  %v10514_v46 = vpop.f32.mrb[77].mxu0  ;;  %v10522_v48 = vpop.f32.mrb[77].mxu1 }
 0x173   :  { %12483 = vst [vmem:[#allocation112_spill] sm:$0xff] %v10514_v46  ;;  %12484 = vst [vmem:[#allocation113_spill] sm:$0xff] %v10522_v48  ;;  %v10524_v23 = vpop.f32.mrb[78].mxu0  ;;  %v10532_v34 = vpop.f32.mrb[78].mxu1 }
 0x174   :  { %12485 = vst [vmem:[#allocation114_spill] sm:$0xff] %v10524_v23  ;;  %12486 = vst [vmem:[#allocation115_spill] sm:$0xff] %v10532_v34  ;;  %v10534_v39 = vpop.f32.mrb[79].mxu0  ;;  %v10536_v46 = vpop.f32.mrb[79].mxu1 }
 0x175   :  { %12487 = vst [vmem:[#allocation116_spill] sm:$0xff] %v10534_v39  ;;  %12488 = vst [vmem:[#allocation117_spill] sm:$0xff] %v10536_v46  ;;  %v9291_v39 = vld [vmem:[%s12369_s0 + $0x2f8] sm:$0xff]  }
 0x176   :  { %8628 = vmatmul.mubr.msk.bf16.gmra.mrb[184].mxu0 %vm2042_vm0, %v9287_v56  ;;  %8956 = vmatmul.mubr.msk.bf16.gmra.mrb[184].mxu1 %vm2042_vm0, %v9288_v18  ;;  %v9292_v56 = vld [vmem:[%s12369_s0 + $0x818] sm:$0xff]  }
 0x177   :  { %8631 = vmatprep.mubr.msk.bf16.mxu0 %vm2042_vm0, %v9289_v53  ;;  %8959 = vmatprep.mubr.msk.bf16.mxu1 %vm2042_vm0, %v9290_v7  ;;  %v9293_v53 = vld [vmem:[%s12369_s0 + $0x300] sm:$0xff]  }
 0x178   :  { %v9294_v7 = vld [vmem:[%s12369_s0 + $0x820] sm:$0xff]  }
 0x179   :  { %v10542_v48 = vpop.f32.mrb[80].mxu0  ;;  %v10544_v23 = vpop.f32.mrb[80].mxu1 }
 0x17a   :  { %12489 = vst [vmem:[#allocation118_spill] sm:$0xff] %v10542_v48  ;;  %12490 = vst [vmem:[#allocation119_spill] sm:$0xff] %v10544_v23  ;;  %v10546_v38 = vpop.f32.mrb[81].mxu0  ;;  %v10554_v46 = vpop.f32.mrb[81].mxu1 }
 0x17b   :  { %12491 = vst [vmem:[#allocation120_spill] sm:$0xff] %v10546_v38  ;;  %12492 = vst [vmem:[#allocation121_spill] sm:$0xff] %v10554_v46  ;;  %v10556_v18 = vpop.f32.mrb[82].mxu0  ;;  %v10564_v23 = vpop.f32.mrb[82].mxu1 }
 0x17c   :  { %12493 = vst [vmem:[#allocation122_spill] sm:$0xff] %v10556_v18  ;;  %12494 = vst [vmem:[#allocation123_spill] sm:$0xff] %v10564_v23  ;;  %v10566_v38 = vpop.f32.mrb[83].mxu0  ;;  %v10568_v48 = vpop.f32.mrb[83].mxu1 }
 0x17d   :  { %12495 = vst [vmem:[#allocation124_spill] sm:$0xff] %v10566_v38  ;;  %12496 = vst [vmem:[#allocation125_spill] sm:$0xff] %v10568_v48  ;;  %v9295_v38 = vld [vmem:[%s12369_s0 + $0x308] sm:$0xff]  }
 0x17e   :  { %8632 = vmatmul.mubr.msk.bf16.gmra.mrb[188].mxu0 %vm2042_vm0, %v9291_v39  ;;  %8960 = vmatmul.mubr.msk.bf16.gmra.mrb[188].mxu1 %vm2042_vm0, %v9292_v56  ;;  %v9296_v39 = vld [vmem:[%s12369_s0 + $0x828] sm:$0xff]  }
 0x17f   :  { %8635 = vmatprep.mubr.msk.bf16.mxu0 %vm2042_vm0, %v9293_v53  ;;  %8963 = vmatprep.mubr.msk.bf16.mxu1 %vm2042_vm0, %v9294_v7  ;;  %v9297_v53 = vld [vmem:[%s12369_s0 + $0x310] sm:$0xff]  }
 0x180   :  { %v9298_v7 = vld [vmem:[%s12369_s0 + $0x830] sm:$0xff]  }
 0x181   :  { %v10574_v46 = vpop.f32.mrb[84].mxu0  ;;  %v10576_v18 = vpop.f32.mrb[84].mxu1 }
 0x182   :  { %12497 = vst [vmem:[#allocation126_spill] sm:$0xff] %v10574_v46  ;;  %12498 = vst [vmem:[#allocation127_spill] sm:$0xff] %v10576_v18  ;;  %v10578_v34 = vpop.f32.mrb[85].mxu0  ;;  %v10586_v48 = vpop.f32.mrb[85].mxu1 }
 0x183   :  { %12499 = vst [vmem:[#allocation128_spill] sm:$0xff] %v10578_v34  ;;  %12500 = vst [vmem:[#allocation129_spill] sm:$0xff] %v10586_v48  ;;  %v10588_v56 = vpop.f32.mrb[86].mxu0  ;;  %v10596_v18 = vpop.f32.mrb[86].mxu1 }
 0x184   :  { %12501 = vst [vmem:[#allocation130_spill] sm:$0xff] %v10588_v56  ;;  %12502 = vst [vmem:[#allocation131_spill] sm:$0xff] %v10596_v18  ;;  %v10598_v34 = vpop.f32.mrb[87].mxu0  ;;  %v10600_v46 = vpop.f32.mrb[87].mxu1 }
 0x185   :  { %12503 = vst [vmem:[#allocation132_spill] sm:$0xff] %v10598_v34  ;;  %12504 = vst [vmem:[#allocation133_spill] sm:$0xff] %v10600_v46  ;;  %v9299_v34 = vld [vmem:[%s12369_s0 + $0x318] sm:$0xff]  }
 0x186   :  { %8636 = vmatmul.mubr.msk.bf16.gmra.mrb[192].mxu0 %vm2042_vm0, %v9295_v38  ;;  %8964 = vmatmul.mubr.msk.bf16.gmra.mrb[192].mxu1 %vm2042_vm0, %v9296_v39  ;;  %v9300_v38 = vld [vmem:[%s12369_s0 + $0x838] sm:$0xff]  }
 0x187   :  { %8639 = vmatprep.mubr.msk.bf16.mxu0 %vm2042_vm0, %v9297_v53  ;;  %8967 = vmatprep.mubr.msk.bf16.mxu1 %vm2042_vm0, %v9298_v7  ;;  %v9301_v53 = vld [vmem:[%s12369_s0 + $0x320] sm:$0xff]  }
 0x188   :  { %v9302_v7 = vld [vmem:[%s12369_s0 + $0x840] sm:$0xff]  }
 0x189   :  { %v10606_v48 = vpop.f32.mrb[88].mxu0  ;;  %v10608_v56 = vpop.f32.mrb[88].mxu1 }
 0x18a   :  { %12505 = vst [vmem:[#allocation134_spill] sm:$0xff] %v10606_v48  ;;  %12506 = vst [vmem:[#allocation135_spill] sm:$0xff] %v10608_v56  ;;  %v10610_v23 = vpop.f32.mrb[89].mxu0  ;;  %v10618_v46 = vpop.f32.mrb[89].mxu1 }
 0x18b   :  { %12507 = vst [vmem:[#allocation136_spill] sm:$0xff] %v10610_v23  ;;  %12508 = vst [vmem:[#allocation137_spill] sm:$0xff] %v10618_v46  ;;  %v10620_v39 = vpop.f32.mrb[90].mxu0  ;;  %v10628_v56 = vpop.f32.mrb[90].mxu1 }
 0x18c   :  { %12509 = vst [vmem:[#allocation138_spill] sm:$0xff] %v10620_v39  ;;  %12510 = vst [vmem:[#allocation139_spill] sm:$0xff] %v10628_v56  ;;  %v10630_v23 = vpop.f32.mrb[91].mxu0  ;;  %v10632_v48 = vpop.f32.mrb[91].mxu1 }
 0x18d   :  { %12511 = vst [vmem:[#allocation140_spill] sm:$0xff] %v10630_v23  ;;  %12512 = vst [vmem:[#allocation141_spill] sm:$0xff] %v10632_v48  ;;  %v9303_v23 = vld [vmem:[%s12369_s0 + $0x328] sm:$0xff]  }
 0x18e   :  { %8640 = vmatmul.mubr.msk.bf16.gmra.mrb[196].mxu0 %vm2042_vm0, %v9299_v34  ;;  %8968 = vmatmul.mubr.msk.bf16.gmra.mrb[196].mxu1 %vm2042_vm0, %v9300_v38  ;;  %v9304_v34 = vld [vmem:[%s12369_s0 + $0x848] sm:$0xff]  }
 0x18f   :  { %8643 = vmatprep.mubr.msk.bf16.mxu0 %vm2042_vm0, %v9301_v53  ;;  %8971 = vmatprep.mubr.msk.bf16.mxu1 %vm2042_vm0, %v9302_v7  ;;  %v9305_v53 = vld [vmem:[%s12369_s0 + $0x330] sm:$0xff]  }
 0x190   :  { %v9306_v7 = vld [vmem:[%s12369_s0 + $0x850] sm:$0xff]  }
 0x191   :  { %v10638_v39 = vpop.f32.mrb[92].mxu0  ;;  %v10640_v46 = vpop.f32.mrb[92].mxu1 }
 0x192   :  { %12513 = vst [vmem:[#allocation142_spill] sm:$0xff] %v10638_v39  ;;  %12514 = vst [vmem:[#allocation143_spill] sm:$0xff] %v10640_v46  ;;  %v10642_v18 = vpop.f32.mrb[93].mxu0  ;;  %v10650_v48 = vpop.f32.mrb[93].mxu1 }
 0x193   :  { %12515 = vst [vmem:[#allocation144_spill] sm:$0xff] %v10642_v18  ;;  %12516 = vst [vmem:[#allocation145_spill] sm:$0xff] %v10650_v48  ;;  %v10652_v38 = vpop.f32.mrb[94].mxu0  ;;  %v10660_v46 = vpop.f32.mrb[94].mxu1 }
 0x194   :  { %12517 = vst [vmem:[#allocation146_spill] sm:$0xff] %v10652_v38  ;;  %12518 = vst [vmem:[#allocation147_spill] sm:$0xff] %v10660_v46  ;;  %v10662_v18 = vpop.f32.mrb[95].mxu0  ;;  %v10664_v39 = vpop.f32.mrb[95].mxu1 }
 0x195   :  { %12519 = vst [vmem:[#allocation148_spill] sm:$0xff] %v10662_v18  ;;  %12520 = vst [vmem:[#allocation149_spill] sm:$0xff] %v10664_v39  ;;  %v9307_v18 = vld [vmem:[%s12369_s0 + $0x338] sm:$0xff]  }
 0x196   :  { %8644 = vmatmul.mubr.msk.bf16.gmra.mrb[200].mxu0 %vm2042_vm0, %v9303_v23  ;;  %8972 = vmatmul.mubr.msk.bf16.gmra.mrb[200].mxu1 %vm2042_vm0, %v9304_v34  ;;  %v9308_v23 = vld [vmem:[%s12369_s0 + $0x858] sm:$0xff]  }
 0x197   :  { %8647 = vmatprep.mubr.msk.bf16.mxu0 %vm2042_vm0, %v9305_v53  ;;  %8975 = vmatprep.mubr.msk.bf16.mxu1 %vm2042_vm0, %v9306_v7  ;;  %v9309_v53 = vld [vmem:[%s12369_s0 + $0x340] sm:$0xff]  }
 0x198   :  { %v9310_v7 = vld [vmem:[%s12369_s0 + $0x860] sm:$0xff]  }
 0x199   :  { %v10670_v48 = vpop.f32.mrb[96].mxu0  ;;  %v10672_v38 = vpop.f32.mrb[96].mxu1 }
 0x19a   :  { %12521 = vst [vmem:[#allocation150_spill] sm:$0xff] %v10670_v48  ;;  %12522 = vst [vmem:[#allocation151_spill] sm:$0xff] %v10672_v38  ;;  %v10674_v56 = vpop.f32.mrb[97].mxu0  ;;  %v10682_v39 = vpop.f32.mrb[97].mxu1 }
 0x19b   :  { %12523 = vst [vmem:[#allocation152_spill] sm:$0xff] %v10674_v56  ;;  %12524 = vst [vmem:[#allocation153_spill] sm:$0xff] %v10682_v39  ;;  %v10684_v34 = vpop.f32.mrb[98].mxu0  ;;  %v10692_v38 = vpop.f32.mrb[98].mxu1 }
 0x19c   :  { %12525 = vst [vmem:[#allocation154_spill] sm:$0xff] %v10684_v34  ;;  %12526 = vst [vmem:[#allocation155_spill] sm:$0xff] %v10692_v38  ;;  %v10694_v56 = vpop.f32.mrb[99].mxu0  ;;  %v10696_v48 = vpop.f32.mrb[99].mxu1 }
 0x19d   :  { %12527 = vst [vmem:[#allocation156_spill] sm:$0xff] %v10694_v56  ;;  %12528 = vst [vmem:[#allocation157_spill] sm:$0xff] %v10696_v48  ;;  %v9311_v56 = vld [vmem:[%s12369_s0 + $0x348] sm:$0xff]  }
 0x19e   :  { %8648 = vmatmul.mubr.msk.bf16.gmra.mrb[204].mxu0 %vm2042_vm0, %v9307_v18  ;;  %8976 = vmatmul.mubr.msk.bf16.gmra.mrb[204].mxu1 %vm2042_vm0, %v9308_v23  ;;  %v9312_v18 = vld [vmem:[%s12369_s0 + $0x868] sm:$0xff]  }
 0x19f   :  { %8651 = vmatprep.mubr.msk.bf16.mxu0 %vm2042_vm0, %v9309_v53  ;;  %8979 = vmatprep.mubr.msk.bf16.mxu1 %vm2042_vm0, %v9310_v7  ;;  %v9313_v53 = vld [vmem:[%s12369_s0 + $0x350] sm:$0xff]  }
 0x1a0   :  { %v9314_v7 = vld [vmem:[%s12369_s0 + $0x870] sm:$0xff]  }
 0x1a1   :  { %v10702_v39 = vpop.f32.mrb[100].mxu0  ;;  %v10704_v34 = vpop.f32.mrb[100].mxu1 }
 0x1a2   :  { %12529 = vst [vmem:[#allocation158_spill] sm:$0xff] %v10702_v39  ;;  %12530 = vst [vmem:[#allocation159_spill] sm:$0xff] %v10704_v34  ;;  %v10706_v46 = vpop.f32.mrb[101].mxu0  ;;  %v10714_v48 = vpop.f32.mrb[101].mxu1 }
 0x1a3   :  { %12531 = vst [vmem:[#allocation160_spill] sm:$0xff] %v10706_v46  ;;  %12532 = vst [vmem:[#allocation161_spill] sm:$0xff] %v10714_v48  ;;  %v10716_v23 = vpop.f32.mrb[102].mxu0  ;;  %v10724_v34 = vpop.f32.mrb[102].mxu1 }
 0x1a4   :  { %12533 = vst [vmem:[#allocation162_spill] sm:$0xff] %v10716_v23  ;;  %12534 = vst [vmem:[#allocation163_spill] sm:$0xff] %v10724_v34  ;;  %v10726_v46 = vpop.f32.mrb[103].mxu0  ;;  %v10728_v39 = vpop.f32.mrb[103].mxu1 }
 0x1a5   :  { %12535 = vst [vmem:[#allocation164_spill] sm:$0xff] %v10726_v46  ;;  %12536 = vst [vmem:[#allocation165_spill] sm:$0xff] %v10728_v39  ;;  %v9315_v46 = vld [vmem:[%s12369_s0 + $0x358] sm:$0xff]  }
 0x1a6   :  { %8652 = vmatmul.mubr.msk.bf16.gmra.mrb[208].mxu0 %vm2042_vm0, %v9311_v56  ;;  %8980 = vmatmul.mubr.msk.bf16.gmra.mrb[208].mxu1 %vm2042_vm0, %v9312_v18  ;;  %v9316_v56 = vld [vmem:[%s12369_s0 + $0x878] sm:$0xff]  }
 0x1a7   :  { %8655 = vmatprep.mubr.msk.bf16.mxu0 %vm2042_vm0, %v9313_v53  ;;  %8983 = vmatprep.mubr.msk.bf16.mxu1 %vm2042_vm0, %v9314_v7  ;;  %v9317_v53 = vld [vmem:[%s12369_s0 + $0x360] sm:$0xff]  }
 0x1a8   :  { %v9318_v7 = vld [vmem:[%s12369_s0 + $0x880] sm:$0xff]  }
 0x1a9   :  { %v10734_v48 = vpop.f32.mrb[104].mxu0  ;;  %v10736_v23 = vpop.f32.mrb[104].mxu1 }
 0x1aa   :  { %12537 = vst [vmem:[#allocation166_spill] sm:$0xff] %v10734_v48  ;;  %12538 = vst [vmem:[#allocation167_spill] sm:$0xff] %v10736_v23  ;;  %v10738_v38 = vpop.f32.mrb[105].mxu0  ;;  %v10746_v39 = vpop.f32.mrb[105].mxu1 }
 0x1ab   :  { %12539 = vst [vmem:[#allocation168_spill] sm:$0xff] %v10738_v38  ;;  %12540 = vst [vmem:[#allocation169_spill] sm:$0xff] %v10746_v39  ;;  %v10748_v18 = vpop.f32.mrb[106].mxu0  ;;  %v10756_v23 = vpop.f32.mrb[106].mxu1  ;;  %v9366_v39 = vld [vmem:[%s12368_s2 + $0x50] sm:$0xff]  }
 0x1ac   :  { %12541 = vst [vmem:[#allocation170_spill] sm:$0xff] %v10748_v18  ;;  %12542 = vst [vmem:[#allocation171_spill] sm:$0xff] %v10756_v23  ;;  %v10758_v38 = vpop.f32.mrb[107].mxu0  ;;  %v10760_v48 = vpop.f32.mrb[107].mxu1  ;;  %v9368_v23 = vld [vmem:[%s12368_s2 + $0x10] sm:$0xff]   ;;  %8349 = vmatprep.subr.bf16.mxu1 %v9366_v39 }
 0x1ad   :  { %12543 = vst [vmem:[#allocation172_spill] sm:$0xff] %v10758_v38  ;;  %12544 = vst [vmem:[#allocation173_spill] sm:$0xff] %v10760_v48  ;;  %8350 = vmatpush3.bf16.msra.mxu1 %v9368_v23  ;;  %v9322_v39 = vld [vmem:[%s12369_s0 + $0x890] sm:$0xff]  }
 0x1ae   :  { %8656 = vmatmul.mubr.msk.bf16.gmra.mrb[212].mxu0 %vm2042_vm0, %v9315_v46  ;;  %8984 = vmatmul.mubr.msk.bf16.gmra.mrb[212].mxu1 %vm2042_vm0, %v9316_v56  ;;  %v9319_v56 = vld [vmem:[%s12369_s0 + $0x368] sm:$0xff]  }
 0x1af   :  { %8659 = vmatprep.mubr.msk.bf16.mxu0 %vm2042_vm0, %v9317_v53  ;;  %8987 = vmatprep.mubr.msk.bf16.mxu1 %vm2042_vm0, %v9318_v7  ;;  %v9320_v53 = vld [vmem:[%s12369_s0 + $0x888] sm:$0xff]  }
 0x1b1   :  { %v10772_v18 = vpop.f32.mrb[108].mxu0  ;;  %v10774_v38 = vpop.f32.mrb[108].mxu1 }
 0x1b2   :  { %12545 = vst [vmem:[#allocation174_spill] sm:$0xff] %v10772_v18  ;;  %12546 = vst [vmem:[#allocation175_spill] sm:$0xff] %v10774_v38  ;;  %v10776_v46 = vpop.f32.mrb[109].mxu0  ;;  %v10784_v7 = vpop.f32.mrb[109].mxu1  ;;  %v9321_v38 = vld [vmem:[%s12369_s0 + $0x370] sm:$0xff]  }
 0x1b3   :  { %12547 = vst [vmem:[#allocation176_spill] sm:$0xff] %v10776_v46  ;;  %12548 = vst [vmem:[#allocation177_spill] sm:$0xff] %v10784_v7  ;;  %v10786_v48 = vpop.f32.mrb[110].mxu0  ;;  %v10794_v46 = vpop.f32.mrb[110].mxu1 }
 0x1b4   :  { %12549 = vst [vmem:[#allocation178_spill] sm:$0xff] %v10786_v48  ;;  %12550 = vst [vmem:[#allocation179_spill] sm:$0xff] %v10794_v46  ;;  %v10796_v18 = vpop.f32.mrb[111].mxu0  ;;  %v10798_v34 = vpop.f32.mrb[111].mxu1  ;;  %v9323_v46 = vld [vmem:[%s12369_s0 + $0x378] sm:$0xff]  }
 0x1b5   :  { %12551 = vst [vmem:[#allocation180_spill] sm:$0xff] %v10796_v18  ;;  %12552 = vst [vmem:[#allocation181_spill] sm:$0xff] %v10798_v34 }
 0x1b6   :  { %8660 = vmatmul.mubr.msk.bf16.gmra.mrb[216].mxu0 %vm2042_vm0, %v9319_v56  ;;  %8988 = vmatmul.mubr.msk.bf16.gmra.mrb[216].mxu1 %vm2042_vm0, %v9320_v53  ;;  %v9324_v56 = vld [vmem:[%s12369_s0 + $0x898] sm:$0xff]  }
 0x1b7   :  { %8663 = vmatprep.mubr.msk.bf16.mxu0 %vm2042_vm0, %v9321_v38  ;;  %8991 = vmatprep.mubr.msk.bf16.mxu1 %vm2042_vm0, %v9322_v39  ;;  %v9325_v38 = vld [vmem:[%s12369_s0 + $0x380] sm:$0xff]  }
 0x1b8   :  { %v9326_v39 = vld [vmem:[%s12369_s0 + $0x8a0] sm:$0xff]  }
 0x1b9   :  { %v10804_v23 = vpop.f32.mrb[112].mxu0  ;;  %v10806_v7 = vpop.f32.mrb[112].mxu1 }
 0x1ba   :  { %12553 = vst [vmem:[#allocation182_spill] sm:$0xff] %v10804_v23  ;;  %12554 = vst [vmem:[#allocation183_spill] sm:$0xff] %v10806_v7  ;;  %v10808_v48 = vpop.f32.mrb[113].mxu0  ;;  %v10816_v34 = vpop.f32.mrb[113].mxu1 }
 0x1bb   :  { %12555 = vst [vmem:[#allocation184_spill] sm:$0xff] %v10808_v48  ;;  %12556 = vst [vmem:[#allocation185_spill] sm:$0xff] %v10816_v34  ;;  %v10818_v53 = vpop.f32.mrb[114].mxu0  ;;  %v10826_v7 = vpop.f32.mrb[114].mxu1 }
 0x1bc   :  { %12557 = vst [vmem:[#allocation186_spill] sm:$0xff] %v10818_v53  ;;  %12558 = vst [vmem:[#allocation187_spill] sm:$0xff] %v10826_v7  ;;  %v10828_v48 = vpop.f32.mrb[115].mxu0  ;;  %v10830_v23 = vpop.f32.mrb[115].mxu1  ;;  %v9327_v7 = vld [vmem:[%s12369_s0 + $0x388] sm:$0xff]  }
 0x1bd   :  { %12559 = vst [vmem:[#allocation188_spill] sm:$0xff] %v10828_v48  ;;  %12560 = vst [vmem:[#allocation189_spill] sm:$0xff] %v10830_v23 }
 0x1be   :  { %8664 = vmatmul.mubr.msk.bf16.gmra.mrb[220].mxu0 %vm2042_vm0, %v9323_v46  ;;  %8992 = vmatmul.mubr.msk.bf16.gmra.mrb[220].mxu1 %vm2042_vm0, %v9324_v56  ;;  %v9328_v46 = vld [vmem:[%s12369_s0 + $0x8a8] sm:$0xff]  }
 0x1bf   :  { %8667 = vmatprep.mubr.msk.bf16.mxu0 %vm2042_vm0, %v9325_v38  ;;  %8995 = vmatprep.mubr.msk.bf16.mxu1 %vm2042_vm0, %v9326_v39  ;;  %v9329_v38 = vld [vmem:[%s12369_s0 + $0x390] sm:$0xff]  }
 0x1c0   :  { %v9330_v39 = vld [vmem:[%s12369_s0 + $0x8b0] sm:$0xff]  }
 0x1c1   :  { %v10836_v34 = vpop.f32.mrb[116].mxu0  ;;  %v10838_v53 = vpop.f32.mrb[116].mxu1 }
 0x1c2   :  { %12561 = vst [vmem:[#allocation190_spill] sm:$0xff] %v10836_v34  ;;  %12562 = vst [vmem:[#allocation191_spill] sm:$0xff] %v10838_v53  ;;  %v10840_v18 = vpop.f32.mrb[117].mxu0  ;;  %v10848_v23 = vpop.f32.mrb[117].mxu1 }
 0x1c3   :  { %12563 = vst [vmem:[#allocation192_spill] sm:$0xff] %v10840_v18  ;;  %12564 = vst [vmem:[#allocation193_spill] sm:$0xff] %v10848_v23  ;;  %v10850_v56 = vpop.f32.mrb[118].mxu0  ;;  %v10858_v53 = vpop.f32.mrb[118].mxu1 }
 0x1c4   :  { %12565 = vst [vmem:[#allocation194_spill] sm:$0xff] %v10850_v56  ;;  %12566 = vst [vmem:[#allocation195_spill] sm:$0xff] %v10858_v53  ;;  %v10860_v18 = vpop.f32.mrb[119].mxu0  ;;  %v10862_v34 = vpop.f32.mrb[119].mxu1  ;;  %v9331_v53 = vld [vmem:[%s12369_s0 + $0x398] sm:$0xff]  }
 0x1c5   :  { %12567 = vst [vmem:[#allocation196_spill] sm:$0xff] %v10860_v18  ;;  %12568 = vst [vmem:[#allocation197_spill] sm:$0xff] %v10862_v34 }
 0x1c6   :  { %8668 = vmatmul.mubr.msk.bf16.gmra.mrb[224].mxu0 %vm2042_vm0, %v9327_v7  ;;  %8996 = vmatmul.mubr.msk.bf16.gmra.mrb[224].mxu1 %vm2042_vm0, %v9328_v46  ;;  %v9332_v7 = vld [vmem:[%s12369_s0 + $0x8b8] sm:$0xff]  }
 0x1c7   :  { %8671 = vmatprep.mubr.msk.bf16.mxu0 %vm2042_vm0, %v9329_v38  ;;  %8999 = vmatprep.mubr.msk.bf16.mxu1 %vm2042_vm0, %v9330_v39  ;;  %v9333_v38 = vld [vmem:[%s12369_s0 + $0x3a0] sm:$0xff]  }
 0x1c8   :  { %v9334_v39 = vld [vmem:[%s12369_s0 + $0x8c0] sm:$0xff]  }
 0x1c9   :  { %v10868_v23 = vpop.f32.mrb[120].mxu0  ;;  %v10870_v56 = vpop.f32.mrb[120].mxu1 }
 0x1ca   :  { %12569 = vst [vmem:[#allocation198_spill] sm:$0xff] %v10868_v23  ;;  %12570 = vst [vmem:[#allocation199_spill] sm:$0xff] %v10870_v56  ;;  %v10872_v48 = vpop.f32.mrb[121].mxu0  ;;  %v10880_v34 = vpop.f32.mrb[121].mxu1 }
 0x1cb   :  { %12571 = vst [vmem:[#allocation200_spill] sm:$0xff] %v10872_v48  ;;  %12572 = vst [vmem:[#allocation201_spill] sm:$0xff] %v10880_v34  ;;  %v10882_v46 = vpop.f32.mrb[122].mxu0  ;;  %v10890_v56 = vpop.f32.mrb[122].mxu1 }
 0x1cc   :  { %12573 = vst [vmem:[#allocation202_spill] sm:$0xff] %v10882_v46  ;;  %12574 = vst [vmem:[#allocation203_spill] sm:$0xff] %v10890_v56  ;;  %v10892_v48 = vpop.f32.mrb[123].mxu0  ;;  %v10894_v23 = vpop.f32.mrb[123].mxu1  ;;  %v9335_v56 = vld [vmem:[%s12369_s0 + $0x3a8] sm:$0xff]  }
 0x1cd   :  { %12575 = vst [vmem:[#allocation204_spill] sm:$0xff] %v10892_v48  ;;  %12576 = vst [vmem:[#allocation205_spill] sm:$0xff] %v10894_v23 }
 0x1ce   :  { %8672 = vmatmul.mubr.msk.bf16.gmra.mrb[228].mxu0 %vm2042_vm0, %v9331_v53  ;;  %9000 = vmatmul.mubr.msk.bf16.gmra.mrb[228].mxu1 %vm2042_vm0, %v9332_v7  ;;  %v9336_v53 = vld [vmem:[%s12369_s0 + $0x8c8] sm:$0xff]  }
 0x1cf   :  { %8675 = vmatprep.mubr.msk.bf16.mxu0 %vm2042_vm0, %v9333_v38  ;;  %9003 = vmatprep.mubr.msk.bf16.mxu1 %vm2042_vm0, %v9334_v39  ;;  %v9337_v38 = vld [vmem:[%s12369_s0 + $0x3b0] sm:$0xff]  }
 0x1d0   :  { %v9338_v39 = vld [vmem:[%s12369_s0 + $0x8d0] sm:$0xff]  }
 0x1d1   :  { %v10900_v34 = vpop.f32.mrb[124].mxu0  ;;  %v10902_v46 = vpop.f32.mrb[124].mxu1 }
 0x1d2   :  { %12577 = vst [vmem:[#allocation206_spill] sm:$0xff] %v10900_v34  ;;  %12578 = vst [vmem:[#allocation207_spill] sm:$0xff] %v10902_v46  ;;  %v10904_v18 = vpop.f32.mrb[125].mxu0  ;;  %v10912_v23 = vpop.f32.mrb[125].mxu1 }
 0x1d3   :  { %12579 = vst [vmem:[#allocation208_spill] sm:$0xff] %v10904_v18  ;;  %12580 = vst [vmem:[#allocation209_spill] sm:$0xff] %v10912_v23  ;;  %v10914_v7 = vpop.f32.mrb[126].mxu0  ;;  %v10922_v46 = vpop.f32.mrb[126].mxu1 }
 0x1d4   :  { %12581 = vst [vmem:[#allocation210_spill] sm:$0xff] %v10914_v7  ;;  %12582 = vst [vmem:[#allocation211_spill] sm:$0xff] %v10922_v46  ;;  %v10924_v18 = vpop.f32.mrb[127].mxu0  ;;  %v10926_v34 = vpop.f32.mrb[127].mxu1  ;;  %v9339_v46 = vld [vmem:[%s12369_s0 + $0x3b8] sm:$0xff]  }
 0x1d5   :  { %12583 = vst [vmem:[#allocation212_spill] sm:$0xff] %v10924_v18  ;;  %12584 = vst [vmem:[#allocation213_spill] sm:$0xff] %v10926_v34 }
 0x1d6   :  { %8676 = vmatmul.mubr.msk.bf16.gmra.mrb[232].mxu0 %vm2042_vm0, %v9335_v56  ;;  %9004 = vmatmul.mubr.msk.bf16.gmra.mrb[232].mxu1 %vm2042_vm0, %v9336_v53  ;;  %v9340_v56 = vld [vmem:[%s12369_s0 + $0x8d8] sm:$0xff]  }
 0x1d7   :  { %8679 = vmatprep.mubr.msk.bf16.mxu0 %vm2042_vm0, %v9337_v38  ;;  %9007 = vmatprep.mubr.msk.bf16.mxu1 %vm2042_vm0, %v9338_v39  ;;  %v9341_v38 = vld [vmem:[%s12369_s0 + $0x3c0] sm:$0xff]  }
 0x1d8   :  { %v9342_v39 = vld [vmem:[%s12369_s0 + $0x8e0] sm:$0xff]  }
 0x1d9   :  { %v10932_v23 = vpop.f32.mrb[128].mxu0  ;;  %v10934_v7 = vpop.f32.mrb[128].mxu1 }
 0x1da   :  { %12585 = vst [vmem:[#allocation214_spill] sm:$0xff] %v10932_v23  ;;  %12586 = vst [vmem:[#allocation215_spill] sm:$0xff] %v10934_v7  ;;  %v10936_v48 = vpop.f32.mrb[129].mxu0  ;;  %v10944_v34 = vpop.f32.mrb[129].mxu1 }
 0x1db   :  { %12587 = vst [vmem:[#allocation216_spill] sm:$0xff] %v10936_v48  ;;  %12588 = vst [vmem:[#allocation217_spill] sm:$0xff] %v10944_v34  ;;  %v10946_v53 = vpop.f32.mrb[130].mxu0  ;;  %v10954_v7 = vpop.f32.mrb[130].mxu1 }
 0x1dc   :  { %12589 = vst [vmem:[#allocation218_spill] sm:$0xff] %v10946_v53  ;;  %12590 = vst [vmem:[#allocation219_spill] sm:$0xff] %v10954_v7  ;;  %v10956_v48 = vpop.f32.mrb[131].mxu0  ;;  %v10958_v23 = vpop.f32.mrb[131].mxu1  ;;  %v9343_v7 = vld [vmem:[%s12369_s0 + $0x3c8] sm:$0xff]  }
 0x1dd   :  { %12591 = vst [vmem:[#allocation220_spill] sm:$0xff] %v10956_v48  ;;  %12592 = vst [vmem:[#allocation221_spill] sm:$0xff] %v10958_v23 }
 0x1de   :  { %8680 = vmatmul.mubr.msk.bf16.gmra.mrb[236].mxu0 %vm2042_vm0, %v9339_v46  ;;  %9008 = vmatmul.mubr.msk.bf16.gmra.mrb[236].mxu1 %vm2042_vm0, %v9340_v56  ;;  %v9344_v46 = vld [vmem:[%s12369_s0 + $0x8e8] sm:$0xff]  }
 0x1df   :  { %8683 = vmatprep.mubr.msk.bf16.mxu0 %vm2042_vm0, %v9341_v38  ;;  %9011 = vmatprep.mubr.msk.bf16.mxu1 %vm2042_vm0, %v9342_v39  ;;  %v9345_v38 = vld [vmem:[%s12369_s0 + $0x3d0] sm:$0xff]  }
 0x1e0   :  { %v9346_v39 = vld [vmem:[%s12369_s0 + $0x8f0] sm:$0xff]  }
 0x1e1   :  { %v10964_v34 = vpop.f32.mrb[132].mxu0  ;;  %v10966_v53 = vpop.f32.mrb[132].mxu1 }
 0x1e2   :  { %12593 = vst [vmem:[#allocation222_spill] sm:$0xff] %v10964_v34  ;;  %12594 = vst [vmem:[#allocation223_spill] sm:$0xff] %v10966_v53  ;;  %v10968_v18 = vpop.f32.mrb[133].mxu0  ;;  %v10976_v23 = vpop.f32.mrb[133].mxu1 }
 0x1e3   :  { %12595 = vst [vmem:[#allocation224_spill] sm:$0xff] %v10968_v18  ;;  %12596 = vst [vmem:[#allocation225_spill] sm:$0xff] %v10976_v23  ;;  %v10978_v56 = vpop.f32.mrb[134].mxu0  ;;  %v10986_v53 = vpop.f32.mrb[134].mxu1 }
 0x1e4   :  { %12597 = vst [vmem:[#allocation226_spill] sm:$0xff] %v10978_v56  ;;  %12598 = vst [vmem:[#allocation227_spill] sm:$0xff] %v10986_v53  ;;  %v10988_v18 = vpop.f32.mrb[135].mxu0  ;;  %v10990_v34 = vpop.f32.mrb[135].mxu1  ;;  %v9347_v53 = vld [vmem:[%s12369_s0 + $0x3d8] sm:$0xff]  }
 0x1e5   :  { %12599 = vst [vmem:[#allocation228_spill] sm:$0xff] %v10988_v18  ;;  %12600 = vst [vmem:[#allocation229_spill] sm:$0xff] %v10990_v34 }
 0x1e6   :  { %8684 = vmatmul.mubr.msk.bf16.gmra.mrb[240].mxu0 %vm2042_vm0, %v9343_v7  ;;  %9012 = vmatmul.mubr.msk.bf16.gmra.mrb[240].mxu1 %vm2042_vm0, %v9344_v46  ;;  %v9348_v7 = vld [vmem:[%s12369_s0 + $0x8f8] sm:$0xff]  }
 0x1e7   :  { %8687 = vmatprep.mubr.msk.bf16.mxu0 %vm2042_vm0, %v9345_v38  ;;  %9015 = vmatprep.mubr.msk.bf16.mxu1 %vm2042_vm0, %v9346_v39  ;;  %v9351_v39 = vld [vmem:[%s12369_s0 + $0x3e0] sm:$0xff]  }
 0x1e9   :  { %v10996_v23 = vpop.f32.mrb[136].mxu0  ;;  %v10998_v56 = vpop.f32.mrb[136].mxu1 }
 0x1ea   :  { %12601 = vst [vmem:[#allocation230_spill] sm:$0xff] %v10996_v23  ;;  %12602 = vst [vmem:[#allocation231_spill] sm:$0xff] %v10998_v56  ;;  %v11000_v48 = vpop.f32.mrb[137].mxu0  ;;  %v11008_v34 = vpop.f32.mrb[137].mxu1 }
 0x1eb   :  { %12603 = vst [vmem:[#allocation232_spill] sm:$0xff] %v11000_v48  ;;  %12604 = vst [vmem:[#allocation233_spill] sm:$0xff] %v11008_v34  ;;  %v11010_v46 = vpop.f32.mrb[138].mxu0  ;;  %v11012_v38 = vpop.f32.mrb[138].mxu1  ;;  %v9383_v34 = vld [vmem:[%s12368_s2 + $0x58] sm:$0xff]  }
 0x1ec   :  { %12605 = vst [vmem:[#allocation234_spill] sm:$0xff] %v11010_v46  ;;  %12606 = vst [vmem:[#allocation235_spill] sm:$0xff] %v11012_v38  ;;  %v11017_v56 = vpop.f32.mrb[139].mxu0  ;;  %v11019_v48 = vpop.f32.mrb[139].mxu1  ;;  %8351 = vmatprep.subr.bf16.mxu1 %v9383_v34  ;;  %v5244_v34 = vmax.f32 %v9901_v49, 0.0  ;;  %v5573_v49 = vmax.f32 %v9970_v10, 0.0 }
 0x1ed   :  { %12607 = vst [vmem:[#allocation236_spill] sm:$0xff] %v11017_v56  ;;  %12608 = vst [vmem:[#allocation237_spill] sm:$0xff] %v11019_v48  ;;  %v9384_v56 = vld [vmem:[%s12368_s2 + $0x18] sm:$0xff]  }
 0x1ee   :  { %8688 = vmatmul.mubr.msk.bf16.gmra.mrb[244].mxu0 %vm2042_vm0, %v9347_v53  ;;  %9016 = vmatmul.mubr.msk.bf16.gmra.mrb[244].mxu1 %vm2042_vm0, %v9348_v7  ;;  %v9352_v53 = vld [vmem:[%s12369_s0 + $0x3e8] sm:$0xff]  }
 0x1ef   :  { %8691 = vmatprep.mubr.msk.bf16.mxu0 %vm2042_vm0, %v9351_v39  ;;  %8352 = vmatpush3.bf16.msra.mxu1 %v9384_v56  ;;  %v5572_v56 = vmax.f32 %v9956_v4, 0.0  ;;  %v9355_v4 = vld [vmem:[%s12369_s0 + $0x400] sm:$0xff]  }
 0x1f1   :  { %v11027_v46 = vpop.f32.mrb[140].mxu0  ;;  %v11029_v38 = vpop.f32.mrb[140].mxu1 }
 0x1f2   :  { %12609 = vst [vmem:[#allocation238_spill] sm:$0xff] %v11027_v46  ;;  %12610 = vst [vmem:[#allocation239_spill] sm:$0xff] %v11029_v38  ;;  %v11034_v23 = vpop.f32.mrb[141].mxu0  ;;  %v11039_v7 = vpop.f32.mrb[141].mxu1  ;;  %v9353_v38 = vld [vmem:[%s12369_s0 + $0x3f0] sm:$0xff]  }
 0x1f3   :  { %12611 = vst [vmem:[#allocation240_spill] sm:$0xff] %v11034_v23  ;;  %12612 = vst [vmem:[#allocation241_spill] sm:$0xff] %v11039_v7  ;;  %v11041_v39 = vpop.f32.mrb[142].mxu0  ;;  %v11043_v48 = vpop.f32.mrb[142].mxu1  ;;  %v5246_v7 = vmax.f32 %v9896_v47, 0.0  ;;  %v5574_v23 = vmax.f32 %v9946_v0, 0.0 }
 0x1f4   :  { %12613 = vst [vmem:[#allocation242_spill] sm:$0xff] %v11041_v39  ;;  %12614 = vst [vmem:[#allocation243_spill] sm:$0xff] %v11043_v48  ;;  %v11048_v46 = vpop.f32.mrb[143].mxu0  ;;  %v11050_v18 = vpop.f32.mrb[143].mxu1  ;;  %v5247_v39 = vmax.f32 %v9906_v51, 0.0  ;;  %v5245_v48 = vmax.f32 %v9914_v54, 0.0 }
 0x1f5   :  { %12615 = vst [vmem:[#allocation244_spill] sm:$0xff] %v11048_v46  ;;  %12616 = vst [vmem:[#allocation245_spill] sm:$0xff] %v11050_v18  ;;  %v5575_v18 = vmax.f32 %v9966_v8, 0.0  ;;  %v9354_v47 = vld [vmem:[%s12369_s0 + $0x3f8] sm:$0xff]  }
 0x1f6   :  { %8692 = vmatmul.mubr.msk.bf16.gmra.mrb[248].mxu0 %vm2042_vm0, %v9352_v53 }
 0x1f7   :  { %8695 = vmatprep.mubr.msk.bf16.mxu0 %vm2042_vm0, %v9353_v38 }
 0x1f9   :  { %v8589_v35 = vpop.f32.mrb[144].mxu0  ;;  %v8917_v46 = vpop.f32.mrb[144].mxu1 }
 0x1fa   :  { %v5390_v19 = vmax.f32 %v8589_v35, 0.0  ;;  %v5718_v53 = vmax.f32 %v8917_v46, 0.0  ;;  %v3517_v22 = vpop.f32.mrb[145].mxu0  ;;  %v4829_v38 = vpop.f32.mrb[145].mxu1 }
 0x1fb   :  { %v5388_v51 = vmax.f32 %v3517_v22, 0.0  ;;  %v5716_v54 = vmax.f32 %v4829_v38, 0.0  ;;  %v8590_v6 = vpop.f32.mrb[146].mxu0  ;;  %v8918_v0 = vpop.f32.mrb[146].mxu1 }
 0x1fc   :  { %v11068_v3 = vmax.f32 %v5246_v7, %v5390_v19  ;;  %v11070_v8 = vmax.f32 %v5574_v23, %v5718_v53  ;;  %v5391_v35 = vmax.f32 %v8590_v6, 0.0  ;;  %v5719_v46 = vmax.f32 %v8918_v0, 0.0  ;;  %v3520_v2 = vpop.f32.mrb[147].mxu0  ;;  %v4832_v61 = vpop.f32.mrb[147].mxu1 }
 0x1fd   :  { %v11072_v60 = vmax.f32 %v5244_v34, %v5388_v51  ;;  %v11074_v58 = vmax.f32 %v5572_v56, %v5716_v54  ;;  %v5389_v10 = vmax.f32 %v3520_v2, 0.0  ;;  %v5717_v22 = vmax.f32 %v4832_v61, 0.0 }
 0x1fe   :  { %12617 = vst [vmem:[#allocation246_spill] sm:$0xff] %v11068_v3  ;;  %v11076_v38 = vmax.f32 %v5247_v39, %v5391_v35  ;;  %v11078_v50 = vmax.f32 %v5575_v18, %v5719_v46  ;;  %8696 = vmatmul.mubr.msk.bf16.gmra.mrb[252].mxu0 %vm2042_vm0, %v9354_v47  ;;  %v5250_v6 = vmax.f32 %v9920_v55, 0.0  ;;  %v5248_v7 = vmax.f32 %v9925_v57, 0.0  ;;  %v9356_v55 = vld [vmem:[%s12369_s0 + $0x408] sm:$0xff]  }
 0x1ff   :  { %12618 = vst [vmem:[#allocation247_spill] sm:$0xff] %v11072_v60  ;;  %v11081_v19 = vmax.f32 %v5245_v48, %v5389_v10  ;;  %v11083_v23 = vmax.f32 %v5573_v49, %v5717_v22  ;;  %8699 = vmatprep.mubr.msk.bf16.mxu0 %vm2042_vm0, %v9355_v4  ;;  %v5251_v34 = vmax.f32 %v9930_v59, 0.0  ;;  %v5249_v61 = vmax.f32 %v9938_v62, 0.0 }
 0x200   :  { %12619 = vst [vmem:[#allocation248_spill] sm:$0xff] %v11076_v38  ;;  %v5578_v2 = vmax.f32 %v9972_v11, 0.0  ;;  %v5576_v18 = vmax.f32 %v9976_v12, 0.0  ;;  %v5579_v48 = vmax.f32 %v9980_v13, 0.0  ;;  %v5577_v57 = vmax.f32 %v9982_v14, 0.0  ;;  %v9357_v12 = vld [vmem:[%s12369_s0 + $0x410] sm:$0xff]  }
 0x201   :  { %12620 = vst [vmem:[#allocation249_spill] sm:$0xff] %v11081_v19  ;;  %v8593_v39 = vpop.f32.mrb[148].mxu0  ;;  %v8921_v56 = vpop.f32.mrb[148].mxu1 }
 0x202   :  { %v5394_v53 = vmax.f32 %v8593_v39, 0.0  ;;  %v5722_v47 = vmax.f32 %v8921_v56, 0.0  ;;  %v3533_v49 = vpop.f32.mrb[149].mxu0  ;;  %v4845_v51 = vpop.f32.mrb[149].mxu1 }
 0x203   :  { %v5392_v59 = vmax.f32 %v3533_v49, 0.0  ;;  %v5720_v62 = vmax.f32 %v4845_v51, 0.0  ;;  %v8594_v54 = vpop.f32.mrb[150].mxu0  ;;  %v8922_v11 = vpop.f32.mrb[150].mxu1 }
 0x204   :  { %v11100_v0 = vmax.f32 %v5250_v6, %v5394_v53  ;;  %v11102_v13 = vmax.f32 %v5578_v2, %v5722_v47  ;;  %v5395_v4 = vmax.f32 %v8594_v54, 0.0  ;;  %v5723_v35 = vmax.f32 %v8922_v11, 0.0  ;;  %v3536_v46 = vpop.f32.mrb[151].mxu0  ;;  %v4848_v10 = vpop.f32.mrb[151].mxu1 }
 0x205   :  { %v11104_v22 = vmax.f32 %v5248_v7, %v5392_v59  ;;  %v11106_v39 = vmax.f32 %v5576_v18, %v5720_v62  ;;  %v5393_v14 = vmax.f32 %v3536_v46, 0.0  ;;  %v5721_v56 = vmax.f32 %v4848_v10, 0.0 }
 0x206   :  { %12621 = vst [vmem:[#allocation250_spill] sm:$0xff] %v11100_v0  ;;  %v11108_v49 = vmax.f32 %v5251_v34, %v5395_v4  ;;  %v11110_v51 = vmax.f32 %v5579_v48, %v5723_v35  ;;  %8700 = vmatmul.mubr.msk.bf16.gmra.mrb[0].mxu0 %vm2042_vm0, %v9356_v55  ;;  %v5254_v53 = vmax.f32 %v9944_v63, 0.0  ;;  %v5252_v7 = vmax.f32 %v9948_v1, 0.0  ;;  %v9358_v63 = vld [vmem:[%s12369_s0 + $0x418] sm:$0xff]  }
 0x207   :  { %12622 = vst [vmem:[#allocation251_spill] sm:$0xff] %v11104_v22  ;;  %v11113_v6 = vmax.f32 %v5249_v61, %v5393_v14  ;;  %v11115_v2 = vmax.f32 %v5577_v57, %v5721_v56  ;;  %8703 = vmatprep.mubr.msk.bf16.mxu0 %vm2042_vm0, %v9357_v12  ;;  %v5255_v18 = vmax.f32 %v9958_v5, 0.0  ;;  %v5253_v47 = vmax.f32 %v9968_v9, 0.0 }
 0x208   :  { %12623 = vst [vmem:[#allocation252_spill] sm:$0xff] %v11108_v49  ;;  %v5582_v34 = vmax.f32 %v9986_v16, 0.0  ;;  %v5580_v48 = vmax.f32 %v9996_v20, 0.0  ;;  %v5583_v61 = vmax.f32 %v10006_v24, 0.0  ;;  %v5581_v1 = vmax.f32 %v10010_v26, 0.0  ;;  %v9359_v20 = vld [vmem:[%s12369_s0 + $0x420] sm:$0xff]  }
 0x209   :  { %12624 = vst [vmem:[#allocation253_spill] sm:$0xff] %v11113_v6  ;;  %v8597_v59 = vpop.f32.mrb[152].mxu0  ;;  %v8925_v55 = vpop.f32.mrb[152].mxu1 }
 0x20a   :  { %v5398_v57 = vmax.f32 %v8597_v59, 0.0  ;;  %v5726_v62 = vmax.f32 %v8925_v55, 0.0  ;;  %v3549_v54 = vpop.f32.mrb[153].mxu0  ;;  %v4861_v11 = vpop.f32.mrb[153].mxu1 }
 0x20b   :  { %v5396_v5 = vmax.f32 %v3549_v54, 0.0  ;;  %v5724_v9 = vmax.f32 %v4861_v11, 0.0  ;;  %v8598_v12 = vpop.f32.mrb[154].mxu0  ;;  %v8926_v16 = vpop.f32.mrb[154].mxu1 }
 0x20c   :  { %v11132_v4 = vmax.f32 %v5254_v53, %v5398_v57  ;;  %v11134_v24 = vmax.f32 %v5582_v34, %v5726_v62  ;;  %v5399_v35 = vmax.f32 %v8598_v12, 0.0  ;;  %v5727_v46 = vmax.f32 %v8926_v16, 0.0  ;;  %v3552_v10 = vpop.f32.mrb[155].mxu0  ;;  %v4864_v14 = vpop.f32.mrb[155].mxu1 }
 0x20d   :  { %v11136_v56 = vmax.f32 %v5252_v7, %v5396_v5  ;;  %v11138_v59 = vmax.f32 %v5580_v48, %v5724_v9  ;;  %v5397_v26 = vmax.f32 %v3552_v10, 0.0  ;;  %v5725_v55 = vmax.f32 %v4864_v14, 0.0 }
 0x20e   :  { %12625 = vst [vmem:[#allocation254_spill] sm:$0xff] %v11132_v4  ;;  %v11140_v54 = vmax.f32 %v5255_v18, %v5399_v35  ;;  %v11142_v11 = vmax.f32 %v5583_v61, %v5727_v46  ;;  %8704 = vmatmul.mubr.msk.bf16.gmra.mrb[4].mxu0 %vm2042_vm0, %v9358_v63  ;;  %v5258_v57 = vmax.f32 %v9984_v15, 0.0  ;;  %v5256_v7 = vmax.f32 %v9988_v17, 0.0  ;;  %v9360_v15 = vld [vmem:[%s12369_s0 + $0x428] sm:$0xff]  }
 0x20f   :  { %12626 = vst [vmem:[#allocation255_spill] sm:$0xff] %v11136_v56  ;;  %v11145_v53 = vmax.f32 %v5253_v47, %v5397_v26  ;;  %v11147_v34 = vmax.f32 %v5581_v1, %v5725_v55  ;;  %8707 = vmatprep.mubr.msk.bf16.mxu0 %vm2042_vm0, %v9359_v20  ;;  %v5259_v48 = vmax.f32 %v9998_v21, 0.0  ;;  %v5257_v62 = vmax.f32 %v10008_v25, 0.0 }
 0x210   :  { %12627 = vst [vmem:[#allocation256_spill] sm:$0xff] %v11140_v54  ;;  %v5586_v18 = vmax.f32 %v10012_v27, 0.0  ;;  %v5584_v61 = vmax.f32 %v10016_v28, 0.0  ;;  %v5587_v47 = vmax.f32 %v10020_v29, 0.0  ;;  %v5585_v17 = vmax.f32 %v10022_v30, 0.0  ;;  %v9361_v28 = vld [vmem:[%s12369_s0 + $0x430] sm:$0xff]  }
 0x211   :  { %12628 = vst [vmem:[#allocation257_spill] sm:$0xff] %v11145_v53  ;;  %v8601_v5 = vpop.f32.mrb[156].mxu0  ;;  %v8929_v63 = vpop.f32.mrb[156].mxu1 }
 0x212   :  { %v5402_v1 = vmax.f32 %v8601_v5, 0.0  ;;  %v5730_v9 = vmax.f32 %v8929_v63, 0.0  ;;  %v3565_v12 = vpop.f32.mrb[157].mxu0  ;;  %v4877_v16 = vpop.f32.mrb[157].mxu1 }
 0x213   :  { %v5400_v21 = vmax.f32 %v3565_v12, 0.0  ;;  %v5728_v25 = vmax.f32 %v4877_v16, 0.0  ;;  %v8602_v20 = vpop.f32.mrb[158].mxu0  ;;  %v8930_v27 = vpop.f32.mrb[158].mxu1 }
 0x214   :  { %v11164_v35 = vmax.f32 %v5258_v57, %v5402_v1  ;;  %v11166_v29 = vmax.f32 %v5586_v18, %v5730_v9  ;;  %v5403_v46 = vmax.f32 %v8602_v20, 0.0  ;;  %v5731_v10 = vmax.f32 %v8930_v27, 0.0  ;;  %v3568_v14 = vpop.f32.mrb[159].mxu0  ;;  %v4880_v26 = vpop.f32.mrb[159].mxu1 }
 0x215   :  { %v11168_v55 = vmax.f32 %v5256_v7, %v5400_v21  ;;  %v11170_v5 = vmax.f32 %v5584_v61, %v5728_v25  ;;  %v5401_v30 = vmax.f32 %v3568_v14, 0.0  ;;  %v5729_v63 = vmax.f32 %v4880_v26, 0.0 }
 0x216   :  { %12629 = vst [vmem:[#allocation258_spill] sm:$0xff] %v11164_v35  ;;  %v11172_v12 = vmax.f32 %v5259_v48, %v5403_v46  ;;  %v11174_v16 = vmax.f32 %v5587_v47, %v5731_v10  ;;  %8708 = vmatmul.mubr.msk.bf16.gmra.mrb[8].mxu0 %vm2042_vm0, %v9360_v15  ;;  %v5262_v1 = vmax.f32 %v10024_v31, 0.0  ;;  %v5590_v7 = vmax.f32 %v10026_v32, 0.0  ;;  %v9362_v31 = vld [vmem:[%s12369_s0 + $0x438] sm:$0xff]  }
 0x217   :  { %12630 = vst [vmem:[#allocation259_spill] sm:$0xff] %v11168_v55  ;;  %v11177_v57 = vmax.f32 %v5257_v62, %v5401_v30  ;;  %v11179_v18 = vmax.f32 %v5585_v17, %v5729_v63  ;;  %8711 = vmatprep.mubr.msk.bf16.mxu0 %vm2042_vm0, %v9361_v28  ;;  %v5260_v61 = vmax.f32 %v10028_v33, 0.0  ;;  %v5263_v9 = vmax.f32 %v10038_v37, 0.0 }
 0x218   :  { %12631 = vst [vmem:[#allocation260_spill] sm:$0xff] %v11172_v12  ;;  %v5588_v48 = vmax.f32 %v10036_v36, 0.0  ;;  %v5591_v47 = vmax.f32 %v10046_v40, 0.0  ;;  %v5261_v62 = vmax.f32 %v10048_v41, 0.0  ;;  %v5589_v32 = vmax.f32 %v10050_v42, 0.0  ;;  %v9363_v40 = vld [vmem:[%s12369_s0 + $0x440] sm:$0xff]  }
 0x219   :  { %12632 = vst [vmem:[#allocation261_spill] sm:$0xff] %v11177_v57  ;;  %v8605_v21 = vpop.f32.mrb[160].mxu0  ;;  %v8933_v15 = vpop.f32.mrb[160].mxu1 }
 0x21a   :  { %v5406_v17 = vmax.f32 %v8605_v21, 0.0  ;;  %v5734_v25 = vmax.f32 %v8933_v15, 0.0  ;;  %v3581_v20 = vpop.f32.mrb[161].mxu0  ;;  %v4893_v27 = vpop.f32.mrb[161].mxu1 }
 0x21b   :  { %v5404_v33 = vmax.f32 %v3581_v20, 0.0  ;;  %v5732_v37 = vmax.f32 %v4893_v27, 0.0  ;;  %v8606_v28 = vpop.f32.mrb[162].mxu0  ;;  %v8934_v36 = vpop.f32.mrb[162].mxu1 }
 0x21c   :  { %v11196_v46 = vmax.f32 %v5262_v1, %v5406_v17  ;;  %v11198_v41 = vmax.f32 %v5590_v7, %v5734_v25  ;;  %v5407_v10 = vmax.f32 %v8606_v28, 0.0  ;;  %v5735_v14 = vmax.f32 %v8934_v36, 0.0  ;;  %v3584_v26 = vpop.f32.mrb[163].mxu0  ;;  %v4896_v30 = vpop.f32.mrb[163].mxu1 }
 0x21d   :  { %v11200_v63 = vmax.f32 %v5260_v61, %v5404_v33  ;;  %v11202_v21 = vmax.f32 %v5588_v48, %v5732_v37  ;;  %v5405_v42 = vmax.f32 %v3584_v26, 0.0  ;;  %v5733_v15 = vmax.f32 %v4896_v30, 0.0 }
 0x21e   :  { %12633 = vst [vmem:[#allocation262_spill] sm:$0xff] %v11196_v46  ;;  %v11204_v20 = vmax.f32 %v5263_v9, %v5407_v10  ;;  %v11206_v27 = vmax.f32 %v5591_v47, %v5735_v14  ;;  %8712 = vmatmul.mubr.msk.bf16.gmra.mrb[12].mxu0 %vm2042_vm0, %v9362_v31  ;;  %v5266_v17 = vmax.f32 %v10056_v43, 0.0  ;;  %v5594_v61 = vmax.f32 %v10058_v44, 0.0  ;;  %v12637_v9 = vld [vmem:[#allocation2_spill] sm:$0xff]  ;;  %v12638_v47 = vld [vmem:[#allocation3_spill] sm:$0xff]  ;;  %v12640_v44 = vld [vmem:[#allocation5_spill] sm:$0xff] }
 0x21f   :  { %12634 = vst [vmem:[#allocation263_spill] sm:$0xff] %v11200_v63  ;;  %v11209_v1 = vmax.f32 %v5261_v62, %v5405_v42  ;;  %v11211_v7 = vmax.f32 %v5589_v32, %v5733_v15  ;;  %8715 = vmatprep.mubr.msk.bf16.mxu0 %vm2042_vm0, %v9363_v40  ;;  %v5264_v48 = vmax.f32 %v10060_v45, 0.0  ;;  %v5267_v25 = vmax.f32 %v10070_v52, 0.0  ;;  %v12639_v62 = vld [vmem:[#allocation4_spill] sm:$0xff]  ;;  %v9364_v43 = vld [vmem:[%s12369_s0 + $0x448] sm:$0xff]  }
 0x220   :  { %12635 = vst [vmem:[#allocation264_spill] sm:$0xff] %v11204_v20  ;;  %v5592_v33 = vmax.f32 %v12637_v9, 0.0  ;;  %v5595_v37 = vmax.f32 %v12638_v47, 0.0  ;;  %v5265_v36 = vmax.f32 %v12639_v62, 0.0  ;;  %v5593_v45 = vmax.f32 %v12640_v44, 0.0  ;;  %v9365_v15 = vld [vmem:[%s12369_s0 + $0x450] sm:$0xff]  }
 0x221   :  { %12636 = vst [vmem:[#allocation265_spill] sm:$0xff] %v11209_v1  ;;  %v8609_v28 = vpop.f32.mrb[164].mxu0  ;;  %v8937_v31 = vpop.f32.mrb[164].mxu1 }
 0x222   :  { %v5410_v32 = vmax.f32 %v8609_v28, 0.0  ;;  %v5738_v10 = vmax.f32 %v8937_v31, 0.0  ;;  %v3597_v14 = vpop.f32.mrb[165].mxu0  ;;  %v4909_v40 = vpop.f32.mrb[165].mxu1 }
 0x223   :  { %v5408_v26 = vmax.f32 %v3597_v14, 0.0  ;;  %v5736_v52 = vmax.f32 %v4909_v40, 0.0  ;;  %v8610_v30 = vpop.f32.mrb[166].mxu0  ;;  %v8938_v42 = vpop.f32.mrb[166].mxu1 }
 0x224   :  { %v11228_v9 = vmax.f32 %v5266_v17, %v5410_v32  ;;  %v11230_v47 = vmax.f32 %v5594_v61, %v5738_v10  ;;  %v5411_v28 = vmax.f32 %v8610_v30, 0.0  ;;  %v5739_v31 = vmax.f32 %v8938_v42, 0.0  ;;  %v3600_v62 = vpop.f32.mrb[167].mxu0  ;;  %v4912_v1 = vpop.f32.mrb[167].mxu1  ;;  %v12645_v32 = vld [vmem:[#allocation6_spill] sm:$0xff] }
 0x225   :  { %v11232_v20 = vmax.f32 %v5264_v48, %v5408_v26  ;;  %v11234_v63 = vmax.f32 %v5592_v33, %v5736_v52  ;;  %v5409_v14 = vmax.f32 %v3600_v62, 0.0  ;;  %v5737_v40 = vmax.f32 %v4912_v1, 0.0  ;;  %v12646_v48 = vld [vmem:[#allocation7_spill] sm:$0xff]  ;;  %v12647_v33 = vld [vmem:[#allocation8_spill] sm:$0xff]  ;;  %v12648_v30 = vld [vmem:[#allocation10_spill] sm:$0xff] }
 0x226   :  { %12641 = vst [vmem:[#allocation2_spill] sm:$0xff] %v11228_v9  ;;  %v11236_v44 = vmax.f32 %v5267_v25, %v5411_v28  ;;  %v11238_v46 = vmax.f32 %v5595_v37, %v5739_v31  ;;  %8716 = vmatmul.mubr.msk.bf16.gmra.mrb[16].mxu0 %vm2042_vm0, %v9364_v43  ;;  %v5270_v10 = vmax.f32 %v12645_v32, 0.0  ;;  %v5598_v26 = vmax.f32 %v12646_v48, 0.0  ;;  %v12649_v25 = vld [vmem:[#allocation9_spill] sm:$0xff]  ;;  %v12650_v37 = vld [vmem:[#allocation11_spill] sm:$0xff] }
 0x227   :  { %12642 = vst [vmem:[#allocation3_spill] sm:$0xff] %v11232_v20  ;;  %v11241_v17 = vmax.f32 %v5265_v36, %v5409_v14  ;;  %v11243_v61 = vmax.f32 %v5593_v45, %v5737_v40  ;;  %8719 = vmatprep.mubr.msk.bf16.mxu0 %vm2042_vm0, %v9365_v15  ;;  %v5268_v52 = vmax.f32 %v12647_v33, 0.0  ;;  %v5271_v1 = vmax.f32 %v12648_v30, 0.0  ;;  %v12651_v36 = vld [vmem:[#allocation12_spill] sm:$0xff]  ;;  %v9367_v32 = vld [vmem:[%s12369_s0 + $0x458] sm:$0xff]  }
 0x228   :  { %12643 = vst [vmem:[#allocation4_spill] sm:$0xff] %v11236_v44  ;;  %v5596_v42 = vmax.f32 %v12649_v25, 0.0  ;;  %v5599_v28 = vmax.f32 %v12650_v37, 0.0  ;;  %v5269_v62 = vmax.f32 %v12651_v36, 0.0  ;;  %v12652_v48 = vld [vmem:[#allocation13_spill] sm:$0xff]  ;;  %v9369_v37 = vld [vmem:[%s12369_s0 + $0x460] sm:$0xff]  }
 0x229   :  { %12644 = vst [vmem:[#allocation5_spill] sm:$0xff] %v11241_v17  ;;  %v8613_v31 = vpop.f32.mrb[168].mxu0  ;;  %v8941_v43 = vpop.f32.mrb[168].mxu1  ;;  %v5597_v33 = vmax.f32 %v12652_v48, 0.0 }
 0x22a   :  { %v5414_v45 = vmax.f32 %v8613_v31, 0.0  ;;  %v5742_v14 = vmax.f32 %v8941_v43, 0.0  ;;  %v3613_v40 = vpop.f32.mrb[169].mxu0  ;;  %v4925_v15 = vpop.f32.mrb[169].mxu1 }
 0x22b   :  { %v5412_v17 = vmax.f32 %v3613_v40, 0.0  ;;  %v5740_v30 = vmax.f32 %v4925_v15, 0.0  ;;  %v8614_v44 = vpop.f32.mrb[170].mxu0  ;;  %v8942_v25 = vpop.f32.mrb[170].mxu1 }
 0x22c   :  { %v11260_v20 = vmax.f32 %v5270_v10, %v5414_v45  ;;  %v11262_v31 = vmax.f32 %v5598_v26, %v5742_v14  ;;  %v5415_v43 = vmax.f32 %v8614_v44, 0.0  ;;  %v5743_v36 = vmax.f32 %v8942_v25, 0.0  ;;  %v3616_v9 = vpop.f32.mrb[171].mxu0  ;;  %v4928_v57 = vpop.f32.mrb[171].mxu1  ;;  %v9395_v10 = vld [vmem:[%s12368_s2 + $0x60] sm:$0xff]  }
 0x22d   :  { %v11264_v12 = vmax.f32 %v5268_v52, %v5412_v17  ;;  %v11266_v55 = vmax.f32 %v5596_v42, %v5740_v30  ;;  %v5413_v40 = vmax.f32 %v3616_v9, 0.0  ;;  %v5741_v15 = vmax.f32 %v4928_v57, 0.0  ;;  %v9396_v57 = vld [vmem:[%s12368_s2 + $0x20] sm:$0xff]   ;;  %v12658_v52 = vld [vmem:[#allocation15_spill] sm:$0xff]  ;;  %8353 = vmatprep.subr.bf16.mxu1 %v9395_v10  ;;  %v12659_v42 = vld [vmem:[#allocation16_spill] sm:$0xff] }
 0x22e   :  { %12653 = vst [vmem:[#allocation6_spill] sm:$0xff] %v11260_v20  ;;  %v11268_v48 = vmax.f32 %v5271_v1, %v5415_v43  ;;  %v11270_v35 = vmax.f32 %v5599_v28, %v5743_v36  ;;  %8720 = vmatmul.mubr.msk.bf16.gmra.mrb[20].mxu0 %vm2042_vm0, %v9367_v32  ;;  %v12657_v9 = vld [vmem:[#allocation14_spill] sm:$0xff]  ;;  %v5602_v1 = vmax.f32 %v12658_v52, 0.0  ;;  %v5272_v28 = vmax.f32 %v12659_v42, 0.0  ;;  %v12661_v32 = vld [vmem:[#allocation17_spill] sm:$0xff]  ;;  %v12662_v30 = vld [vmem:[#allocation19_spill] sm:$0xff]  ;;  %8354 = vmatpush3.bf16.msra.mxu1 %v9396_v57 }
 0x22f   :  { %12654 = vst [vmem:[#allocation7_spill] sm:$0xff] %v11264_v12  ;;  %v11276_v44 = vmax.f32 %v5269_v62, %v5413_v40  ;;  %v11278_v26 = vmax.f32 %v5597_v33, %v5741_v15  ;;  %8723 = vmatprep.mubr.msk.bf16.mxu0 %vm2042_vm0, %v9369_v37  ;;  %v5274_v17 = vmax.f32 %v12657_v9, 0.0  ;;  %v12660_v45 = vld [vmem:[#allocation18_spill] sm:$0xff]  ;;  %v5600_v62 = vmax.f32 %v12661_v32, 0.0  ;;  %v12663_v37 = vld [vmem:[#allocation20_spill] sm:$0xff]  ;;  %v9370_v10 = vld [vmem:[%s12369_s0 + $0x468] sm:$0xff]  }
 0x230   :  { %12655 = vst [vmem:[#allocation8_spill] sm:$0xff] %v11268_v48  ;;  %v5275_v14 = vmax.f32 %v12660_v45, 0.0  ;;  %v5603_v33 = vmax.f32 %v12662_v30, 0.0  ;;  %v5273_v36 = vmax.f32 %v12663_v37, 0.0  ;;  %v12664_v52 = vld [vmem:[#allocation21_spill] sm:$0xff]  ;;  %v9371_v57 = vld [vmem:[%s12369_s0 + $0x470] sm:$0xff]  }
 0x231   :  { %12656 = vst [vmem:[#allocation10_spill] sm:$0xff] %v11276_v44  ;;  %v8617_v25 = vpop.f32.mrb[172].mxu0  ;;  %v8945_v43 = vpop.f32.mrb[172].mxu1  ;;  %v5601_v42 = vmax.f32 %v12664_v52, 0.0 }
 0x232   :  { %v5418_v40 = vmax.f32 %v8617_v25, 0.0  ;;  %v5746_v15 = vmax.f32 %v8945_v43, 0.0  ;;  %v3629_v44 = vpop.f32.mrb[173].mxu0  ;;  %v4941_v9 = vpop.f32.mrb[173].mxu1 }
 0x233   :  { %v5416_v45 = vmax.f32 %v3629_v44, 0.0  ;;  %v5744_v48 = vmax.f32 %v4941_v9, 0.0  ;;  %v8618_v32 = vpop.f32.mrb[174].mxu0  ;;  %v8946_v12 = vpop.f32.mrb[174].mxu1 }
 0x234   :  { %v11298_v30 = vmax.f32 %v5274_v17, %v5418_v40  ;;  %v11300_v25 = vmax.f32 %v5602_v1, %v5746_v15  ;;  %v5419_v43 = vmax.f32 %v8618_v32, 0.0  ;;  %v5747_v37 = vmax.f32 %v8946_v12, 0.0  ;;  %v3632_v20 = vpop.f32.mrb[175].mxu0  ;;  %v4944_v53 = vpop.f32.mrb[175].mxu1  ;;  %v12669_v12 = vld [vmem:[#allocation22_spill] sm:$0xff] }
 0x235   :  { %v11302_v54 = vmax.f32 %v5272_v28, %v5416_v45  ;;  %v11304_v56 = vmax.f32 %v5600_v62, %v5744_v48  ;;  %v5417_v44 = vmax.f32 %v3632_v20, 0.0  ;;  %v5745_v9 = vmax.f32 %v4944_v53, 0.0  ;;  %v12670_v28 = vld [vmem:[#allocation23_spill] sm:$0xff]  ;;  %v12671_v48 = vld [vmem:[#allocation24_spill] sm:$0xff]  ;;  %v12672_v20 = vld [vmem:[#allocation26_spill] sm:$0xff] }
 0x236   :  { %12665 = vst [vmem:[#allocation9_spill] sm:$0xff] %v11298_v30  ;;  %v11306_v52 = vmax.f32 %v5275_v14, %v5419_v43  ;;  %v11308_v4 = vmax.f32 %v5603_v33, %v5747_v37  ;;  %8724 = vmatmul.mubr.msk.bf16.gmra.mrb[24].mxu0 %vm2042_vm0, %v9370_v10  ;;  %v5278_v40 = vmax.f32 %v12669_v12, 0.0  ;;  %v5606_v15 = vmax.f32 %v12670_v28, 0.0  ;;  %v12673_v14 = vld [vmem:[#allocation25_spill] sm:$0xff]  ;;  %v12674_v33 = vld [vmem:[#allocation27_spill] sm:$0xff] }
 0x237   :  { %12666 = vst [vmem:[#allocation11_spill] sm:$0xff] %v11302_v54  ;;  %v11311_v17 = vmax.f32 %v5273_v36, %v5417_v44  ;;  %v11313_v1 = vmax.f32 %v5601_v42, %v5745_v9  ;;  %8727 = vmatprep.mubr.msk.bf16.mxu0 %vm2042_vm0, %v9371_v57  ;;  %v5276_v62 = vmax.f32 %v12671_v48, 0.0  ;;  %v5279_v53 = vmax.f32 %v12672_v20, 0.0  ;;  %v12675_v36 = vld [vmem:[#allocation28_spill] sm:$0xff]  ;;  %v9372_v12 = vld [vmem:[%s12369_s0 + $0x478] sm:$0xff]  }
 0x238   :  { %12667 = vst [vmem:[#allocation12_spill] sm:$0xff] %v11306_v52  ;;  %v5604_v45 = vmax.f32 %v12673_v14, 0.0  ;;  %v5607_v32 = vmax.f32 %v12674_v33, 0.0  ;;  %v5277_v37 = vmax.f32 %v12675_v36, 0.0  ;;  %v12676_v28 = vld [vmem:[#allocation29_spill] sm:$0xff]  ;;  %v9373_v33 = vld [vmem:[%s12369_s0 + $0x480] sm:$0xff]  }
 0x239   :  { %12668 = vst [vmem:[#allocation13_spill] sm:$0xff] %v11311_v17  ;;  %v8621_v43 = vpop.f32.mrb[176].mxu0  ;;  %v8949_v10 = vpop.f32.mrb[176].mxu1  ;;  %v5605_v48 = vmax.f32 %v12676_v28, 0.0 }
 0x23a   :  { %v5422_v42 = vmax.f32 %v8621_v43, 0.0  ;;  %v5750_v44 = vmax.f32 %v8949_v10, 0.0  ;;  %v3645_v9 = vpop.f32.mrb[177].mxu0  ;;  %v4957_v57 = vpop.f32.mrb[177].mxu1 }
 0x23b   :  { %v5420_v17 = vmax.f32 %v3645_v9, 0.0  ;;  %v5748_v20 = vmax.f32 %v4957_v57, 0.0  ;;  %v8622_v52 = vpop.f32.mrb[178].mxu0  ;;  %v8950_v14 = vpop.f32.mrb[178].mxu1 }
 0x23c   :  { %v11330_v54 = vmax.f32 %v5278_v40, %v5422_v42  ;;  %v11332_v43 = vmax.f32 %v5606_v15, %v5750_v44  ;;  %v5423_v10 = vmax.f32 %v8622_v52, 0.0  ;;  %v5751_v36 = vmax.f32 %v8950_v14, 0.0  ;;  %v3648_v30 = vpop.f32.mrb[179].mxu0  ;;  %v4960_v6 = vpop.f32.mrb[179].mxu1  ;;  %v12682_v52 = vld [vmem:[#allocation30_spill] sm:$0xff] }
 0x23d   :  { %v11334_v49 = vmax.f32 %v5276_v62, %v5420_v17  ;;  %v11336_v22 = vmax.f32 %v5604_v45, %v5748_v20  ;;  %v5421_v9 = vmax.f32 %v3648_v30, 0.0  ;;  %v5749_v57 = vmax.f32 %v4960_v6, 0.0  ;;  %v12683_v17 = vld [vmem:[#allocation31_spill] sm:$0xff]  ;;  %v12684_v45 = vld [vmem:[#allocation32_spill] sm:$0xff]  ;;  %v12685_v30 = vld [vmem:[#allocation34_spill] sm:$0xff] }
 0x23e   :  { %12677 = vst [vmem:[#allocation14_spill] sm:$0xff] %v11330_v54  ;;  %v11338_v28 = vmax.f32 %v5279_v53, %v5423_v10  ;;  %v11340_v0 = vmax.f32 %v5607_v32, %v5751_v36  ;;  %8728 = vmatmul.mubr.msk.bf16.gmra.mrb[28].mxu0 %vm2042_vm0, %v9372_v12  ;;  %v5282_v42 = vmax.f32 %v12682_v52, 0.0  ;;  %v5610_v62 = vmax.f32 %v12683_v17, 0.0  ;;  %v12686_v53 = vld [vmem:[#allocation33_spill] sm:$0xff]  ;;  %v12687_v32 = vld [vmem:[#allocation35_spill] sm:$0xff] }
 0x23f   :  { %12678 = vst [vmem:[#allocation15_spill] sm:$0xff] %v11334_v49  ;;  %v11343_v40 = vmax.f32 %v5277_v37, %v5421_v9  ;;  %v11345_v15 = vmax.f32 %v5605_v48, %v5749_v57  ;;  %8731 = vmatprep.mubr.msk.bf16.mxu0 %vm2042_vm0, %v9373_v33  ;;  %v5280_v44 = vmax.f32 %v12684_v45, 0.0  ;;  %v5283_v6 = vmax.f32 %v12685_v30, 0.0  ;;  %v12688_v37 = vld [vmem:[#allocation36_spill] sm:$0xff]  ;;  %v9374_v52 = vld [vmem:[%s12369_s0 + $0x488] sm:$0xff]   ;;  %v12689_v17 = vld [vmem:[#allocation37_spill] sm:$0xff] }
 0x240   :  { %12679 = vst [vmem:[#allocation16_spill] sm:$0xff] %v11338_v28  ;;  %v5608_v20 = vmax.f32 %v12686_v53, 0.0  ;;  %v5611_v14 = vmax.f32 %v12687_v32, 0.0  ;;  %v5281_v36 = vmax.f32 %v12688_v37, 0.0  ;;  %v5609_v45 = vmax.f32 %v12689_v17, 0.0  ;;  %v9375_v32 = vld [vmem:[%s12369_s0 + $0x490] sm:$0xff]  }
 0x241   :  { %12680 = vst [vmem:[#allocation18_spill] sm:$0xff] %v11343_v40  ;;  %12681 = vst [vmem:[#allocation17_spill] sm:$0xff] %v11345_v15  ;;  %v8625_v10 = vpop.f32.mrb[180].mxu0  ;;  %v8953_v12 = vpop.f32.mrb[180].mxu1 }
 0x242   :  { %v5426_v48 = vmax.f32 %v8625_v10, 0.0  ;;  %v5754_v9 = vmax.f32 %v8953_v12, 0.0  ;;  %v3661_v57 = vpop.f32.mrb[181].mxu0  ;;  %v4973_v33 = vpop.f32.mrb[181].mxu1 }
 0x243   :  { %v5424_v40 = vmax.f32 %v3661_v57, 0.0  ;;  %v5752_v30 = vmax.f32 %v4973_v33, 0.0  ;;  %v8626_v28 = vpop.f32.mrb[182].mxu0  ;;  %v8954_v53 = vpop.f32.mrb[182].mxu1 }
 0x244   :  { %v11362_v49 = vmax.f32 %v5282_v42, %v5426_v48  ;;  %v11364_v10 = vmax.f32 %v5610_v62, %v5754_v9  ;;  %v5427_v12 = vmax.f32 %v8626_v28, 0.0  ;;  %v5755_v37 = vmax.f32 %v8954_v53, 0.0  ;;  %v3664_v54 = vpop.f32.mrb[183].mxu0  ;;  %v4976_v19 = vpop.f32.mrb[183].mxu1  ;;  %v12698_v28 = vld [vmem:[#allocation38_spill] sm:$0xff] }
 0x245   :  { %v11366_v38 = vmax.f32 %v5280_v44, %v5424_v40  ;;  %v11368_v60 = vmax.f32 %v5608_v20, %v5752_v30  ;;  %v5425_v57 = vmax.f32 %v3664_v54, 0.0  ;;  %v5753_v33 = vmax.f32 %v4976_v19, 0.0  ;;  %v12699_v40 = vld [vmem:[#allocation39_spill] sm:$0xff]  ;;  %v12700_v20 = vld [vmem:[#allocation40_spill] sm:$0xff]  ;;  %v12701_v54 = vld [vmem:[#allocation42_spill] sm:$0xff] }
 0x246   :  { %12690 = vst [vmem:[#allocation19_spill] sm:$0xff] %v11362_v49  ;;  %12691 = vst [vmem:[#allocation20_spill] sm:$0xff] %v11364_v10  ;;  %v11370_v17 = vmax.f32 %v5283_v6, %v5427_v12  ;;  %v11372_v3 = vmax.f32 %v5611_v14, %v5755_v37  ;;  %8732 = vmatmul.mubr.msk.bf16.gmra.mrb[32].mxu0 %vm2042_vm0, %v9374_v52  ;;  %v5286_v48 = vmax.f32 %v12698_v28, 0.0  ;;  %v5614_v44 = vmax.f32 %v12699_v40, 0.0  ;;  %v12702_v6 = vld [vmem:[#allocation41_spill] sm:$0xff]  ;;  %v12703_v14 = vld [vmem:[#allocation43_spill] sm:$0xff] }
 0x247   :  { %12692 = vst [vmem:[#allocation21_spill] sm:$0xff] %v11366_v38  ;;  %12693 = vst [vmem:[#allocation22_spill] sm:$0xff] %v11368_v60  ;;  %v11375_v42 = vmax.f32 %v5281_v36, %v5425_v57  ;;  %v11377_v62 = vmax.f32 %v5609_v45, %v5753_v33  ;;  %8735 = vmatprep.mubr.msk.bf16.mxu0 %vm2042_vm0, %v9375_v32  ;;  %v5284_v9 = vmax.f32 %v12700_v20, 0.0  ;;  %v5287_v19 = vmax.f32 %v12701_v54, 0.0  ;;  %v12704_v36 = vld [vmem:[#allocation44_spill] sm:$0xff]  ;;  %v9376_v28 = vld [vmem:[%s12369_s0 + $0x498] sm:$0xff]  }
 0x248   :  { %12694 = vst [vmem:[#allocation23_spill] sm:$0xff] %v11370_v17  ;;  %12695 = vst [vmem:[#allocation24_spill] sm:$0xff] %v11372_v3  ;;  %v5612_v30 = vmax.f32 %v12702_v6, 0.0  ;;  %v5615_v53 = vmax.f32 %v12703_v14, 0.0  ;;  %v5285_v37 = vmax.f32 %v12704_v36, 0.0  ;;  %v12705_v40 = vld [vmem:[#allocation45_spill] sm:$0xff] }
 0x249   :  { %12696 = vst [vmem:[#allocation26_spill] sm:$0xff] %v11375_v42  ;;  %12697 = vst [vmem:[#allocation25_spill] sm:$0xff] %v11377_v62  ;;  %v8629_v12 = vpop.f32.mrb[184].mxu0  ;;  %v8957_v52 = vpop.f32.mrb[184].mxu1  ;;  %v5613_v20 = vmax.f32 %v12705_v40, 0.0  ;;  %v9377_v14 = vld [vmem:[%s12369_s0 + $0x4a0] sm:$0xff]  }
 0x24a   :  { %v5430_v45 = vmax.f32 %v8629_v12, 0.0  ;;  %v5758_v57 = vmax.f32 %v8957_v52, 0.0  ;;  %v3677_v33 = vpop.f32.mrb[185].mxu0  ;;  %v4989_v32 = vpop.f32.mrb[185].mxu1 }
 0x24b   :  { %v5428_v42 = vmax.f32 %v3677_v33, 0.0  ;;  %v5756_v54 = vmax.f32 %v4989_v32, 0.0  ;;  %v8630_v17 = vpop.f32.mrb[186].mxu0  ;;  %v8958_v6 = vpop.f32.mrb[186].mxu1 }
 0x24c   :  { %v5862_v38 = vmax.f32 %v5286_v48, %v5430_v45  ;;  %v11394_v36 = vmax.f32 %v5614_v44, %v5758_v57  ;;  %v5431_v12 = vmax.f32 %v8630_v17, 0.0  ;;  %v5759_v52 = vmax.f32 %v8958_v6, 0.0  ;;  %v3680_v49 = vpop.f32.mrb[187].mxu0  ;;  %v4992_v62 = vpop.f32.mrb[187].mxu1  ;;  %v12709_v17 = vld [vmem:[#allocation46_spill] sm:$0xff] }
 0x24d   :  { %v5860_v3 = vmax.f32 %v5284_v9, %v5428_v42  ;;  %v11396_v60 = vmax.f32 %v5612_v30, %v5756_v54  ;;  %v5429_v10 = vmax.f32 %v3680_v49, 0.0  ;;  %v5757_v40 = vmax.f32 %v4992_v62, 0.0  ;;  %v12710_v9 = vld [vmem:[#allocation48_spill] sm:$0xff]  ;;  %v12711_v49 = vld [vmem:[#allocation47_spill] sm:$0xff] }
 0x24e   :  { %v6150_v33 = vmax.f32 %v5862_v38, %v11070_v8  ;;  %v5863_v32 = vmax.f32 %v5287_v19, %v5431_v12  ;;  %v11399_v15 = vmax.f32 %v5615_v53, %v5759_v52  ;;  %8736 = vmatmul.mubr.msk.bf16.gmra.mrb[36].mxu0 %vm2042_vm0, %v9376_v28  ;;  %v5290_v42 = vmax.f32 %v12709_v17, 0.0  ;;  %v12712_v38 = vld [vmem:[#allocation50_spill] sm:$0xff]  ;;  %v12713_v53 = vld [vmem:[#allocation49_spill] sm:$0xff]  ;;  %v12714_v28 = vld [vmem:[#allocation51_spill] sm:$0xff] }
 0x24f   :  { %12706 = vst [vmem:[#allocation27_spill] sm:$0xff] %v11396_v60  ;;  %v6148_v48 = vmax.f32 %v5860_v3, %v11074_v58  ;;  %v5861_v44 = vmax.f32 %v5285_v37, %v5429_v10  ;;  %v11403_v45 = vmax.f32 %v5613_v20, %v5757_v40  ;;  %8739 = vmatprep.mubr.msk.bf16.mxu0 %vm2042_vm0, %v9377_v14  ;;  %v5288_v30 = vmax.f32 %v12710_v9, 0.0  ;;  %v12715_v37 = vld [vmem:[#allocation52_spill] sm:$0xff] }
 0x250   :  { %12707 = vst [vmem:[#allocation28_spill] sm:$0xff] %v11399_v15  ;;  %v5618_v62 = vmax.f32 %v12711_v49, 0.0  ;;  %v6151_v8 = vmax.f32 %v5863_v32, %v11078_v50  ;;  %v5291_v19 = vmax.f32 %v12712_v38, 0.0  ;;  %v5616_v57 = vmax.f32 %v12713_v53, 0.0  ;;  %v9378_v50 = vld [vmem:[%s12369_s0 + $0x4a8] sm:$0xff]   ;;  %v12717_v32 = vld [vmem:[#allocation53_spill] sm:$0xff] }
 0x251   :  { %12708 = vst [vmem:[#allocation29_spill] sm:$0xff] %v11403_v45  ;;  %v5619_v54 = vmax.f32 %v12714_v28, 0.0  ;;  %v6149_v58 = vmax.f32 %v5861_v44, %v11083_v23  ;;  %v8633_v3 = vpop.f32.mrb[188].mxu0  ;;  %v8961_v10 = vpop.f32.mrb[188].mxu1  ;;  %v5289_v20 = vmax.f32 %v12715_v37, 0.0  ;;  %v5617_v17 = vmax.f32 %v12717_v32, 0.0 }
 0x252   :  { %v5434_v6 = vmax.f32 %v8633_v3, 0.0  ;;  %v5762_v14 = vmax.f32 %v8961_v10, 0.0  ;;  %v3693_v12 = vpop.f32.mrb[189].mxu0  ;;  %v5005_v52 = vpop.f32.mrb[189].mxu1  ;;  %v11418_v40 = vpack.c.bf16 %v6151_v8, %v6150_v33  ;;  %v9379_v44 = vld [vmem:[%s12369_s0 + $0x4b0] sm:$0xff]  }
 0x253   :  { %v5432_v9 = vmax.f32 %v3693_v12, 0.0  ;;  %v5760_v49 = vmax.f32 %v5005_v52, 0.0  ;;  %v8634_v38 = vpop.f32.mrb[190].mxu0  ;;  %v8962_v23 = vpop.f32.mrb[190].mxu1  ;;  %v11424_v53 = vpack.c.bf16 %v6149_v58, %v6148_v48  ;;  %v12719_v58 = vld [vmem:[#allocation54_spill] sm:$0xff] }
 0x254   :  { %12716 = vst [vmem:[#allocation30_spill] sm:$0xff] %v11418_v40  ;;  %v5866_v28 = vmax.f32 %v5290_v42, %v5434_v6  ;;  %v11426_v3 = vmax.f32 %v5618_v62, %v5762_v14  ;;  %v5435_v10 = vmax.f32 %v8634_v38, 0.0  ;;  %v5763_v37 = vmax.f32 %v8962_v23, 0.0  ;;  %v3696_v45 = vpop.f32.mrb[191].mxu0  ;;  %v5008_v33 = vpop.f32.mrb[191].mxu1  ;;  %v12725_v23 = vld [vmem:[#allocation60_spill] sm:$0xff] }
 0x255   :  { %12718 = vst [vmem:[#allocation31_spill] sm:$0xff] %v11424_v53  ;;  %v5864_v8 = vmax.f32 %v5288_v30, %v5432_v9  ;;  %v11428_v40 = vmax.f32 %v5616_v57, %v5760_v49  ;;  %v5433_v12 = vmax.f32 %v3696_v45, 0.0  ;;  %v5761_v52 = vmax.f32 %v5008_v33, 0.0  ;;  %v12720_v57 = vld [vmem:[#allocation56_spill] sm:$0xff]  ;;  %v12721_v45 = vld [vmem:[#allocation55_spill] sm:$0xff]  ;;  %v12723_v9 = vld [vmem:[#allocation57_spill] sm:$0xff] }
 0x256   :  { %v6154_v32 = vmax.f32 %v5866_v28, %v11102_v13  ;;  %v5867_v15 = vmax.f32 %v5291_v19, %v5435_v10  ;;  %v11431_v60 = vmax.f32 %v5619_v54, %v5763_v37  ;;  %8740 = vmatmul.mubr.msk.bf16.gmra.mrb[40].mxu0 %vm2042_vm0, %v9378_v50  ;;  %v5294_v30 = vmax.f32 %v12719_v58, 0.0  ;;  %v12722_v19 = vld [vmem:[#allocation58_spill] sm:$0xff]  ;;  %v12724_v50 = vld [vmem:[#allocation59_spill] sm:$0xff] }
 0x257   :  { %v6152_v48 = vmax.f32 %v5864_v8, %v11106_v39  ;;  %v5865_v42 = vmax.f32 %v5289_v20, %v5433_v12  ;;  %v11435_v62 = vmax.f32 %v5617_v17, %v5761_v52  ;;  %8743 = vmatprep.mubr.msk.bf16.mxu0 %vm2042_vm0, %v9379_v44  ;;  %v5292_v6 = vmax.f32 %v12720_v57, 0.0  ;;  %v12727_v8 = vld [vmem:[#allocation61_spill] sm:$0xff] }
 0x258   :  { %v5622_v14 = vmax.f32 %v12721_v45, 0.0  ;;  %v6155_v13 = vmax.f32 %v5867_v15, %v11110_v51  ;;  %v5295_v54 = vmax.f32 %v12722_v19, 0.0  ;;  %v5620_v49 = vmax.f32 %v12723_v9, 0.0  ;;  %v9380_v51 = vld [vmem:[%s12369_s0 + $0x4b8] sm:$0xff]  }
 0x259   :  { %v5623_v38 = vmax.f32 %v12724_v50, 0.0  ;;  %v6153_v39 = vmax.f32 %v5865_v42, %v11115_v2  ;;  %v8637_v20 = vpop.f32.mrb[192].mxu0  ;;  %v8965_v17 = vpop.f32.mrb[192].mxu1  ;;  %v5293_v44 = vmax.f32 %v12725_v23, 0.0  ;;  %v5621_v12 = vmax.f32 %v12727_v8, 0.0  ;;  %v9381_v42 = vld [vmem:[%s12369_s0 + $0x4c0] sm:$0xff]  }
 0x25a   :  { %v5438_v28 = vmax.f32 %v8637_v20, 0.0  ;;  %v5766_v10 = vmax.f32 %v8965_v17, 0.0  ;;  %v3709_v37 = vpop.f32.mrb[193].mxu0  ;;  %v5021_v33 = vpop.f32.mrb[193].mxu1  ;;  %v11450_v15 = vpack.c.bf16 %v6155_v13, %v6154_v32 }
 0x25b   :  { %v5436_v52 = vmax.f32 %v3709_v37, 0.0  ;;  %v5764_v58 = vmax.f32 %v5021_v33, 0.0  ;;  %v8638_v57 = vpop.f32.mrb[194].mxu0  ;;  %v8966_v2 = vpop.f32.mrb[194].mxu1  ;;  %v11456_v45 = vpack.c.bf16 %v6153_v39, %v6152_v48 }
 0x25c   :  { %12726 = vst [vmem:[#allocation32_spill] sm:$0xff] %v11450_v15  ;;  %v5870_v19 = vmax.f32 %v5294_v30, %v5438_v28  ;;  %v11458_v9 = vmax.f32 %v5622_v14, %v5766_v10  ;;  %v5439_v50 = vmax.f32 %v8638_v57, 0.0  ;;  %v5767_v20 = vmax.f32 %v8966_v2, 0.0  ;;  %v3712_v17 = vpop.f32.mrb[195].mxu0  ;;  %v5024_v32 = vpop.f32.mrb[195].mxu1  ;;  %v12729_v28 = vld [vmem:[#allocation62_spill] sm:$0xff] }
 0x25d   :  { %12728 = vst [vmem:[#allocation34_spill] sm:$0xff] %v11456_v45  ;;  %v5868_v13 = vmax.f32 %v5292_v6, %v5436_v52  ;;  %v11460_v23 = vmax.f32 %v5620_v49, %v5764_v58  ;;  %v5437_v37 = vmax.f32 %v3712_v17, 0.0  ;;  %v5765_v33 = vmax.f32 %v5024_v32, 0.0  ;;  %v12730_v49 = vld [vmem:[#allocation64_spill] sm:$0xff]  ;;  %v12731_v52 = vld [vmem:[#allocation63_spill] sm:$0xff] }
 0x25e   :  { %v5871_v8 = vmax.f32 %v5295_v54, %v5439_v50  ;;  %v11462_v15 = vmax.f32 %v5623_v38, %v5767_v20  ;;  %8744 = vmatmul.mubr.msk.bf16.gmra.mrb[44].mxu0 %vm2042_vm0, %v9380_v51  ;;  %v6158_v48 = vmax.f32 %v5870_v19, %v11134_v24  ;;  %v5298_v6 = vmax.f32 %v12729_v28, 0.0  ;;  %v12732_v38 = vld [vmem:[#allocation66_spill] sm:$0xff]  ;;  %v12733_v51 = vld [vmem:[#allocation65_spill] sm:$0xff]  ;;  %v12734_v24 = vld [vmem:[#allocation67_spill] sm:$0xff] }
 0x25f   :  { %v6156_v30 = vmax.f32 %v5868_v13, %v11138_v59  ;;  %v5869_v14 = vmax.f32 %v5293_v44, %v5437_v37  ;;  %v11467_v39 = vmax.f32 %v5621_v12, %v5765_v33  ;;  %8747 = vmatprep.mubr.msk.bf16.mxu0 %vm2042_vm0, %v9381_v42  ;;  %v5296_v10 = vmax.f32 %v12730_v49, 0.0  ;;  %v12735_v50 = vld [vmem:[#allocation68_spill] sm:$0xff]  ;;  %v12736_v33 = vld [vmem:[#allocation69_spill] sm:$0xff] }
 0x260   :  { %v5626_v58 = vmax.f32 %v12731_v52, 0.0  ;;  %v6159_v54 = vmax.f32 %v5871_v8, %v11142_v11  ;;  %v5299_v57 = vmax.f32 %v12732_v38, 0.0  ;;  %v5624_v2 = vmax.f32 %v12733_v51, 0.0  ;;  %v9382_v11 = vld [vmem:[%s12369_s0 + $0x4c8] sm:$0xff]  }
 0x261   :  { %v5627_v19 = vmax.f32 %v12734_v24, 0.0  ;;  %v6157_v59 = vmax.f32 %v5869_v14, %v11147_v34  ;;  %v8641_v44 = vpop.f32.mrb[196].mxu0  ;;  %v8969_v12 = vpop.f32.mrb[196].mxu1  ;;  %v5297_v42 = vmax.f32 %v12735_v50, 0.0  ;;  %v5625_v8 = vmax.f32 %v12736_v33, 0.0  ;;  %v9385_v14 = vld [vmem:[%s12369_s0 + $0x4d0] sm:$0xff]  }
 0x262   :  { %v5442_v20 = vmax.f32 %v8641_v44, 0.0  ;;  %v5770_v17 = vmax.f32 %v8969_v12, 0.0  ;;  %v3725_v32 = vpop.f32.mrb[197].mxu0  ;;  %v5037_v13 = vpop.f32.mrb[197].mxu1  ;;  %v6277_v37 = vpack.c.bf16 %v6159_v54, %v6158_v48 }
 0x263   :  { %v5440_v28 = vmax.f32 %v3725_v32, 0.0  ;;  %v5768_v49 = vmax.f32 %v5037_v13, 0.0  ;;  %v8642_v52 = vpop.f32.mrb[198].mxu0  ;;  %v8970_v38 = vpop.f32.mrb[198].mxu1  ;;  %v6276_v34 = vpack.c.bf16 %v6157_v59, %v6156_v30 }
 0x264   :  { %v5874_v51 = vmax.f32 %v5298_v6, %v5442_v20  ;;  %v11486_v24 = vmax.f32 %v5626_v58, %v5770_v17  ;;  %v5443_v44 = vmax.f32 %v8642_v52, 0.0  ;;  %v5771_v48 = vmax.f32 %v8970_v38, 0.0  ;;  %v5040_v54 = vpop.f32.mrb[199].mxu1  ;;  %6382 = vrot.lane.b32.xlu1 %v6277_v37, %s9421_s19  ;;  %v3728_v12 = vpop.f32.mrb[199].mxu0  ;;  %v12737_v6 = vld [vmem:[#allocation70_spill] sm:$0xff]  ;;  %v12740_v52 = vld [vmem:[#allocation73_spill] sm:$0xff] }
 0x265   :  { %v5872_v50 = vmax.f32 %v5296_v10, %v5440_v28  ;;  %v11489_v32 = vmax.f32 %v5624_v2, %v5768_v49  ;;  %v5769_v13 = vmax.f32 %v5040_v54, 0.0  ;;  %v5441_v33 = vmax.f32 %v3728_v12, 0.0  ;;  %v12738_v10 = vld [vmem:[#allocation72_spill] sm:$0xff]  ;;  %v12739_v28 = vld [vmem:[#allocation71_spill] sm:$0xff] }
 0x266   :  { %v6162_v30 = vmax.f32 %v5874_v51, %v11166_v29  ;;  %v5875_v59 = vmax.f32 %v5299_v57, %v5443_v44  ;;  %v11492_v45 = vmax.f32 %v5627_v19, %v5771_v48  ;;  %8748 = vmatmul.mubr.msk.bf16.gmra.mrb[48].mxu0 %vm2042_vm0, %v9382_v11  ;;  %v5302_v58 = vmax.f32 %v12737_v6, 0.0  ;;  %v12741_v19 = vld [vmem:[#allocation74_spill] sm:$0xff]  ;;  %v12742_v38 = vld [vmem:[#allocation75_spill] sm:$0xff]  ;;  %v12743_v48 = vld [vmem:[#allocation76_spill] sm:$0xff] }
 0x267   :  { %v6160_v20 = vmax.f32 %v5872_v50, %v11170_v5  ;;  %v11497_v17 = vmax.f32 %v5625_v8, %v5769_v13  ;;  %v5873_v37 = vmax.f32 %v5297_v42, %v5441_v33  ;;  %8751 = vmatprep.mubr.msk.bf16.mxu0 %vm2042_vm0, %v9385_v14  ;;  %v5300_v2 = vmax.f32 %v12738_v10, 0.0  ;;  %v9397_v14 = vld [vmem:[%s12368_s2 + $0x68] sm:$0xff]   ;;  %v12745_v33 = vld [vmem:[#allocation77_spill] sm:$0xff] }
 0x268   :  { %v5630_v49 = vmax.f32 %v12739_v28, 0.0  ;;  %v5628_v29 = vmax.f32 %v12740_v52, 0.0  ;;  %v6163_v57 = vmax.f32 %v5875_v59, %v11174_v16  ;;  %6380 = vrot.lane.b32.xlu1 %v6276_v34, %s9421_s19  ;;  %v5303_v11 = vmax.f32 %v12741_v19, 0.0  ;;  %v9398_v44 = vld [vmem:[%s12368_s2 + $0x28] sm:$0xff]   ;;  %v9387_v19 = vld [vmem:[%s12369_s0 + $0x4e0] sm:$0xff]   ;;  %8355 = vmatprep.subr.bf16.mxu1 %v9397_v14 }
 0x269   :  { %v5631_v51 = vmax.f32 %v12742_v38, 0.0  ;;  %v6161_v5 = vmax.f32 %v5873_v37, %v11179_v18  ;;  %v8645_v8 = vpop.f32.mrb[200].mxu0  ;;  %v8973_v42 = vpop.f32.mrb[200].mxu1  ;;  %v5301_v16 = vmax.f32 %v12743_v48, 0.0  ;;  %v9386_v18 = vld [vmem:[%s12369_s0 + $0x4d8] sm:$0xff]   ;;  %v5629_v59 = vmax.f32 %v12745_v33, 0.0  ;;  %8356 = vmatpush3.bf16.msra.mxu1 %v9398_v44 }
 0x26a   :  { %v5446_v54 = vmax.f32 %v8645_v8, 0.0  ;;  %v5774_v34 = vmax.f32 %v8973_v42, 0.0  ;;  %v3741_v12 = vpop.f32.mrb[201].mxu0  ;;  %v5053_v50 = vpop.f32.mrb[201].mxu1  ;;  %v11518_v13 = vpack.c.bf16 %v6163_v57, %v6162_v30 }
 0x26b   :  { %v5444_v6 = vmax.f32 %v3741_v12, 0.0  ;;  %v5772_v37 = vmax.f32 %v5053_v50, 0.0  ;;  %v8646_v10 = vpop.f32.mrb[202].mxu0  ;;  %v8974_v28 = vpop.f32.mrb[202].mxu1  ;;  %v6278_v52 = vpack.c.bf16 %v6161_v5, %v6160_v20 }
 0x26c   :  { %12744 = vst [vmem:[#allocation33_spill] sm:$0xff] %v11518_v13  ;;  %v5878_v38 = vmax.f32 %v5302_v58, %v5446_v54  ;;  %v11524_v8 = vmax.f32 %v5630_v49, %v5774_v34  ;;  %v5447_v42 = vmax.f32 %v8646_v10, 0.0  ;;  %v5775_v48 = vmax.f32 %v8974_v28, 0.0  ;;  %v3744_v53 = vpop.f32.mrb[203].mxu0  ;;  %v5056_v30 = vpop.f32.mrb[203].mxu1  ;;  %v12748_v54 = vld [vmem:[#allocation79_spill] sm:$0xff] }
 0x26d   :  { %v5876_v57 = vmax.f32 %v5300_v2, %v5444_v6  ;;  %v11526_v33 = vmax.f32 %v5628_v29, %v5772_v37  ;;  %v5445_v12 = vmax.f32 %v3744_v53, 0.0  ;;  %v5773_v50 = vmax.f32 %v5056_v30, 0.0  ;;  %6384 = vrot.lane.b32.xlu1 %v6278_v52, %s9421_s19  ;;  %v12746_v2 = vld [vmem:[#allocation78_spill] sm:$0xff]  ;;  %v12747_v53 = vld [vmem:[#allocation80_spill] sm:$0xff]  ;;  %v12750_v6 = vld [vmem:[#allocation81_spill] sm:$0xff] }
 0x26e   :  { %v6166_v20 = vmax.f32 %v5878_v38, %v11198_v41  ;;  %v5879_v5 = vmax.f32 %v5303_v11, %v5447_v42  ;;  %v11530_v13 = vmax.f32 %v5631_v51, %v5775_v48  ;;  %8752 = vmatmul.mubr.msk.bf16.gmra.mrb[52].mxu0 %vm2042_vm0, %v9386_v18  ;;  %v5306_v29 = vmax.f32 %v12746_v2, 0.0  ;;  %v12749_v11 = vld [vmem:[#allocation82_spill] sm:$0xff]  ;;  %v12751_v18 = vld [vmem:[#allocation83_spill] sm:$0xff]  ;;  %v12752_v28 = vld [vmem:[#allocation84_spill] sm:$0xff] }
 0x26f   :  { %v6164_v58 = vmax.f32 %v5876_v57, %v11202_v21  ;;  %v5877_v49 = vmax.f32 %v5301_v16, %v5445_v12  ;;  %v11534_v14 = vmax.f32 %v5629_v59, %v5773_v50  ;;  %8755 = vmatprep.mubr.msk.bf16.mxu0 %vm2042_vm0, %v9387_v19  ;;  %v5304_v44 = vmax.f32 %v12747_v53, 0.0  ;;  %v12754_v57 = vld [vmem:[#allocation85_spill] sm:$0xff] }
 0x270   :  { %v5634_v34 = vmax.f32 %v12748_v54, 0.0  ;;  %v6167_v41 = vmax.f32 %v5879_v5, %v11206_v27  ;;  %v5307_v51 = vmax.f32 %v12749_v11, 0.0  ;;  %v5632_v37 = vmax.f32 %v12750_v6, 0.0  ;;  %v9388_v27 = vld [vmem:[%s12369_s0 + $0x4e8] sm:$0xff]  }
 0x271   :  { %v5635_v10 = vmax.f32 %v12751_v18, 0.0  ;;  %v6165_v21 = vmax.f32 %v5877_v49, %v11211_v7  ;;  %v8649_v16 = vpop.f32.mrb[204].mxu0  ;;  %v8977_v59 = vpop.f32.mrb[204].mxu1  ;;  %v5305_v52 = vmax.f32 %v12752_v28, 0.0  ;;  %v5633_v12 = vmax.f32 %v12754_v57, 0.0  ;;  %v9389_v49 = vld [vmem:[%s12369_s0 + $0x4f0] sm:$0xff]  }
 0x272   :  { %v5450_v19 = vmax.f32 %v8649_v16, 0.0  ;;  %v5778_v38 = vmax.f32 %v8977_v59, 0.0  ;;  %v3757_v42 = vpop.f32.mrb[205].mxu0  ;;  %v5069_v48 = vpop.f32.mrb[205].mxu1  ;;  %v11549_v30 = vpack.c.bf16 %v6167_v41, %v6166_v20 }
 0x273   :  { %v5448_v50 = vmax.f32 %v3757_v42, 0.0  ;;  %v5776_v5 = vmax.f32 %v5069_v48, 0.0  ;;  %v8650_v2 = vpop.f32.mrb[206].mxu0  ;;  %v8978_v7 = vpop.f32.mrb[206].mxu1  ;;  %v11555_v53 = vpack.c.bf16 %v6165_v21, %v6164_v58  ;;  %v12756_v21 = vld [vmem:[#allocation86_spill] sm:$0xff] }
 0x274   :  { %12753 = vst [vmem:[#allocation35_spill] sm:$0xff] %v11549_v30  ;;  %v5882_v54 = vmax.f32 %v5306_v29, %v5450_v19  ;;  %v11557_v11 = vmax.f32 %v5634_v34, %v5778_v38  ;;  %v5451_v6 = vmax.f32 %v8650_v2, 0.0  ;;  %v5779_v18 = vmax.f32 %v8978_v7, 0.0  ;;  %v3760_v16 = vpop.f32.mrb[207].mxu0  ;;  %v5072_v20 = vpop.f32.mrb[207].mxu1  ;;  %v12758_v38 = vld [vmem:[#allocation87_spill] sm:$0xff] }
 0x275   :  { %12755 = vst [vmem:[#allocation36_spill] sm:$0xff] %v11555_v53  ;;  %v5880_v41 = vmax.f32 %v5304_v44, %v5448_v50  ;;  %v11559_v59 = vmax.f32 %v5632_v37, %v5776_v5  ;;  %v5449_v28 = vmax.f32 %v3760_v16, 0.0  ;;  %v5777_v42 = vmax.f32 %v5072_v20, 0.0  ;;  %v12757_v37 = vld [vmem:[#allocation88_spill] sm:$0xff]  ;;  %v12760_v5 = vld [vmem:[#allocation89_spill] sm:$0xff] }
 0x276   :  { %v6170_v48 = vmax.f32 %v5882_v54, %v11230_v47  ;;  %v5883_v57 = vmax.f32 %v5307_v51, %v5451_v6  ;;  %v11562_v30 = vmax.f32 %v5635_v10, %v5779_v18  ;;  %8756 = vmatmul.mubr.msk.bf16.gmra.mrb[56].mxu0 %vm2042_vm0, %v9388_v27  ;;  %v5310_v44 = vmax.f32 %v12756_v21, 0.0  ;;  %v12759_v51 = vld [vmem:[#allocation90_spill] sm:$0xff]  ;;  %v12761_v27 = vld [vmem:[#allocation91_spill] sm:$0xff]  ;;  %v12762_v54 = vld [vmem:[#allocation92_spill] sm:$0xff] }
 0x277   :  { %v6168_v58 = vmax.f32 %v5880_v41, %v11234_v63  ;;  %v5881_v29 = vmax.f32 %v5305_v52, %v5449_v28  ;;  %v11566_v34 = vmax.f32 %v5633_v12, %v5777_v42  ;;  %8759 = vmatprep.mubr.msk.bf16.mxu0 %vm2042_vm0, %v9389_v49  ;;  %v5308_v19 = vmax.f32 %v12757_v37, 0.0  ;;  %v12764_v28 = vld [vmem:[#allocation93_spill] sm:$0xff] }
 0x278   :  { %v5638_v50 = vmax.f32 %v12758_v38, 0.0  ;;  %v6171_v47 = vmax.f32 %v5883_v57, %v11238_v46  ;;  %v5311_v10 = vmax.f32 %v12759_v51, 0.0  ;;  %v5636_v2 = vmax.f32 %v12760_v5, 0.0  ;;  %v9390_v46 = vld [vmem:[%s12369_s0 + $0x4f8] sm:$0xff]  }
 0x279   :  { %v5639_v7 = vmax.f32 %v12761_v27, 0.0  ;;  %v6169_v63 = vmax.f32 %v5881_v29, %v11243_v61  ;;  %v8653_v52 = vpop.f32.mrb[208].mxu0  ;;  %v8981_v12 = vpop.f32.mrb[208].mxu1  ;;  %v5309_v49 = vmax.f32 %v12762_v54, 0.0  ;;  %v5637_v42 = vmax.f32 %v12764_v28, 0.0  ;;  %v9391_v29 = vld [vmem:[%s12369_s0 + $0x500] sm:$0xff]  }
 0x27a   :  { %v5454_v6 = vmax.f32 %v8653_v52, 0.0  ;;  %v5782_v18 = vmax.f32 %v8981_v12, 0.0  ;;  %v3773_v16 = vpop.f32.mrb[209].mxu0  ;;  %v5085_v20 = vpop.f32.mrb[209].mxu1  ;;  %v11581_v41 = vpack.c.bf16 %v6171_v47, %v6170_v48 }
 0x27b   :  { %v5452_v57 = vmax.f32 %v3773_v16, 0.0  ;;  %v5780_v21 = vmax.f32 %v5085_v20, 0.0  ;;  %v8654_v37 = vpop.f32.mrb[210].mxu0  ;;  %v8982_v61 = vpop.f32.mrb[210].mxu1  ;;  %v11587_v38 = vpack.c.bf16 %v6169_v63, %v6168_v58  ;;  %v12766_v63 = vld [vmem:[#allocation94_spill] sm:$0xff] }
 0x27c   :  { %12763 = vst [vmem:[#allocation37_spill] sm:$0xff] %v11581_v41  ;;  %v5886_v51 = vmax.f32 %v5310_v44, %v5454_v6  ;;  %v11589_v5 = vmax.f32 %v5638_v50, %v5782_v18  ;;  %v5455_v27 = vmax.f32 %v8654_v37, 0.0  ;;  %v5783_v52 = vmax.f32 %v8982_v61, 0.0  ;;  %v3776_v12 = vpop.f32.mrb[211].mxu0  ;;  %v5088_v48 = vpop.f32.mrb[211].mxu1  ;;  %v12768_v18 = vld [vmem:[#allocation95_spill] sm:$0xff] }
 0x27d   :  { %12765 = vst [vmem:[#allocation38_spill] sm:$0xff] %v11587_v38  ;;  %v5884_v47 = vmax.f32 %v5308_v19, %v5452_v57  ;;  %v11591_v54 = vmax.f32 %v5636_v2, %v5780_v21  ;;  %v5453_v16 = vmax.f32 %v3776_v12, 0.0  ;;  %v5781_v20 = vmax.f32 %v5088_v48, 0.0  ;;  %v12767_v2 = vld [vmem:[#allocation96_spill] sm:$0xff]  ;;  %v12770_v21 = vld [vmem:[#allocation97_spill] sm:$0xff] }
 0x27e   :  { %v6174_v28 = vmax.f32 %v5886_v51, %v11262_v31  ;;  %v5887_v41 = vmax.f32 %v5311_v10, %v5455_v27  ;;  %v11594_v53 = vmax.f32 %v5639_v7, %v5783_v52  ;;  %8760 = vmatmul.mubr.msk.bf16.gmra.mrb[60].mxu0 %vm2042_vm0, %v9390_v46  ;;  %v5314_v19 = vmax.f32 %v12766_v63, 0.0  ;;  %v12769_v10 = vld [vmem:[#allocation98_spill] sm:$0xff]  ;;  %v12771_v46 = vld [vmem:[#allocation99_spill] sm:$0xff]  ;;  %v12772_v51 = vld [vmem:[#allocation100_spill] sm:$0xff] }
 0x27f   :  { %v6172_v58 = vmax.f32 %v5884_v47, %v11266_v55  ;;  %v5885_v44 = vmax.f32 %v5309_v49, %v5453_v16  ;;  %v11598_v50 = vmax.f32 %v5637_v42, %v5781_v20  ;;  %8763 = vmatprep.mubr.msk.bf16.mxu0 %vm2042_vm0, %v9391_v29  ;;  %v5312_v6 = vmax.f32 %v12767_v2, 0.0  ;;  %v12774_v47 = vld [vmem:[#allocation101_spill] sm:$0xff] }
 0x280   :  { %v5642_v57 = vmax.f32 %v12768_v18, 0.0  ;;  %v6175_v31 = vmax.f32 %v5887_v41, %v11270_v35  ;;  %v5315_v7 = vmax.f32 %v12769_v10, 0.0  ;;  %v5640_v37 = vmax.f32 %v12770_v21, 0.0  ;;  %v9392_v35 = vld [vmem:[%s12369_s0 + $0x508] sm:$0xff]  }
 0x281   :  { %v5643_v61 = vmax.f32 %v12771_v46, 0.0  ;;  %v6173_v55 = vmax.f32 %v5885_v44, %v11278_v26  ;;  %v8657_v49 = vpop.f32.mrb[212].mxu0  ;;  %v8985_v42 = vpop.f32.mrb[212].mxu1  ;;  %v5313_v29 = vmax.f32 %v12772_v51, 0.0  ;;  %v5641_v16 = vmax.f32 %v12774_v47, 0.0  ;;  %v9393_v44 = vld [vmem:[%s12369_s0 + $0x510] sm:$0xff]  }
 0x282   :  { %v5458_v27 = vmax.f32 %v8657_v49, 0.0  ;;  %v5786_v52 = vmax.f32 %v8985_v42, 0.0  ;;  %v3789_v12 = vpop.f32.mrb[213].mxu0  ;;  %v5101_v48 = vpop.f32.mrb[213].mxu1  ;;  %v11613_v41 = vpack.c.bf16 %v6175_v31, %v6174_v28 }
 0x283   :  { %v5456_v20 = vmax.f32 %v3789_v12, 0.0  ;;  %v5784_v63 = vmax.f32 %v5101_v48, 0.0  ;;  %v8658_v2 = vpop.f32.mrb[214].mxu0  ;;  %v8986_v26 = vpop.f32.mrb[214].mxu1  ;;  %v11619_v18 = vpack.c.bf16 %v6173_v55, %v6172_v58  ;;  %v12776_v55 = vld [vmem:[#allocation102_spill] sm:$0xff] }
 0x284   :  { %12773 = vst [vmem:[#allocation39_spill] sm:$0xff] %v11613_v41  ;;  %v5890_v10 = vmax.f32 %v5314_v19, %v5458_v27  ;;  %v11621_v21 = vmax.f32 %v5642_v57, %v5786_v52  ;;  %v5459_v46 = vmax.f32 %v8658_v2, 0.0  ;;  %v5787_v49 = vmax.f32 %v8986_v26, 0.0  ;;  %v3792_v42 = vpop.f32.mrb[215].mxu0  ;;  %v5104_v28 = vpop.f32.mrb[215].mxu1  ;;  %v12778_v52 = vld [vmem:[#allocation103_spill] sm:$0xff] }
 0x285   :  { %12775 = vst [vmem:[#allocation40_spill] sm:$0xff] %v11619_v18  ;;  %v5888_v31 = vmax.f32 %v5312_v6, %v5456_v20  ;;  %v11623_v51 = vmax.f32 %v5640_v37, %v5784_v63  ;;  %v5457_v12 = vmax.f32 %v3792_v42, 0.0  ;;  %v5785_v48 = vmax.f32 %v5104_v28, 0.0  ;;  %v12777_v37 = vld [vmem:[#allocation104_spill] sm:$0xff]  ;;  %v12780_v63 = vld [vmem:[#allocation105_spill] sm:$0xff] }
 0x286   :  { %v6178_v47 = vmax.f32 %v5890_v10, %v11300_v25  ;;  %v5891_v38 = vmax.f32 %v5315_v7, %v5459_v46  ;;  %v11626_v41 = vmax.f32 %v5643_v61, %v5787_v49  ;;  %8764 = vmatmul.mubr.msk.bf16.gmra.mrb[64].mxu0 %vm2042_vm0, %v9392_v35  ;;  %v5318_v6 = vmax.f32 %v12776_v55, 0.0  ;;  %v12779_v7 = vld [vmem:[#allocation106_spill] sm:$0xff]  ;;  %v12781_v35 = vld [vmem:[#allocation107_spill] sm:$0xff]  ;;  %v12782_v10 = vld [vmem:[#allocation108_spill] sm:$0xff] }
 0x287   :  { %v6176_v58 = vmax.f32 %v5888_v31, %v11304_v56  ;;  %v5889_v19 = vmax.f32 %v5313_v29, %v5457_v12  ;;  %v11630_v57 = vmax.f32 %v5641_v16, %v5785_v48  ;;  %8767 = vmatprep.mubr.msk.bf16.mxu0 %vm2042_vm0, %v9393_v44  ;;  %v5316_v27 = vmax.f32 %v12777_v37, 0.0  ;;  %v12784_v31 = vld [vmem:[#allocation109_spill] sm:$0xff] }
 0x288   :  { %v5646_v20 = vmax.f32 %v12778_v52, 0.0  ;;  %v6179_v25 = vmax.f32 %v5891_v38, %v11308_v4  ;;  %v5319_v61 = vmax.f32 %v12779_v7, 0.0  ;;  %v5644_v2 = vmax.f32 %v12780_v63, 0.0  ;;  %v9394_v4 = vld [vmem:[%s12369_s0 + $0x518] sm:$0xff]   ;;  %s9422_s0 = smov 32  }
 0x289   :  { %v5647_v26 = vmax.f32 %v12781_v35, 0.0  ;;  %v6177_v56 = vmax.f32 %v5889_v19, %v11313_v1  ;;  %v8661_v29 = vpop.f32.mrb[216].mxu0  ;;  %v8989_v16 = vpop.f32.mrb[216].mxu1  ;;  %v5317_v44 = vmax.f32 %v12782_v10, 0.0  ;;  %v5645_v12 = vmax.f32 %v12784_v31, 0.0 }
 0x28a   :  { %v5462_v46 = vmax.f32 %v8661_v29, 0.0  ;;  %v5790_v49 = vmax.f32 %v8989_v16, 0.0  ;;  %v3805_v42 = vpop.f32.mrb[217].mxu0  ;;  %v5117_v28 = vpop.f32.mrb[217].mxu1  ;;  %v11645_v38 = vpack.c.bf16 %v6179_v25, %v6178_v47 }
 0x28b   :  { %v5460_v48 = vmax.f32 %v3805_v42, 0.0  ;;  %v5788_v55 = vmax.f32 %v5117_v28, 0.0  ;;  %v8662_v37 = vpop.f32.mrb[218].mxu0  ;;  %v8990_v1 = vpop.f32.mrb[218].mxu1  ;;  %v11648_v19 = vpack.c.bf16 %v6177_v56, %v6176_v58  ;;  %v12787_v56 = vld [vmem:[#allocation110_spill] sm:$0xff] }
 0x28c   :  { %12783 = vst [vmem:[#allocation42_spill] sm:$0xff] %v11645_v38  ;;  %v5894_v52 = vmax.f32 %v5318_v6, %v5462_v46  ;;  %v11650_v7 = vmax.f32 %v5646_v20, %v5790_v49  ;;  %v5463_v63 = vmax.f32 %v8662_v37, 0.0  ;;  %v5791_v35 = vmax.f32 %v8990_v1, 0.0  ;;  %v3808_v29 = vpop.f32.mrb[219].mxu0  ;;  %v5120_v16 = vpop.f32.mrb[219].mxu1  ;;  %v12788_v49 = vld [vmem:[#allocation112_spill] sm:$0xff] }
 0x28d   :  { %12785 = vst [vmem:[#allocation41_spill] sm:$0xff] %v11648_v19  ;;  %v5892_v10 = vmax.f32 %v5316_v27, %v5460_v48  ;;  %v11652_v18 = vmax.f32 %v5644_v2, %v5788_v55  ;;  %v5461_v47 = vmax.f32 %v3808_v29, 0.0  ;;  %v5789_v25 = vmax.f32 %v5120_v16, 0.0  ;;  %v12789_v2 = vld [vmem:[#allocation111_spill] sm:$0xff]  ;;  %v12790_v37 = vld [vmem:[#allocation114_spill] sm:$0xff] }
 0x28e   :  { %v6182_v31 = vmax.f32 %v5894_v52, %v11332_v43  ;;  %v5895_v42 = vmax.f32 %v5319_v61, %v5463_v63  ;;  %v11655_v28 = vmax.f32 %v5647_v26, %v5791_v35  ;;  %8768 = vmatmul.mubr.msk.bf16.gmra.mrb[68].mxu0 %vm2042_vm0, %v9394_v4  ;;  %v5322_v46 = vmax.f32 %v12787_v56, 0.0  ;;  %v12791_v61 = vld [vmem:[#allocation113_spill] sm:$0xff]  ;;  %v12792_v1 = vld [vmem:[#allocation115_spill] sm:$0xff] }
 0x28f   :  { %v6180_v58 = vmax.f32 %v5892_v10, %v11336_v22  ;;  %v5893_v6 = vmax.f32 %v5317_v44, %v5461_v47  ;;  %v11659_v20 = vmax.f32 %v5645_v12, %v5789_v25  ;;  %v5320_v27 = vmax.f32 %v12788_v49, 0.0  ;;  %v12793_v4 = vld [vmem:[#allocation17_spill] sm:$0xff]  ;;  %v12794_v12 = vld [vmem:[#allocation116_spill] sm:$0xff] }
 0x290   :  { %v5650_v48 = vmax.f32 %v12789_v2, 0.0  ;;  %v6183_v55 = vmax.f32 %v5895_v42, %v11340_v0  ;;  %v5323_v43 = vmax.f32 %v12790_v37, 0.0  ;;  %v5648_v26 = vmax.f32 %v12791_v61, 0.0  ;;  %v12796_v56 = vld [vmem:[#allocation117_spill] sm:$0xff] }
 0x291   :  { %12786 = vst [vmem:[#allocation43_spill] sm:$0xff] %v11659_v20  ;;  %v5651_v52 = vmax.f32 %v12792_v1, 0.0  ;;  %v6181_v63 = vmax.f32 %v5893_v6, %v12793_v4  ;;  %v8665_v22 = vpop.f32.mrb[220].mxu0  ;;  %v8993_v44 = vpop.f32.mrb[220].mxu1  ;;  %v5321_v35 = vmax.f32 %v12794_v12, 0.0  ;;  %v5649_v0 = vmax.f32 %v12796_v56, 0.0 }
 0x292   :  { %v5466_v29 = vmax.f32 %v8665_v22, 0.0  ;;  %v5794_v16 = vmax.f32 %v8993_v44, 0.0  ;;  %v3821_v10 = vpop.f32.mrb[221].mxu0  ;;  %v5133_v47 = vpop.f32.mrb[221].mxu1  ;;  %v11670_v25 = vpack.c.bf16 %v6183_v55, %v6182_v31  ;;  %v12801_v20 = vld [vmem:[#allocation22_spill] sm:$0xff] }
 0x293   :  { %v5464_v42 = vmax.f32 %v3821_v10, 0.0  ;;  %v5792_v49 = vmax.f32 %v5133_v47, 0.0  ;;  %v8666_v2 = vpop.f32.mrb[222].mxu0  ;;  %v8994_v37 = vpop.f32.mrb[222].mxu1  ;;  %v11673_v61 = vpack.c.bf16 %v6181_v63, %v6180_v58 }
 0x294   :  { %12795 = vst [vmem:[#allocation44_spill] sm:$0xff] %v11670_v25  ;;  %v5898_v1 = vmax.f32 %v5322_v46, %v5466_v29  ;;  %v11675_v6 = vmax.f32 %v5650_v48, %v5794_v16  ;;  %v5467_v4 = vmax.f32 %v8666_v2, 0.0  ;;  %v5795_v38 = vmax.f32 %v8994_v37, 0.0  ;;  %v3824_v12 = vpop.f32.mrb[223].mxu0  ;;  %v5136_v22 = vpop.f32.mrb[223].mxu1  ;;  %v12799_v25 = vld [vmem:[#allocation20_spill] sm:$0xff] }
 0x295   :  { %12797 = vst [vmem:[#allocation45_spill] sm:$0xff] %v11673_v61  ;;  %v5896_v44 = vmax.f32 %v5320_v27, %v5464_v42  ;;  %v11677_v19 = vmax.f32 %v5648_v26, %v5792_v49  ;;  %v5465_v31 = vmax.f32 %v3824_v12, 0.0  ;;  %v5793_v55 = vmax.f32 %v5136_v22, 0.0  ;;  %v12803_v48 = vld [vmem:[#allocation118_spill] sm:$0xff]  ;;  %v12804_v16 = vld [vmem:[#allocation120_spill] sm:$0xff]  ;;  %v12805_v37 = vld [vmem:[#allocation119_spill] sm:$0xff] }
 0x296   :  { %v6186_v56 = vmax.f32 %v5898_v1, %v12799_v25  ;;  %v5899_v10 = vmax.f32 %v5323_v43, %v5467_v4  ;;  %v11680_v47 = vmax.f32 %v5651_v52, %v5795_v38  ;;  %v5326_v29 = vmax.f32 %v12803_v48, 0.0  ;;  %v12806_v26 = vld [vmem:[#allocation24_spill] sm:$0xff]  ;;  %v12807_v49 = vld [vmem:[#allocation122_spill] sm:$0xff]  ;;  %v12808_v22 = vld [vmem:[#allocation121_spill] sm:$0xff] }
 0x297   :  { %12798 = vst [vmem:[#allocation46_spill] sm:$0xff] %v11677_v19  ;;  %v6184_v58 = vmax.f32 %v5896_v44, %v12801_v20  ;;  %v5897_v63 = vmax.f32 %v5321_v35, %v5465_v31  ;;  %v11683_v46 = vmax.f32 %v5649_v0, %v5793_v55  ;;  %v5324_v2 = vmax.f32 %v12804_v16, 0.0  ;;  %v12809_v43 = vld [vmem:[#allocation123_spill] sm:$0xff]  ;;  %v12810_v52 = vld [vmem:[#allocation25_spill] sm:$0xff]  ;;  %v12811_v0 = vld [vmem:[#allocation124_spill] sm:$0xff] }
 0x298   :  { %12800 = vst [vmem:[#allocation48_spill] sm:$0xff] %v11680_v47  ;;  %v5654_v27 = vmax.f32 %v12805_v37, 0.0  ;;  %v6187_v42 = vmax.f32 %v5899_v10, %v12806_v26  ;;  %v5327_v12 = vmax.f32 %v12807_v49, 0.0  ;;  %v5652_v25 = vmax.f32 %v12808_v22, 0.0  ;;  %v12813_v37 = vld [vmem:[#allocation125_spill] sm:$0xff] }
 0x299   :  { %12802 = vst [vmem:[#allocation47_spill] sm:$0xff] %v11683_v46  ;;  %v5655_v38 = vmax.f32 %v12809_v43, 0.0  ;;  %v6185_v1 = vmax.f32 %v5897_v63, %v12810_v52  ;;  %v8669_v20 = vpop.f32.mrb[224].mxu0  ;;  %v8997_v35 = vpop.f32.mrb[224].mxu1  ;;  %v5325_v4 = vmax.f32 %v12811_v0, 0.0  ;;  %v5653_v10 = vmax.f32 %v12813_v37, 0.0 }
 0x29a   :  { %v5470_v44 = vmax.f32 %v8669_v20, 0.0  ;;  %v5798_v31 = vmax.f32 %v8997_v35, 0.0  ;;  %v3837_v55 = vpop.f32.mrb[225].mxu0  ;;  %v5149_v48 = vpop.f32.mrb[225].mxu1  ;;  %v11694_v16 = vpack.c.bf16 %v6187_v42, %v6186_v56 }
 0x29b   :  { %v5468_v26 = vmax.f32 %v3837_v55, 0.0  ;;  %v5796_v49 = vmax.f32 %v5149_v48, 0.0  ;;  %v8670_v61 = vpop.f32.mrb[226].mxu0  ;;  %v8998_v22 = vpop.f32.mrb[226].mxu1  ;;  %v11697_v46 = vpack.c.bf16 %v6185_v1, %v6184_v58  ;;  %v12817_v48 = vld [vmem:[#allocation27_spill] sm:$0xff] }
 0x29c   :  { %12812 = vst [vmem:[#allocation50_spill] sm:$0xff] %v11694_v16  ;;  %v5902_v43 = vmax.f32 %v5326_v29, %v5470_v44  ;;  %v11699_v63 = vmax.f32 %v5654_v27, %v5798_v31  ;;  %v5471_v52 = vmax.f32 %v8670_v61, 0.0  ;;  %v5799_v47 = vmax.f32 %v8998_v22, 0.0  ;;  %v3840_v0 = vpop.f32.mrb[227].mxu0  ;;  %v5152_v20 = vpop.f32.mrb[227].mxu1  ;;  %v12819_v27 = vld [vmem:[#allocation126_spill] sm:$0xff] }
 0x29d   :  { %12814 = vst [vmem:[#allocation49_spill] sm:$0xff] %v11697_v46  ;;  %v5900_v35 = vmax.f32 %v5324_v2, %v5468_v26  ;;  %v11701_v19 = vmax.f32 %v5652_v25, %v5796_v49  ;;  %v5469_v56 = vmax.f32 %v3840_v0, 0.0  ;;  %v5797_v42 = vmax.f32 %v5152_v20, 0.0  ;;  %v12820_v44 = vld [vmem:[#allocation128_spill] sm:$0xff]  ;;  %v12821_v22 = vld [vmem:[#allocation127_spill] sm:$0xff]  ;;  %v12823_v49 = vld [vmem:[#allocation130_spill] sm:$0xff] }
 0x29e   :  { %v5903_v16 = vmax.f32 %v5327_v12, %v5471_v52  ;;  %v11703_v37 = vmax.f32 %v5655_v38, %v5799_v47  ;;  %v6190_v55 = vmax.f32 %v5902_v43, %v11394_v36  ;;  %v5330_v61 = vmax.f32 %v12819_v27, 0.0  ;;  %v12822_v25 = vld [vmem:[#allocation28_spill] sm:$0xff]  ;;  %v12824_v12 = vld [vmem:[#allocation129_spill] sm:$0xff]  ;;  %v12825_v38 = vld [vmem:[#allocation131_spill] sm:$0xff] }
 0x29f   :  { %12815 = vst [vmem:[#allocation51_spill] sm:$0xff] %v11701_v19  ;;  %v6188_v58 = vmax.f32 %v5900_v35, %v12817_v48  ;;  %v5901_v1 = vmax.f32 %v5325_v4, %v5469_v56  ;;  %v11707_v29 = vmax.f32 %v5653_v10, %v5797_v42  ;;  %v5328_v31 = vmax.f32 %v12820_v44, 0.0  ;;  %v12826_v36 = vld [vmem:[#allocation29_spill] sm:$0xff]  ;;  %v12827_v10 = vld [vmem:[#allocation132_spill] sm:$0xff] }
 0x2a0   :  { %12816 = vst [vmem:[#allocation52_spill] sm:$0xff] %v11703_v37  ;;  %v5658_v2 = vmax.f32 %v12821_v22, 0.0  ;;  %v6191_v26 = vmax.f32 %v5903_v16, %v12822_v25  ;;  %v5331_v0 = vmax.f32 %v12823_v49, 0.0  ;;  %v5656_v47 = vmax.f32 %v12824_v12, 0.0  ;;  %v12828_v22 = vld [vmem:[#allocation133_spill] sm:$0xff] }
 0x2a1   :  { %12818 = vst [vmem:[#allocation53_spill] sm:$0xff] %v11707_v29  ;;  %v5659_v52 = vmax.f32 %v12825_v38, 0.0  ;;  %v6189_v43 = vmax.f32 %v5901_v1, %v12826_v36  ;;  %v8673_v20 = vpop.f32.mrb[228].mxu0  ;;  %v9001_v4 = vpop.f32.mrb[228].mxu1  ;;  %v5329_v35 = vmax.f32 %v12827_v10, 0.0  ;;  %v5657_v46 = vmax.f32 %v12828_v22, 0.0 }
 0x2a2   :  { %v5474_v56 = vmax.f32 %v8673_v20, 0.0  ;;  %v5802_v42 = vmax.f32 %v9001_v4, 0.0  ;;  %v3853_v48 = vpop.f32.mrb[229].mxu0  ;;  %v5165_v27 = vpop.f32.mrb[229].mxu1  ;;  %v6293_v44 = vpack.c.bf16 %v6191_v26, %v6190_v55 }
 0x2a3   :  { %v5472_v16 = vmax.f32 %v3853_v48, 0.0  ;;  %v5800_v25 = vmax.f32 %v5165_v27, 0.0  ;;  %v8674_v49 = vpop.f32.mrb[230].mxu0  ;;  %v9002_v29 = vpop.f32.mrb[230].mxu1  ;;  %v6292_v12 = vpack.c.bf16 %v6189_v43, %v6188_v58  ;;  %v12830_v58 = vld [vmem:[#allocation134_spill] sm:$0xff] }
 0x2a4   :  { %v5906_v37 = vmax.f32 %v5330_v61, %v5474_v56  ;;  %v11719_v38 = vmax.f32 %v5658_v2, %v5802_v42  ;;  %v5475_v1 = vmax.f32 %v8674_v49, 0.0  ;;  %v5803_v36 = vmax.f32 %v9002_v29, 0.0  ;;  %v5168_v19 = vpop.f32.mrb[231].mxu1  ;;  %6406 = vrot.lane.b32.xlu0 %v6293_v44, %s9422_s0  ;;  %v3856_v20 = vpop.f32.mrb[231].mxu0  ;;  %v12832_v56 = vld [vmem:[#allocation136_spill] sm:$0xff]  ;;  %v12833_v44 = vld [vmem:[#allocation135_spill] sm:$0xff] }
 0x2a5   :  { %v5904_v4 = vmax.f32 %v5328_v31, %v5472_v16  ;;  %v11722_v10 = vmax.f32 %v5656_v47, %v5800_v25  ;;  %v5801_v55 = vmax.f32 %v5168_v19, 0.0  ;;  %v5473_v26 = vmax.f32 %v3856_v20, 0.0  ;;  %v12834_v47 = vld [vmem:[#allocation137_spill] sm:$0xff]  ;;  %v9400_v49 = vld [vmem:[%s12368_s2 + $0x30] sm:$0xff]  }
 0x2a6   :  { %v6194_v48 = vmax.f32 %v5906_v37, %v11426_v3  ;;  %v5907_v27 = vmax.f32 %v5331_v0, %v5475_v1  ;;  %v11725_v22 = vmax.f32 %v5659_v52, %v5803_v36  ;;  %v5334_v61 = vmax.f32 %v12830_v58, 0.0  ;;  %v12835_v3 = vld [vmem:[#allocation138_spill] sm:$0xff]  ;;  %v12836_v0 = vld [vmem:[#allocation139_spill] sm:$0xff]  ;;  %v12837_v1 = vld [vmem:[#allocation140_spill] sm:$0xff] }
 0x2a7   :  { %v6192_v2 = vmax.f32 %v5904_v4, %v11428_v40  ;;  %v11729_v29 = vmax.f32 %v5657_v46, %v5801_v55  ;;  %v5905_v43 = vmax.f32 %v5329_v35, %v5473_v26  ;;  %v5332_v42 = vmax.f32 %v12832_v56, 0.0  ;;  %v9399_v35 = vld [vmem:[%s12368_s2 + $0x70] sm:$0xff]   ;;  %v12838_v26 = vld [vmem:[#allocation141_spill] sm:$0xff] }
 0x2a8   :  { %12829 = vst [vmem:[#allocation54_spill] sm:$0xff] %v11725_v22  ;;  %v5662_v31 = vmax.f32 %v12833_v44, 0.0  ;;  %v5660_v16 = vmax.f32 %v12834_v47, 0.0  ;;  %v6195_v19 = vmax.f32 %v5907_v27, %v11431_v60  ;;  %6404 = vrot.lane.b32.xlu0 %v6292_v12, %s9422_s0  ;;  %v5335_v37 = vmax.f32 %v12835_v3, 0.0  ;;  %8357 = vmatprep.subr.bf16.mxu1 %v9399_v35  ;;  %v12839_v35 = vld [vmem:[#allocation142_spill] sm:$0xff] }
 0x2a9   :  { %12831 = vst [vmem:[#allocation56_spill] sm:$0xff] %v11729_v29  ;;  %v5663_v52 = vmax.f32 %v12836_v0, 0.0  ;;  %v6193_v25 = vmax.f32 %v5905_v43, %v11435_v62  ;;  %v8677_v40 = vpop.f32.mrb[232].mxu0  ;;  %v9005_v46 = vpop.f32.mrb[232].mxu1  ;;  %v5333_v60 = vmax.f32 %v12837_v1, 0.0  ;;  %v5661_v62 = vmax.f32 %v12838_v26, 0.0  ;;  %8358 = vmatpush3.bf16.msra.mxu1 %v9400_v49 }
 0x2aa   :  { %v5478_v36 = vmax.f32 %v8677_v40, 0.0  ;;  %v5806_v12 = vmax.f32 %v9005_v46, 0.0  ;;  %v3869_v20 = vpop.f32.mrb[233].mxu0  ;;  %v5181_v4 = vpop.f32.mrb[233].mxu1  ;;  %v11746_v55 = vpack.c.bf16 %v6195_v19, %v6194_v48  ;;  %v12840_v49 = vld [vmem:[#allocation144_spill] sm:$0xff] }
 0x2ab   :  { %v5476_v27 = vmax.f32 %v3869_v20, 0.0  ;;  %v5804_v58 = vmax.f32 %v5181_v4, 0.0  ;;  %v8678_v43 = vpop.f32.mrb[234].mxu0  ;;  %v9006_v56 = vpop.f32.mrb[234].mxu1  ;;  %v6294_v44 = vpack.c.bf16 %v6193_v25, %v6192_v2 }
 0x2ac   :  { %v5910_v47 = vmax.f32 %v5334_v61, %v5478_v36  ;;  %v11749_v3 = vmax.f32 %v5662_v31, %v5806_v12  ;;  %v5479_v0 = vmax.f32 %v8678_v43, 0.0  ;;  %v5807_v29 = vmax.f32 %v9006_v56, 0.0  ;;  %v3872_v1 = vpop.f32.mrb[235].mxu0  ;;  %v5184_v40 = vpop.f32.mrb[235].mxu1  ;;  %v12843_v43 = vld [vmem:[#allocation145_spill] sm:$0xff] }
 0x2ad   :  { %v5908_v46 = vmax.f32 %v5332_v42, %v5476_v27  ;;  %v11751_v22 = vmax.f32 %v5660_v16, %v5804_v58  ;;  %v5477_v48 = vmax.f32 %v3872_v1, 0.0  ;;  %v5805_v19 = vmax.f32 %v5184_v40, 0.0  ;;  %6408 = vrot.lane.b32.xlu0 %v6294_v44, %s9422_s0  ;;  %v12841_v16 = vld [vmem:[#allocation143_spill] sm:$0xff]  ;;  %v12842_v27 = vld [vmem:[#allocation146_spill] sm:$0xff] }
 0x2ae   :  { %v6198_v20 = vmax.f32 %v5910_v47, %v11458_v9  ;;  %v5911_v4 = vmax.f32 %v5335_v37, %v5479_v0  ;;  %v11755_v2 = vmax.f32 %v5663_v52, %v5807_v29  ;;  %v5338_v36 = vmax.f32 %v12839_v35, 0.0  ;;  %v12844_v37 = vld [vmem:[#allocation147_spill] sm:$0xff] }
 0x2af   :  { %v6196_v61 = vmax.f32 %v5908_v46, %v11460_v23  ;;  %v5909_v31 = vmax.f32 %v5333_v60, %v5477_v48  ;;  %v11758_v25 = vmax.f32 %v5661_v62, %v5805_v19  ;;  %v5336_v42 = vmax.f32 %v12840_v49, 0.0  ;;  %v12845_v62 = vld [vmem:[#allocation148_spill] sm:$0xff]  ;;  %v12847_v46 = vld [vmem:[#allocation149_spill] sm:$0xff] }
 0x2b0   :  { %v5666_v12 = vmax.f32 %v12841_v16, 0.0  ;;  %v6199_v26 = vmax.f32 %v5911_v4, %v11462_v15  ;;  %v5339_v58 = vmax.f32 %v12842_v27, 0.0  ;;  %v5664_v9 = vmax.f32 %v12843_v43, 0.0 }
 0x2b1   :  { %v5667_v29 = vmax.f32 %v12844_v37, 0.0  ;;  %v6197_v52 = vmax.f32 %v5909_v31, %v11467_v39  ;;  %v8681_v23 = vpop.f32.mrb[236].mxu0  ;;  %v9009_v60 = vpop.f32.mrb[236].mxu1  ;;  %v5337_v56 = vmax.f32 %v12845_v62, 0.0  ;;  %v5665_v15 = vmax.f32 %v12847_v46, 0.0 }
 0x2b2   :  { %v5482_v44 = vmax.f32 %v8681_v23, 0.0  ;;  %v5810_v47 = vmax.f32 %v9009_v60, 0.0  ;;  %v3885_v0 = vpop.f32.mrb[237].mxu0  ;;  %v5197_v1 = vpop.f32.mrb[237].mxu1  ;;  %v11769_v40 = vpack.c.bf16 %v6199_v26, %v6198_v20 }
 0x2b3   :  { %v5480_v48 = vmax.f32 %v3885_v0, 0.0  ;;  %v5808_v19 = vmax.f32 %v5197_v1, 0.0  ;;  %v8682_v4 = vpop.f32.mrb[238].mxu0  ;;  %v9010_v35 = vpop.f32.mrb[238].mxu1  ;;  %v11772_v49 = vpack.c.bf16 %v6197_v52, %v6196_v61 }
 0x2b4   :  { %12846 = vst [vmem:[#allocation55_spill] sm:$0xff] %v11769_v40  ;;  %v5914_v16 = vmax.f32 %v5338_v36, %v5482_v44  ;;  %v11774_v39 = vmax.f32 %v5666_v12, %v5810_v47  ;;  %v5483_v31 = vmax.f32 %v8682_v4, 0.0  ;;  %v5811_v27 = vmax.f32 %v9010_v35, 0.0  ;;  %v3888_v43 = vpop.f32.mrb[239].mxu0  ;;  %v5200_v37 = vpop.f32.mrb[239].mxu1  ;;  %v12848_v12 = vld [vmem:[#allocation150_spill] sm:$0xff] }
 0x2b5   :  { %v5912_v23 = vmax.f32 %v5336_v42, %v5480_v48  ;;  %v11776_v60 = vmax.f32 %v5664_v9, %v5808_v19  ;;  %v5481_v20 = vmax.f32 %v3888_v43, 0.0  ;;  %v5809_v26 = vmax.f32 %v5200_v37, 0.0  ;;  %v12849_v47 = vld [vmem:[#allocation152_spill] sm:$0xff]  ;;  %v12850_v4 = vld [vmem:[#allocation151_spill] sm:$0xff]  ;;  %v12851_v48 = vld [vmem:[#allocation154_spill] sm:$0xff] }
 0x2b6   :  { %v6202_v62 = vmax.f32 %v5914_v16, %v11486_v24  ;;  %v5915_v0 = vmax.f32 %v5339_v58, %v5483_v31  ;;  %v11779_v1 = vmax.f32 %v5667_v29, %v5811_v27  ;;  %v5342_v44 = vmax.f32 %v12848_v12, 0.0  ;;  %v12852_v35 = vld [vmem:[#allocation153_spill] sm:$0xff]  ;;  %v12853_v58 = vld [vmem:[#allocation155_spill] sm:$0xff] }
 0x2b7   :  { %v6200_v61 = vmax.f32 %v5912_v23, %v11489_v32  ;;  %v5913_v52 = vmax.f32 %v5337_v56, %v5481_v20  ;;  %v11782_v36 = vmax.f32 %v5665_v15, %v5809_v26  ;;  %v5340_v46 = vmax.f32 %v12849_v47, 0.0  ;;  %v12854_v15 = vld [vmem:[#allocation156_spill] sm:$0xff]  ;;  %v12856_v26 = vld [vmem:[#allocation157_spill] sm:$0xff] }
 0x2b8   :  { %v5670_v42 = vmax.f32 %v12850_v4, 0.0  ;;  %v6203_v9 = vmax.f32 %v5915_v0, %v11492_v45  ;;  %v5343_v19 = vmax.f32 %v12851_v48, 0.0  ;;  %v5668_v24 = vmax.f32 %v12852_v35, 0.0 }
 0x2b9   :  { %v5671_v29 = vmax.f32 %v12853_v58, 0.0  ;;  %v6201_v16 = vmax.f32 %v5913_v52, %v11497_v17  ;;  %v8685_v32 = vpop.f32.mrb[240].mxu0  ;;  %v9013_v56 = vpop.f32.mrb[240].mxu1  ;;  %v5341_v31 = vmax.f32 %v12854_v15, 0.0  ;;  %v5669_v45 = vmax.f32 %v12856_v26, 0.0 }
 0x2ba   :  { %v5486_v27 = vmax.f32 %v8685_v32, 0.0  ;;  %v5814_v43 = vmax.f32 %v9013_v56, 0.0  ;;  %v3901_v37 = vpop.f32.mrb[241].mxu0  ;;  %v5213_v23 = vpop.f32.mrb[241].mxu1  ;;  %v11793_v20 = vpack.c.bf16 %v6203_v9, %v6202_v62 }
 0x2bb   :  { %v5484_v0 = vmax.f32 %v3901_v37, 0.0  ;;  %v5812_v12 = vmax.f32 %v5213_v23, 0.0  ;;  %v8686_v47 = vpop.f32.mrb[242].mxu0  ;;  %v9014_v4 = vpop.f32.mrb[242].mxu1  ;;  %v11796_v48 = vpack.c.bf16 %v6201_v16, %v6200_v61 }
 0x2bc   :  { %12855 = vst [vmem:[#allocation58_spill] sm:$0xff] %v11793_v20  ;;  %v5918_v35 = vmax.f32 %v5342_v44, %v5486_v27  ;;  %v11798_v17 = vmax.f32 %v5670_v42, %v5814_v43  ;;  %v5487_v52 = vmax.f32 %v8686_v47, 0.0  ;;  %v5815_v58 = vmax.f32 %v9014_v4, 0.0  ;;  %v3904_v15 = vpop.f32.mrb[243].mxu0  ;;  %v5216_v32 = vpop.f32.mrb[243].mxu1  ;;  %v12858_v42 = vld [vmem:[#allocation158_spill] sm:$0xff] }
 0x2bd   :  { %12857 = vst [vmem:[#allocation57_spill] sm:$0xff] %v11796_v48  ;;  %v5916_v56 = vmax.f32 %v5340_v46, %v5484_v0  ;;  %v11800_v40 = vmax.f32 %v5668_v24, %v5812_v12  ;;  %v5485_v62 = vmax.f32 %v3904_v15, 0.0  ;;  %v5813_v9 = vmax.f32 %v5216_v32, 0.0  ;;  %v12859_v43 = vld [vmem:[#allocation160_spill] sm:$0xff]  ;;  %v12860_v4 = vld [vmem:[#allocation159_spill] sm:$0xff]  ;;  %v12861_v0 = vld [vmem:[#allocation162_spill] sm:$0xff] }
 0x2be   :  { %v6206_v26 = vmax.f32 %v5918_v35, %v11524_v8  ;;  %v5919_v37 = vmax.f32 %v5343_v19, %v5487_v52  ;;  %v11803_v23 = vmax.f32 %v5671_v29, %v5815_v58  ;;  %v5346_v27 = vmax.f32 %v12858_v42, 0.0  ;;  %v12862_v15 = vld [vmem:[#allocation161_spill] sm:$0xff]  ;;  %v12863_v19 = vld [vmem:[#allocation163_spill] sm:$0xff] }
 0x2bf   :  { %v6204_v61 = vmax.f32 %v5916_v56, %v11526_v33  ;;  %v5917_v16 = vmax.f32 %v5341_v31, %v5485_v62  ;;  %v11806_v44 = vmax.f32 %v5669_v45, %v5813_v9  ;;  %v5344_v47 = vmax.f32 %v12859_v43, 0.0  ;;  %v12864_v45 = vld [vmem:[#allocation164_spill] sm:$0xff]  ;;  %v12865_v42 = vld [vmem:[#allocation165_spill] sm:$0xff] }
 0x2c0   :  { %v5674_v46 = vmax.f32 %v12860_v4, 0.0  ;;  %v6207_v24 = vmax.f32 %v5919_v37, %v11530_v13  ;;  %v5347_v12 = vmax.f32 %v12861_v0, 0.0  ;;  %v5672_v8 = vmax.f32 %v12862_v15, 0.0 }
 0x2c1   :  { %v5675_v29 = vmax.f32 %v12863_v19, 0.0  ;;  %v6205_v35 = vmax.f32 %v5917_v16, %v11534_v14  ;;  %v8689_v33 = vpop.f32.mrb[244].mxu0  ;;  %v9017_v31 = vpop.f32.mrb[244].mxu1  ;;  %v5345_v52 = vmax.f32 %v12864_v45, 0.0  ;;  %v5673_v43 = vmax.f32 %v12865_v42, 0.0 }
 0x2c2   :  { %v5490_v58 = vmax.f32 %v8689_v33, 0.0  ;;  %v5818_v32 = vmax.f32 %v9017_v31, 0.0  ;;  %v3917_v56 = vpop.f32.mrb[245].mxu0  ;;  %v5229_v62 = vpop.f32.mrb[245].mxu1  ;;  %v6301_v9 = vpack.c.bf16 %v6207_v24, %v6206_v26 }
 0x2c3   :  { %v5488_v13 = vmax.f32 %v3917_v56, 0.0  ;;  %v5816_v37 = vmax.f32 %v5229_v62, 0.0  ;;  %v8690_v4 = vpop.f32.mrb[246].mxu0  ;;  %v9018_v0 = vpop.f32.mrb[246].mxu1  ;;  %v6300_v15 = vpack.c.bf16 %v6205_v35, %v6204_v61  ;;  %v12866_v62 = vld [vmem:[#allocation166_spill] sm:$0xff] }
 0x2c4   :  { %v5922_v20 = vmax.f32 %v5346_v27, %v5490_v58  ;;  %v11818_v19 = vmax.f32 %v5674_v46, %v5818_v32  ;;  %v5491_v14 = vmax.f32 %v8690_v4, 0.0  ;;  %v5819_v16 = vmax.f32 %v9018_v0, 0.0  ;;  %v5232_v48 = vpop.f32.mrb[247].mxu1  ;;  %6430 = vrot.lane.b32.xlu0 %v6301_v9, %s9423_s21  ;;  %v3920_v33 = vpop.f32.mrb[247].mxu0 }
 0x2c5   :  { %v5920_v31 = vmax.f32 %v5344_v47, %v5488_v13  ;;  %v11821_v45 = vmax.f32 %v5672_v8, %v5816_v37  ;;  %v5817_v26 = vmax.f32 %v5232_v48, 0.0  ;;  %v5489_v24 = vmax.f32 %v3920_v33, 0.0  ;;  %6428 = vrot.lane.b32.xlu1 %v6300_v15, %s9423_s21 }
 0x2c6   :  { %v6210_v56 = vmax.f32 %v5922_v20, %v11557_v11  ;;  %v5923_v61 = vmax.f32 %v5347_v12, %v5491_v14  ;;  %v11825_v27 = vmax.f32 %v5675_v29, %v5819_v16  ;;  %v5350_v48 = vmax.f32 %v12866_v62, 0.0  ;;  %v12867_v11 = vld [vmem:[#allocation168_spill] sm:$0xff] }
 0x2c7   :  { %v6208_v46 = vmax.f32 %v5920_v31, %v11559_v59  ;;  %v11828_v35 = vmax.f32 %v5673_v43, %v5817_v26  ;;  %v5921_v58 = vmax.f32 %v5345_v52, %v5489_v24  ;;  %v5348_v20 = vmax.f32 %v12867_v11, 0.0  ;;  %v12868_v59 = vld [vmem:[#allocation170_spill] sm:$0xff]  ;;  %v12871_v62 = vld [vmem:[#allocation176_spill] sm:$0xff] }
 0x2c8   :  { %v6211_v32 = vmax.f32 %v5923_v61, %v11562_v30  ;;  %v5351_v43 = vmax.f32 %v12868_v59, 0.0  ;;  %v12869_v30 = vld [vmem:[#allocation172_spill] sm:$0xff]  ;;  %v12872_v11 = vld [vmem:[#allocation178_spill] sm:$0xff] }
 0x2c9   :  { %v6209_v47 = vmax.f32 %v5921_v58, %v11566_v34  ;;  %v8693_v8 = vpop.f32.mrb[248].mxu0  ;;  %v5349_v15 = vmax.f32 %v12869_v30, 0.0 }
 0x2ca   :  { %v5494_v9 = vmax.f32 %v8693_v8, 0.0  ;;  %v3933_v42 = vpop.f32.mrb[249].mxu0  ;;  %v11833_v13 = vpack.c.bf16 %v6211_v32, %v6210_v56 }
 0x2cb   :  { %v5492_v12 = vmax.f32 %v3933_v42, 0.0  ;;  %v8694_v29 = vpop.f32.mrb[250].mxu0  ;;  %v6302_v37 = vpack.c.bf16 %v6209_v47, %v6208_v46  ;;  %v12870_v46 = vld [vmem:[#allocation174_spill] sm:$0xff] }
 0x2cc   :  { %v5926_v4 = vmax.f32 %v5350_v48, %v5494_v9  ;;  %v5495_v52 = vmax.f32 %v8694_v29, 0.0  ;;  %v3936_v0 = vpop.f32.mrb[251].mxu0  ;;  %v5354_v58 = vmax.f32 %v12870_v46, 0.0  ;;  %v5352_v48 = vmax.f32 %v12871_v62, 0.0  ;;  %v12873_v29 = vld [vmem:[#allocation180_spill] sm:$0xff] }
 0x2cd   :  { %v5924_v34 = vmax.f32 %v5348_v20, %v5492_v12  ;;  %v5493_v14 = vmax.f32 %v3936_v0, 0.0  ;;  %6432 = vrot.lane.b32.xlu0 %v6302_v37, %s9423_s21  ;;  %v12877_v62 = vld [vmem:[#allocation188_spill] sm:$0xff] }
 0x2ce   :  { %v6214_v16 = vmax.f32 %v5926_v4, %v11589_v5  ;;  %v5927_v33 = vmax.f32 %v5351_v43, %v5495_v52 }
 0x2cf   :  { %v6212_v31 = vmax.f32 %v5924_v34, %v11591_v54  ;;  %v5925_v26 = vmax.f32 %v5349_v15, %v5493_v14  ;;  %v5355_v54 = vmax.f32 %v12872_v11, 0.0  ;;  %v12874_v14 = vld [vmem:[#allocation182_spill] sm:$0xff] }
 0x2d0   :  { %v6215_v24 = vmax.f32 %v5927_v33, %v11594_v53 }
 0x2d1   :  { %v6213_v56 = vmax.f32 %v5925_v26, %v11598_v50  ;;  %v8697_v61 = vpop.f32.mrb[252].mxu0  ;;  %v5353_v50 = vmax.f32 %v12873_v29, 0.0 }
 0x2d2   :  { %v5498_v32 = vmax.f32 %v8697_v61, 0.0  ;;  %v3949_v47 = vpop.f32.mrb[253].mxu0  ;;  %v11844_v8 = vpack.c.bf16 %v6215_v24, %v6214_v16  ;;  %v5358_v16 = vmax.f32 %v12874_v14, 0.0  ;;  %v12875_v24 = vld [vmem:[#allocation184_spill] sm:$0xff] }
 0x2d3   :  { %v5496_v9 = vmax.f32 %v3949_v47, 0.0  ;;  %v8698_v42 = vpop.f32.mrb[254].mxu0  ;;  %v11847_v5 = vpack.c.bf16 %v6213_v56, %v6212_v31  ;;  %v5356_v56 = vmax.f32 %v12875_v24, 0.0 }
 0x2d4   :  { %v5930_v20 = vmax.f32 %v5354_v58, %v5498_v32  ;;  %v5499_v12 = vmax.f32 %v8698_v42, 0.0  ;;  %v3952_v53 = vpop.f32.mrb[255].mxu0  ;;  %v12876_v58 = vld [vmem:[#allocation186_spill] sm:$0xff] }
 0x2d5   :  { %v5928_v37 = vmax.f32 %v5352_v48, %v5496_v9  ;;  %v5497_v59 = vmax.f32 %v3952_v53, 0.0  ;;  %v12878_v53 = vld [vmem:[#allocation43_spill] sm:$0xff] }
 0x2d6   :  { %v6218_v43 = vmax.f32 %v5930_v20, %v11621_v21  ;;  %v5931_v4 = vmax.f32 %v5355_v54, %v5499_v12 }
 0x2d7   :  { %v6216_v52 = vmax.f32 %v5928_v37, %v11623_v51  ;;  %v5929_v0 = vmax.f32 %v5353_v50, %v5497_v59  ;;  %v5359_v51 = vmax.f32 %v12876_v58, 0.0  ;;  %v12879_v37 = vld [vmem:[#allocation190_spill] sm:$0xff] }
 0x2d8   :  { %v6219_v30 = vmax.f32 %v5931_v4, %v11626_v41  ;;  %v5362_v59 = vmax.f32 %v12879_v37, 0.0 }
 0x2d9   :  { %v6217_v15 = vmax.f32 %v5929_v0, %v11630_v57  ;;  %v8701_v34 = vpop.f32.mrb[0].mxu0  ;;  %v5357_v57 = vmax.f32 %v12877_v62, 0.0  ;;  %v12880_v0 = vld [vmem:[#allocation192_spill] sm:$0xff] }
 0x2da   :  { %v5502_v33 = vmax.f32 %v8701_v34, 0.0  ;;  %v3965_v31 = vpop.f32.mrb[1].mxu0  ;;  %v11856_v26 = vpack.c.bf16 %v6219_v30, %v6218_v43  ;;  %v5360_v30 = vmax.f32 %v12880_v0, 0.0 }
 0x2db   :  { %v5500_v61 = vmax.f32 %v3965_v31, 0.0  ;;  %v8702_v46 = vpop.f32.mrb[2].mxu0  ;;  %v11859_v21 = vpack.c.bf16 %v6217_v15, %v6216_v52  ;;  %v12882_v31 = vld [vmem:[#allocation196_spill] sm:$0xff] }
 0x2dc   :  { %v5934_v32 = vmax.f32 %v5358_v16, %v5502_v33  ;;  %v5503_v47 = vmax.f32 %v8702_v46, 0.0  ;;  %v3968_v41 = vpop.f32.mrb[3].mxu0  ;;  %v5361_v24 = vmax.f32 %v12882_v31, 0.0 }
 0x2dd   :  { %v5932_v48 = vmax.f32 %v5356_v56, %v5500_v61  ;;  %v5501_v9 = vmax.f32 %v3968_v41, 0.0  ;;  %v12884_v41 = vld [vmem:[#allocation48_spill] sm:$0xff] }
 0x2de   :  { %v6222_v42 = vmax.f32 %v5934_v32, %v11650_v7  ;;  %v5935_v11 = vmax.f32 %v5359_v51, %v5503_v47  ;;  %v12881_v7 = vld [vmem:[#allocation194_spill] sm:$0xff] }
 0x2df   :  { %v6220_v54 = vmax.f32 %v5932_v48, %v11652_v18  ;;  %v5933_v20 = vmax.f32 %v5357_v57, %v5501_v9  ;;  %v5363_v16 = vmax.f32 %v12881_v7, 0.0  ;;  %v12883_v51 = vld [vmem:[#allocation46_spill] sm:$0xff]  ;;  %v9401_v57 = vld [vmem:[%s12368_s2 + $0x78] sm:$0xff]   ;;  %v12885_v9 = vld [vmem:[#allocation47_spill] sm:$0xff] }
 0x2e0   :  { %v6223_v12 = vmax.f32 %v5935_v11, %v11655_v28  ;;  %v9402_v48 = vld [vmem:[%s12368_s2 + $0x38] sm:$0xff]   ;;  %8359 = vmatprep.subr.bf16.mxu1 %v9401_v57 }
 0x2e1   :  { %v6221_v29 = vmax.f32 %v5933_v20, %v12878_v53  ;;  %v8705_v50 = vpop.f32.mrb[4].mxu0  ;;  %8360 = vmatpush3.bf16.msra.mxu1 %v9402_v48  ;;  %v12894_v48 = vld [vmem:[#allocation208_spill] sm:$0xff] }
 0x2e2   :  { %v5506_v43 = vmax.f32 %v8705_v50, 0.0  ;;  %v3981_v4 = vpop.f32.mrb[5].mxu0  ;;  %v6309_v52 = vpack.c.bf16 %v6223_v12, %v6222_v42 }
 0x2e3   :  { %v5504_v15 = vmax.f32 %v3981_v4, 0.0  ;;  %v8706_v34 = vpop.f32.mrb[6].mxu0  ;;  %v6308_v14 = vpack.c.bf16 %v6221_v29, %v6220_v54  ;;  %v12887_v29 = vld [vmem:[#allocation200_spill] sm:$0xff]  ;;  %v12888_v4 = vld [vmem:[#allocation202_spill] sm:$0xff] }
 0x2e4   :  { %v5938_v33 = vmax.f32 %v5362_v59, %v5506_v43  ;;  %v5507_v18 = vmax.f32 %v8706_v34, 0.0  ;;  %6454 = vrot.lane.b32.xlu0 %v6309_v52, %s9421_s19  ;;  %v3984_v28 = vpop.f32.mrb[7].mxu0  ;;  %v5364_v50 = vmax.f32 %v12887_v29, 0.0  ;;  %v5367_v52 = vmax.f32 %v12888_v4, 0.0  ;;  %v12889_v34 = vld [vmem:[#allocation204_spill] sm:$0xff] }
 0x2e5   :  { %v5936_v56 = vmax.f32 %v5360_v30, %v5504_v15  ;;  %v5505_v61 = vmax.f32 %v3984_v28, 0.0  ;;  %v12890_v28 = vld [vmem:[#allocation51_spill] sm:$0xff] }
 0x2e6   :  { %v6226_v46 = vmax.f32 %v5938_v33, %v11675_v6  ;;  %v5939_v58 = vmax.f32 %v5363_v16, %v5507_v18  ;;  %v12886_v6 = vld [vmem:[#allocation198_spill] sm:$0xff] }
 0x2e7   :  { %v6224_v32 = vmax.f32 %v5936_v56, %v12883_v51  ;;  %v5937_v47 = vmax.f32 %v5361_v24, %v5505_v61  ;;  %v5366_v54 = vmax.f32 %v12886_v6, 0.0  ;;  %v12891_v56 = vld [vmem:[#allocation52_spill] sm:$0xff]  ;;  %v12895_v6 = vld [vmem:[#allocation210_spill] sm:$0xff] }
 0x2e8   :  { %v6227_v62 = vmax.f32 %v5939_v58, %v12884_v41  ;;  %6452 = vrot.lane.b32.xlu0 %v6308_v14, %s9421_s19  ;;  %v5365_v14 = vmax.f32 %v12889_v34, 0.0 }
 0x2e9   :  { %v6225_v42 = vmax.f32 %v5937_v47, %v12885_v9  ;;  %v8709_v11 = vpop.f32.mrb[8].mxu0  ;;  %v5368_v9 = vmax.f32 %v12894_v48, 0.0 }
 0x2ea   :  { %v5510_v20 = vmax.f32 %v8709_v11, 0.0  ;;  %v3997_v12 = vpop.f32.mrb[9].mxu0  ;;  %v11884_v53 = vpack.c.bf16 %v6227_v62, %v6226_v46  ;;  %v12892_v46 = vld [vmem:[#allocation53_spill] sm:$0xff] }
 0x2eb   :  { %v5508_v37 = vmax.f32 %v3997_v12, 0.0  ;;  %v8710_v59 = vpop.f32.mrb[10].mxu0  ;;  %v6310_v43 = vpack.c.bf16 %v6225_v42, %v6224_v32  ;;  %v12893_v32 = vld [vmem:[#allocation206_spill] sm:$0xff] }
 0x2ec   :  { %v5942_v0 = vmax.f32 %v5366_v54, %v5510_v20  ;;  %v5511_v30 = vmax.f32 %v8710_v59, 0.0  ;;  %v4000_v15 = vpop.f32.mrb[11].mxu0  ;;  %v5370_v47 = vmax.f32 %v12893_v32, 0.0  ;;  %v5371_v54 = vmax.f32 %v12895_v6, 0.0 }
 0x2ed   :  { %v5940_v7 = vmax.f32 %v5364_v50, %v5508_v37  ;;  %v5509_v16 = vmax.f32 %v4000_v15, 0.0  ;;  %6456 = vrot.lane.b32.xlu0 %v6310_v43, %s9421_s19  ;;  %v12896_v50 = vld [vmem:[#allocation212_spill] sm:$0xff]  ;;  %v12897_v15 = vld [vmem:[#allocation54_spill] sm:$0xff] }
 0x2ee   :  { %v6230_v33 = vmax.f32 %v5942_v0, %v11699_v63  ;;  %v5943_v18 = vmax.f32 %v5367_v52, %v5511_v30  ;;  %v5369_v37 = vmax.f32 %v12896_v50, 0.0 }
 0x2ef   :  { %v6228_v31 = vmax.f32 %v5940_v7, %v12890_v28  ;;  %v5941_v24 = vmax.f32 %v5365_v14, %v5509_v16  ;;  %v12898_v14 = vld [vmem:[#allocation56_spill] sm:$0xff] }
 0x2f0   :  { %v6231_v61 = vmax.f32 %v5943_v18, %v12891_v56  ;;  %v12900_v56 = vld [vmem:[#allocation216_spill] sm:$0xff] }
 0x2f1   :  { %v6229_v58 = vmax.f32 %v5941_v24, %v12892_v46  ;;  %v8713_v51 = vpop.f32.mrb[12].mxu0 }
 0x2f2   :  { %v5514_v41 = vmax.f32 %v8713_v51, 0.0  ;;  %v4013_v62 = vpop.f32.mrb[13].mxu0  ;;  %v11895_v57 = vpack.c.bf16 %v6231_v61, %v6230_v33  ;;  %v12899_v33 = vld [vmem:[#allocation214_spill] sm:$0xff]  ;;  %v5372_v61 = vmax.f32 %v12900_v56, 0.0 }
 0x2f3   :  { %v5512_v42 = vmax.f32 %v4013_v62, 0.0  ;;  %v8714_v11 = vpop.f32.mrb[14].mxu0  ;;  %v11898_v63 = vpack.c.bf16 %v6229_v58, %v6228_v31  ;;  %v5374_v18 = vmax.f32 %v12899_v33, 0.0  ;;  %v12901_v51 = vld [vmem:[#allocation218_spill] sm:$0xff]  ;;  %v12902_v62 = vld [vmem:[#allocation220_spill] sm:$0xff] }
 0x2f4   :  { %v5946_v20 = vmax.f32 %v5370_v47, %v5514_v41  ;;  %v5515_v12 = vmax.f32 %v8714_v11, 0.0  ;;  %v4016_v29 = vpop.f32.mrb[15].mxu0  ;;  %v5373_v48 = vmax.f32 %v12902_v62, 0.0  ;;  %v12906_v33 = vld [vmem:[#allocation228_spill] sm:$0xff] }
 0x2f5   :  { %v5944_v59 = vmax.f32 %v5368_v9, %v5512_v42  ;;  %v5513_v43 = vmax.f32 %v4016_v29, 0.0 }
 0x2f6   :  { %v6234_v4 = vmax.f32 %v5946_v20, %v11719_v38  ;;  %v5947_v52 = vmax.f32 %v5371_v54, %v5515_v12 }
 0x2f7   :  { %v6232_v0 = vmax.f32 %v5944_v59, %v11722_v10  ;;  %v5945_v30 = vmax.f32 %v5369_v37, %v5513_v43  ;;  %v5375_v10 = vmax.f32 %v12901_v51, 0.0  ;;  %v12903_v37 = vld [vmem:[#allocation222_spill] sm:$0xff] }
 0x2f8   :  { %v6235_v34 = vmax.f32 %v5947_v52, %v12897_v15  ;;  %v5378_v59 = vmax.f32 %v12903_v37, 0.0 }
 0x2f9   :  { %v6233_v7 = vmax.f32 %v5945_v30, %v12898_v14  ;;  %v8717_v16 = vpop.f32.mrb[16].mxu0  ;;  %v12905_v14 = vld [vmem:[#allocation226_spill] sm:$0xff] }
 0x2fa   :  { %v5518_v28 = vmax.f32 %v8717_v16, 0.0  ;;  %v4029_v31 = vpop.f32.mrb[17].mxu0  ;;  %v11907_v24 = vpack.c.bf16 %v6235_v34, %v6234_v4 }
 0x2fb   :  { %v5516_v46 = vmax.f32 %v4029_v31, 0.0  ;;  %v8718_v58 = vpop.f32.mrb[18].mxu0  ;;  %v11910_v38 = vpack.c.bf16 %v6233_v7, %v6232_v0  ;;  %v12904_v0 = vld [vmem:[#allocation224_spill] sm:$0xff] }
 0x2fc   :  { %v5950_v32 = vmax.f32 %v5374_v18, %v5518_v28  ;;  %v5519_v47 = vmax.f32 %v8718_v58, 0.0  ;;  %v4032_v41 = vpop.f32.mrb[19].mxu0  ;;  %v5376_v30 = vmax.f32 %v12904_v0, 0.0 }
 0x2fd   :  { %v5948_v9 = vmax.f32 %v5372_v61, %v5516_v46  ;;  %v5517_v42 = vmax.f32 %v4032_v41, 0.0 }
 0x2fe   :  { %v6238_v11 = vmax.f32 %v5950_v32, %v11749_v3  ;;  %v5951_v6 = vmax.f32 %v5375_v10, %v5519_v47  ;;  %v12907_v32 = vld [vmem:[#allocation230_spill] sm:$0xff] }
 0x2ff   :  { %v6236_v54 = vmax.f32 %v5948_v9, %v11751_v22  ;;  %v5949_v20 = vmax.f32 %v5373_v48, %v5517_v42  ;;  %v5379_v22 = vmax.f32 %v12905_v14, 0.0  ;;  %v5382_v47 = vmax.f32 %v12907_v32, 0.0  ;;  %v12908_v9 = vld [vmem:[#allocation232_spill] sm:$0xff]  ;;  %v12911_v14 = vld [vmem:[#allocation238_spill] sm:$0xff] }
 0x300   :  { %v6239_v12 = vmax.f32 %v5951_v6, %v11755_v2  ;;  %v5380_v42 = vmax.f32 %v12908_v9, 0.0  ;;  %v12915_v9 = vld [vmem:[#allocation39_spill] sm:$0xff] }
 0x301   :  { %v6237_v29 = vmax.f32 %v5949_v20, %v11758_v25  ;;  %v8721_v50 = vpop.f32.mrb[20].mxu0  ;;  %v5377_v25 = vmax.f32 %v12906_v33, 0.0  ;;  %v12912_v33 = vld [vmem:[#allocation240_spill] sm:$0xff] }
 0x302   :  { %v11919_v43 = vpack.c.bf16 %v6239_v12, %v6238_v11  ;;  %v5522_v4 = vmax.f32 %v8721_v50, 0.0  ;;  %v4045_v52 = vpop.f32.mrb[21].mxu0 }
 0x303   :  { %v11922_v15 = vpack.c.bf16 %v6237_v29, %v6236_v54  ;;  %v5520_v3 = vmax.f32 %v4045_v52, 0.0  ;;  %v8722_v34 = vpop.f32.mrb[22].mxu0  ;;  %v12909_v54 = vld [vmem:[#allocation234_spill] sm:$0xff]  ;;  %v12910_v29 = vld [vmem:[#allocation236_spill] sm:$0xff] }
 0x304   :  { %v5954_v7 = vmax.f32 %v5378_v59, %v5522_v4  ;;  %v5523_v16 = vmax.f32 %v8722_v34, 0.0  ;;  %v4048_v2 = vpop.f32.mrb[23].mxu0 }
 0x305   :  { %v5952_v18 = vmax.f32 %v5376_v30, %v5520_v3  ;;  %v5521_v28 = vmax.f32 %v4048_v2, 0.0 }
 0x306   :  { %v6242_v31 = vmax.f32 %v5954_v7, %v11774_v39  ;;  %v5955_v56 = vmax.f32 %v5379_v22, %v5523_v16  ;;  %v5386_v22 = vmax.f32 %v12911_v14, 0.0 }
 0x307   :  { %v6240_v61 = vmax.f32 %v5952_v18, %v11776_v60  ;;  %v5953_v46 = vmax.f32 %v5377_v25, %v5521_v28  ;;  %v5383_v60 = vmax.f32 %v12909_v54, 0.0  ;;  %v5384_v25 = vmax.f32 %v12912_v33, 0.0  ;;  %v12921_v33 = vld [vmem:[#allocation247_spill] sm:$0xff] }
 0x308   :  { %v6243_v58 = vmax.f32 %v5955_v56, %v11779_v1 }
 0x309   :  { %v6241_v51 = vmax.f32 %v5953_v46, %v11782_v36  ;;  %v8725_v10 = vpop.f32.mrb[24].mxu0  ;;  %v5381_v36 = vmax.f32 %v12910_v29, 0.0 }
 0x30a   :  { %v11931_v41 = vpack.c.bf16 %v6243_v58, %v6242_v31  ;;  %v5526_v62 = vmax.f32 %v8725_v10, 0.0  ;;  %v4061_v48 = vpop.f32.mrb[25].mxu0  ;;  %v12913_v31 = vld [vmem:[#allocation242_spill] sm:$0xff] }
 0x30b   :  { %v11934_v11 = vpack.c.bf16 %v6241_v51, %v6240_v61  ;;  %v5524_v39 = vmax.f32 %v4061_v48, 0.0  ;;  %v8726_v6 = vpop.f32.mrb[26].mxu0 }
 0x30c   :  { %v5958_v20 = vmax.f32 %v5382_v47, %v5526_v62  ;;  %v5527_v12 = vmax.f32 %v8726_v6, 0.0  ;;  %v4064_v1 = vpop.f32.mrb[27].mxu0 }
 0x30d   :  { %v5956_v50 = vmax.f32 %v5380_v42, %v5524_v39  ;;  %v5525_v37 = vmax.f32 %v4064_v1, 0.0 }
 0x30e   :  { %v6246_v59 = vmax.f32 %v5958_v20, %v11798_v17  ;;  %v5959_v4 = vmax.f32 %v5383_v60, %v5527_v12  ;;  %v12916_v60 = vld [vmem:[#allocation167_spill] sm:$0xff] }
 0x30f   :  { %v6244_v52 = vmax.f32 %v5956_v50, %v11800_v40  ;;  %v5957_v0 = vmax.f32 %v5381_v36, %v5525_v37  ;;  %v5387_v40 = vmax.f32 %v12913_v31, 0.0  ;;  %v5678_v20 = vmax.f32 %v12916_v60, 0.0  ;;  %v12917_v36 = vld [vmem:[#allocation169_spill] sm:$0xff]  ;;  %v12922_v31 = vld [vmem:[#allocation248_spill] sm:$0xff] }
 0x310   :  { %v6247_v30 = vmax.f32 %v5959_v4, %v11803_v23  ;;  %v12918_v4 = vld [vmem:[#allocation171_spill] sm:$0xff] }
 0x311   :  { %v6245_v3 = vmax.f32 %v5957_v0, %v11806_v44  ;;  %v8729_v34 = vpop.f32.mrb[28].mxu0  ;;  %v12914_v44 = vld [vmem:[#allocation244_spill] sm:$0xff] }
 0x312   :  { %v11943_v7 = vpack.c.bf16 %v6247_v30, %v6246_v59  ;;  %v5530_v16 = vmax.f32 %v8729_v34, 0.0  ;;  %v4077_v2 = vpop.f32.mrb[29].mxu0  ;;  %v5385_v46 = vmax.f32 %v12914_v44, 0.0  ;;  %v12919_v30 = vld [vmem:[#allocation173_spill] sm:$0xff]  ;;  %v9404_v44 = vld [vmem:[%s12368_s2 + $0x40] sm:$0xff]  }
 0x313   :  { %v11946_v18 = vpack.c.bf16 %v6245_v3, %v6244_v52  ;;  %v5528_v17 = vmax.f32 %v4077_v2, 0.0  ;;  %v8730_v28 = vpop.f32.mrb[30].mxu0  ;;  %v5679_v52 = vmax.f32 %v12918_v4, 0.0  ;;  %v5677_v3 = vmax.f32 %v12919_v30, 0.0  ;;  %v12930_v30 = vld [vmem:[#allocation251_spill] sm:$0xff] }
 0x314   :  { %v5962_v56 = vmax.f32 %v5386_v22, %v5530_v16  ;;  %v5531_v61 = vmax.f32 %v8730_v28, 0.0  ;;  %v4080_v23 = vpop.f32.mrb[31].mxu0  ;;  %v12920_v22 = vld [vmem:[#allocation246_spill] sm:$0xff] }
 0x315   :  { %v5960_v58 = vmax.f32 %v5384_v25, %v5528_v17  ;;  %v5529_v51 = vmax.f32 %v4080_v23, 0.0  ;;  %v9403_v23 = vld [vmem:[%s12368_s2 + $0x80] sm:$0xff]  }
 0x316   :  { %v6250_v10 = vmax.f32 %v5962_v56, %v11818_v19  ;;  %v5963_v32 = vmax.f32 %v5387_v40, %v5531_v61  ;;  %v6407_v47 = vpop.permute.xlu0 %6406  ;;  %v12923_v56 = vld [vmem:[#allocation41_spill] sm:$0xff]  ;;  %8361 = vmatprep.subr.bf16.mxu1 %v9403_v23 }
 0x317   :  { %v6248_v62 = vmax.f32 %v5960_v58, %v11821_v45  ;;  %v5961_v48 = vmax.f32 %v5385_v46, %v5529_v51  ;;  %v11954_v42 = vsel %vm6468_vm1, %v12915_v9, %v6407_v47  ;;  %v5676_v45 = vmax.f32 %v12917_v36, 0.0  ;;  %v12924_v46 = vld [vmem:[#allocation249_spill] sm:$0xff]  ;;  %8362 = vmatpush3.bf16.msra.mxu1 %v9404_v44 }
 0x318   :  { %v6251_v39 = vmax.f32 %v5963_v32, %v11825_v27  ;;  %v12926_v9 = vld [vmem:[#allocation177_spill] sm:$0xff] }
 0x319   :  { %v6249_v6 = vmax.f32 %v5961_v48, %v11828_v35  ;;  %v8733_v54 = vpop.f32.mrb[32].mxu0 }
 0x31a   :  { %v11959_v12 = vpack.c.bf16 %v6251_v39, %v6250_v10  ;;  %v5534_v1 = vmax.f32 %v8733_v54, 0.0  ;;  %v11961_v19 = vpop.permute.xlu0 %6404  ;;  %v4093_v29 = vpop.f32.mrb[33].mxu0  ;;  %v12925_v10 = vld [vmem:[#allocation175_spill] sm:$0xff]  ;;  %v5680_v39 = vmax.f32 %v12926_v9, 0.0  ;;  %v12936_v9 = vld [vmem:[#allocation189_spill] sm:$0xff] }
 0x31b   :  { %v11964_v50 = vpack.c.bf16 %v6249_v6, %v6248_v62  ;;  %v5532_v37 = vmax.f32 %v4093_v29, 0.0  ;;  %v8734_v59 = vpop.f32.mrb[34].mxu0  ;;  %v5682_v32 = vmax.f32 %v12925_v10, 0.0 }
 0x31c   :  { %v5966_v27 = vmax.f32 %v5534_v1, %v5678_v20  ;;  %v5535_v0 = vmax.f32 %v8734_v59, 0.0  ;;  %v4096_v35 = vpop.f32.mrb[35].mxu0  ;;  %v12927_v20 = vld [vmem:[#allocation179_spill] sm:$0xff] }
 0x31d   :  { %v5964_v34 = vmax.f32 %v5532_v37, %v5676_v45  ;;  %v5533_v14 = vmax.f32 %v4096_v35, 0.0  ;;  %v5683_v1 = vmax.f32 %v12927_v20, 0.0  ;;  %v12928_v37 = vld [vmem:[#allocation181_spill] sm:$0xff]  ;;  %v12937_v20 = vld [vmem:[#allocation254_spill] sm:$0xff] }
 0x31e   :  { %v6110_v16 = vmax.f32 %v12920_v22, %v5966_v27  ;;  %v5967_v2 = vmax.f32 %v5535_v0, %v5679_v52  ;;  %v5681_v59 = vmax.f32 %v12928_v37, 0.0  ;;  %v12929_v27 = vld [vmem:[#allocation250_spill] sm:$0xff] }
 0x31f   :  { %v6108_v25 = vmax.f32 %v12921_v33, %v5964_v34  ;;  %v5965_v17 = vmax.f32 %v5533_v14, %v5677_v3  ;;  %v6409_v28 = vpop.permute.xlu0 %6408  ;;  %v12931_v14 = vld [vmem:[#allocation252_spill] sm:$0xff] }
 0x320   :  { %v6111_v40 = vmax.f32 %v12922_v31, %v5967_v2  ;;  %v11973_v61 = vsel %vm6468_vm1, %v12923_v56, %v6409_v28  ;;  %v12934_v56 = vld [vmem:[#allocation185_spill] sm:$0xff] }
 0x321   :  { %v6109_v58 = vmax.f32 %v12924_v46, %v5965_v17  ;;  %v8737_v51 = vpop.f32.mrb[36].mxu0  ;;  %v5684_v23 = vmax.f32 %v12934_v56, 0.0 }
 0x322   :  { %v5538_v47 = vmax.f32 %v8737_v51, 0.0  ;;  %v4109_v62 = vpop.f32.mrb[37].mxu0  ;;  %v11983_v48 = vpack.c.bf16 %v6111_v40, %v6110_v16  ;;  %v12932_v16 = vld [vmem:[#allocation253_spill] sm:$0xff]  ;;  %v12935_v51 = vld [vmem:[#allocation187_spill] sm:$0xff] }
 0x323   :  { %v5536_v6 = vmax.f32 %v4109_v62, 0.0  ;;  %v8738_v54 = vpop.f32.mrb[38].mxu0  ;;  %v11986_v60 = vpack.c.bf16 %v6109_v58, %v6108_v25  ;;  %v12933_v25 = vld [vmem:[#allocation183_spill] sm:$0xff]  ;;  %v5687_v10 = vmax.f32 %v12935_v51, 0.0 }
 0x324   :  { %v5970_v29 = vmax.f32 %v5538_v47, %v5682_v32  ;;  %v5539_v36 = vmax.f32 %v8738_v54, 0.0  ;;  %v4112_v45 = vpop.f32.mrb[39].mxu0  ;;  %v5686_v17 = vmax.f32 %v12933_v25, 0.0 }
 0x325   :  { %v5968_v4 = vmax.f32 %v5536_v6, %v5680_v39  ;;  %v5537_v52 = vmax.f32 %v4112_v45, 0.0  ;;  %v5685_v39 = vmax.f32 %v12936_v9, 0.0 }
 0x326   :  { %v6114_v0 = vmax.f32 %v12929_v27, %v5970_v29  ;;  %v5971_v35 = vmax.f32 %v5539_v36, %v5683_v1  ;;  %v12938_v36 = vld [vmem:[#allocation255_spill] sm:$0xff] }
 0x327   :  { %v6112_v3 = vmax.f32 %v12930_v30, %v5968_v4  ;;  %v5969_v34 = vmax.f32 %v5537_v52, %v5681_v59  ;;  %v12939_v59 = vld [vmem:[#allocation256_spill] sm:$0xff]  ;;  %v12940_v52 = vld [vmem:[#allocation257_spill] sm:$0xff] }
 0x328   :  { %v6115_v22 = vmax.f32 %v12931_v14, %v5971_v35  ;;  %v12941_v35 = vld [vmem:[#allocation191_spill] sm:$0xff] }
 0x329   :  { %v6113_v2 = vmax.f32 %v12932_v16, %v5969_v34  ;;  %v8741_v33 = vpop.f32.mrb[40].mxu0  ;;  %v5690_v30 = vmax.f32 %v12941_v35, 0.0  ;;  %v12950_v35 = vld [vmem:[#allocation201_spill] sm:$0xff] }
 0x32a   :  { %v5542_v28 = vmax.f32 %v8741_v33, 0.0  ;;  %v4125_v31 = vpop.f32.mrb[41].mxu0  ;;  %v11995_v40 = vpack.c.bf16 %v6115_v22, %v6114_v0  ;;  %v12942_v22 = vld [vmem:[#allocation193_spill] sm:$0xff] }
 0x32b   :  { %v5540_v44 = vmax.f32 %v4125_v31, 0.0  ;;  %v8742_v46 = vpop.f32.mrb[42].mxu0  ;;  %v11998_v58 = vpack.c.bf16 %v6113_v2, %v6112_v3  ;;  %v5688_v16 = vmax.f32 %v12942_v22, 0.0 }
 0x32c   :  { %v5974_v32 = vmax.f32 %v5542_v28, %v5686_v17  ;;  %v5543_v47 = vmax.f32 %v8742_v46, 0.0  ;;  %v4128_v62 = vpop.f32.mrb[43].mxu0  ;;  %v12943_v17 = vld [vmem:[#allocation195_spill] sm:$0xff] }
 0x32d   :  { %v5972_v6 = vmax.f32 %v5540_v44, %v5684_v23  ;;  %v5541_v54 = vmax.f32 %v4128_v62, 0.0  ;;  %v5691_v28 = vmax.f32 %v12943_v17, 0.0  ;;  %v12944_v44 = vld [vmem:[#allocation197_spill] sm:$0xff] }
 0x32e   :  { %v6118_v1 = vmax.f32 %v12937_v20, %v5974_v32  ;;  %v5975_v29 = vmax.f32 %v5543_v47, %v5687_v10  ;;  %v5689_v46 = vmax.f32 %v12944_v44, 0.0  ;;  %v12945_v32 = vld [vmem:[#allocation258_spill] sm:$0xff] }
 0x32f   :  { %v6116_v45 = vmax.f32 %v12938_v36, %v5972_v6  ;;  %v5973_v37 = vmax.f32 %v5541_v54, %v5685_v39  ;;  %v12946_v39 = vld [vmem:[#allocation259_spill] sm:$0xff]  ;;  %v12948_v36 = vld [vmem:[#allocation261_spill] sm:$0xff]  ;;  %v12953_v44 = vld [vmem:[#allocation262_spill] sm:$0xff] }
 0x330   :  { %v6119_v4 = vmax.f32 %v12939_v59, %v5975_v29  ;;  %v12949_v59 = vld [vmem:[#allocation199_spill] sm:$0xff] }
 0x331   :  { %v6117_v27 = vmax.f32 %v12940_v52, %v5973_v37  ;;  %v8745_v0 = vpop.f32.mrb[44].mxu0 }
 0x332   :  { %v5546_v3 = vmax.f32 %v8745_v0, 0.0  ;;  %v4141_v34 = vpop.f32.mrb[45].mxu0  ;;  %v12007_v14 = vpack.c.bf16 %v6119_v4, %v6118_v1  ;;  %v12947_v1 = vld [vmem:[#allocation260_spill] sm:$0xff]  ;;  %v5694_v4 = vmax.f32 %v12949_v59, 0.0 }
 0x333   :  { %v5544_v2 = vmax.f32 %v4141_v34, 0.0  ;;  %v8746_v33 = vpop.f32.mrb[46].mxu0  ;;  %v12010_v25 = vpack.c.bf16 %v6117_v27, %v6116_v45 }
 0x334   :  { %v5978_v31 = vmax.f32 %v5546_v3, %v5690_v30  ;;  %v5547_v56 = vmax.f32 %v8746_v33, 0.0  ;;  %v4144_v23 = vpop.f32.mrb[47].mxu0  ;;  %v5692_v30 = vmax.f32 %v12950_v35, 0.0 }
 0x335   :  { %v5976_v51 = vmax.f32 %v5544_v2, %v5688_v16  ;;  %v5545_v10 = vmax.f32 %v4144_v23, 0.0  ;;  %v12951_v16 = vld [vmem:[#allocation203_spill] sm:$0xff] }
 0x336   :  { %v6122_v47 = vmax.f32 %v12945_v32, %v5978_v31  ;;  %v5979_v62 = vmax.f32 %v5547_v56, %v5691_v28  ;;  %v6431_v9 = vpop.permute.xlu0 %6430  ;;  %v12952_v28 = vld [vmem:[#allocation205_spill] sm:$0xff] }
 0x337   :  { %v6120_v6 = vmax.f32 %v12946_v39, %v5976_v51  ;;  %v5977_v54 = vmax.f32 %v5545_v10, %v5689_v46  ;;  %v12018_v20 = vsel %vm6493_vm2, %v11954_v42, %v6431_v9  ;;  %v5695_v42 = vmax.f32 %v12951_v16, 0.0  ;;  %v12954_v10 = vld [vmem:[#allocation263_spill] sm:$0xff]  ;;  %v12955_v9 = vld [vmem:[#allocation264_spill] sm:$0xff] }
 0x338   :  { %v6123_v29 = vmax.f32 %v12947_v1, %v5979_v62  ;;  %v5693_v31 = vmax.f32 %v12952_v28, 0.0 }
 0x339   :  { %v6121_v45 = vmax.f32 %v12948_v36, %v5977_v54  ;;  %v8749_v37 = vpop.f32.mrb[48].mxu0  ;;  %v12956_v54 = vld [vmem:[#allocation265_spill] sm:$0xff]  ;;  %v12957_v36 = vld [vmem:[#allocation207_spill] sm:$0xff] }
 0x33a   :  { %v5550_v52 = vmax.f32 %v8749_v37, 0.0  ;;  %v4157_v27 = vpop.f32.mrb[49].mxu0  ;;  %v12023_v0 = vpack.c.bf16 %v6123_v29, %v6122_v47 }
 0x33b   :  { %v5548_v3 = vmax.f32 %v4157_v27, 0.0  ;;  %v8750_v34 = vpop.f32.mrb[50].mxu0  ;;  %v12026_v22 = vpack.c.bf16 %v6121_v45, %v6120_v6  ;;  %v5698_v45 = vmax.f32 %v12957_v36, 0.0 }
 0x33c   :  { %v5982_v2 = vmax.f32 %v5550_v52, %v5694_v4  ;;  %v5551_v33 = vmax.f32 %v8750_v34, 0.0  ;;  %v4160_v17 = vpop.f32.mrb[51].mxu0  ;;  %v12958_v52 = vld [vmem:[#allocation209_spill] sm:$0xff]  ;;  %v12959_v34 = vld [vmem:[#allocation211_spill] sm:$0xff] }
 0x33d   :  { %v5980_v56 = vmax.f32 %v5548_v3, %v5692_v30  ;;  %v5549_v23 = vmax.f32 %v4160_v17, 0.0  ;;  %v5696_v27 = vmax.f32 %v12958_v52, 0.0  ;;  %v5699_v16 = vmax.f32 %v12959_v34, 0.0 }
 0x33e   :  { %v6126_v46 = vmax.f32 %v12953_v44, %v5982_v2  ;;  %v5983_v51 = vmax.f32 %v5551_v33, %v5695_v42  ;;  %v12960_v33 = vld [vmem:[#allocation213_spill] sm:$0xff] }
 0x33f   :  { %v6124_v32 = vmax.f32 %v12954_v10, %v5980_v56  ;;  %v5981_v47 = vmax.f32 %v5549_v23, %v5693_v31  ;;  %v6433_v62 = vpop.permute.xlu0 %6432  ;;  %v5697_v17 = vmax.f32 %v12960_v33, 0.0  ;;  %v12961_v56 = vld [vmem:[#allocation2_spill] sm:$0xff] }
 0x340   :  { %v6127_v39 = vmax.f32 %v12955_v9, %v5983_v51  ;;  %v12035_v6 = vsel %vm6493_vm2, %v11973_v61, %v6433_v62  ;;  %v12962_v51 = vld [vmem:[#allocation3_spill] sm:$0xff]  ;;  %v12964_v9 = vld [vmem:[#allocation5_spill] sm:$0xff] }
 0x341   :  { %v6125_v1 = vmax.f32 %v12956_v54, %v5981_v47  ;;  %v8753_v29 = vpop.f32.mrb[52].mxu0  ;;  %v12963_v47 = vld [vmem:[#allocation4_spill] sm:$0xff] }
 0x342   :  { %v5554_v37 = vmax.f32 %v8753_v29, 0.0  ;;  %v4173_v59 = vpop.f32.mrb[53].mxu0  ;;  %v6261_v4 = vpack.c.bf16 %v6127_v39, %v6126_v46  ;;  %v12045_v46 = vpop.permute.xlu1 %6382 }
 0x343   :  { %v5552_v35 = vmax.f32 %v4173_v59, 0.0  ;;  %v8754_v30 = vpop.f32.mrb[54].mxu0  ;;  %v6260_v3 = vpack.c.bf16 %v6125_v1, %v6124_v32  ;;  %v12965_v1 = vld [vmem:[#allocation215_spill] sm:$0xff]  ;;  %v12966_v59 = vld [vmem:[#allocation217_spill] sm:$0xff] }
 0x344   :  { %v5986_v42 = vmax.f32 %v5554_v37, %v5698_v45  ;;  %v5555_v2 = vmax.f32 %v8754_v30, 0.0  ;;  %6334 = vrot.lane.b32.xlu1 %v6261_v4, %s9422_s0  ;;  %v4176_v61 = vpop.f32.mrb[55].mxu0  ;;  %v5702_v29 = vmax.f32 %v12965_v1, 0.0  ;;  %v5700_v4 = vmax.f32 %v12966_v59, 0.0  ;;  %v12967_v30 = vld [vmem:[#allocation219_spill] sm:$0xff] }
 0x345   :  { %v5984_v28 = vmax.f32 %v5552_v35, %v5696_v27  ;;  %v5553_v31 = vmax.f32 %v4176_v61, 0.0  ;;  %6332 = vrot.lane.b32.xlu0 %v6260_v3, %s9422_s0  ;;  %v5703_v3 = vmax.f32 %v12967_v30, 0.0 }
 0x346   :  { %v6130_v23 = vmax.f32 %v12961_v56, %v5986_v42  ;;  %v5987_v44 = vmax.f32 %v5555_v2, %v5699_v16  ;;  %v12968_v2 = vld [vmem:[#allocation221_spill] sm:$0xff]  ;;  %v12057_v61 = vpop.permute.xlu1 %6380 }
 0x347   :  { %v6128_v10 = vmax.f32 %v12962_v51, %v5984_v28  ;;  %v5985_v32 = vmax.f32 %v5553_v31, %v5697_v17  ;;  %v12969_v28 = vld [vmem:[#allocation6_spill] sm:$0xff] }
 0x348   :  { %v6131_v62 = vmax.f32 %v12963_v47, %v5987_v44  ;;  %v12972_v47 = vld [vmem:[#allocation10_spill] sm:$0xff] }
 0x349   :  { %v6129_v39 = vmax.f32 %v12964_v9, %v5985_v32  ;;  %6410 = vrot.lane.b32.xlu0 %v11746_v55, %s9422_s0  ;;  %v8757_v54 = vpop.f32.mrb[56].mxu0  ;;  %v5701_v55 = vmax.f32 %v12968_v2, 0.0 }
 0x34a   :  { %v5558_v36 = vmax.f32 %v8757_v54, 0.0  ;;  %v4189_v45 = vpop.f32.mrb[57].mxu0  ;;  %v6263_v37 = vpack.c.bf16 %v6131_v62, %v6130_v23  ;;  %v12970_v23 = vld [vmem:[#allocation7_spill] sm:$0xff] }
 0x34b   :  { %v5556_v52 = vmax.f32 %v4189_v45, 0.0  ;;  %v8758_v27 = vpop.f32.mrb[58].mxu0  ;;  %v6262_v35 = vpack.c.bf16 %v6129_v39, %v6128_v10  ;;  %v12971_v10 = vld [vmem:[#allocation8_spill] sm:$0xff]  ;;  %v12973_v39 = vld [vmem:[#allocation223_spill] sm:$0xff] }
 0x34c   :  { %v5990_v34 = vmax.f32 %v5558_v36, %v5702_v29  ;;  %v5559_v16 = vmax.f32 %v8758_v27, 0.0  ;;  %6338 = vrot.lane.b32.xlu1 %v6263_v37, %s9422_s0  ;;  %v4192_v42 = vpop.f32.mrb[59].mxu0  ;;  %v5706_v54 = vmax.f32 %v12973_v39, 0.0  ;;  %v12974_v36 = vld [vmem:[#allocation225_spill] sm:$0xff]  ;;  %v12072_v37 = vpop.permute.xlu1 %6384  ;;  %v12975_v27 = vld [vmem:[#allocation227_spill] sm:$0xff] }
 0x34d   :  { %v5988_v33 = vmax.f32 %v5556_v52, %v5700_v4  ;;  %v5557_v17 = vmax.f32 %v4192_v42, 0.0  ;;  %6434 = vrot.lane.b32.xlu0 %v11833_v13, %s9423_s21  ;;  %v5704_v45 = vmax.f32 %v12974_v36, 0.0 }
 0x34e   :  { %v6134_v31 = vmax.f32 %v12969_v28, %v5990_v34  ;;  %v5991_v56 = vmax.f32 %v5559_v16, %v5703_v3  ;;  %v12976_v34 = vld [vmem:[#allocation229_spill] sm:$0xff] }
 0x34f   :  { %v6132_v44 = vmax.f32 %v12970_v23, %v5988_v33  ;;  %v5989_v51 = vmax.f32 %v5557_v17, %v5701_v55  ;;  %v5705_v16 = vmax.f32 %v12976_v34, 0.0  ;;  %v12977_v55 = vld [vmem:[#allocation9_spill] sm:$0xff] }
 0x350   :  { %v6135_v32 = vmax.f32 %v12971_v10, %v5991_v56  ;;  %6336 = vrot.lane.b32.xlu1 %v6262_v35, %s9422_s0  ;;  %v5707_v35 = vmax.f32 %v12975_v27, 0.0  ;;  %v12978_v56 = vld [vmem:[#allocation11_spill] sm:$0xff]  ;;  %v12979_v10 = vld [vmem:[#allocation12_spill] sm:$0xff] }
 0x351   :  { %v6133_v62 = vmax.f32 %v12972_v47, %v5989_v51  ;;  %6458 = vrot.lane.b32.xlu0 %v11884_v53, %s9421_s19  ;;  %v8761_v9 = vpop.f32.mrb[60].mxu0  ;;  %v12980_v47 = vld [vmem:[#allocation40_spill] sm:$0xff] }
 0x352   :  { %v5562_v1 = vmax.f32 %v8761_v9, 0.0  ;;  %v4205_v13 = vpop.f32.mrb[61].mxu0  ;;  %v12069_v29 = vpack.c.bf16 %v6135_v32, %v6134_v31  ;;  %v6429_v31 = vpop.permute.xlu1 %6428  ;;  %v12981_v9 = vld [vmem:[#allocation13_spill] sm:$0xff] }
 0x353   :  { %v5560_v59 = vmax.f32 %v4205_v13, 0.0  ;;  %v8762_v4 = vpop.f32.mrb[62].mxu0  ;;  %v12074_v52 = vpack.c.bf16 %v6133_v62, %v6132_v44  ;;  %v6537_v62 = vsel %vm6468_vm1, %v12980_v47, %v11961_v19  ;;  %v12988_v47 = vld [vmem:[#allocation16_spill] sm:$0xff] }
 0x354   :  { %v5994_v30 = vmax.f32 %v5562_v1, %v5706_v54  ;;  %v5563_v3 = vmax.f32 %v8762_v4, 0.0  ;;  %v4208_v53 = vpop.f32.mrb[63].mxu0  ;;  %v12982_v54 = vld [vmem:[#allocation231_spill] sm:$0xff]  ;;  %v6560_v13 = vsel %vm6493_vm2, %v6537_v62, %v6429_v31  ;;  %v12983_v4 = vld [vmem:[#allocation233_spill] sm:$0xff] }
 0x355   :  { %v5992_v42 = vmax.f32 %v5560_v59, %v5704_v45  ;;  %v5561_v2 = vmax.f32 %v4208_v53, 0.0  ;;  %6412 = vrot.lane.b32.xlu0 %v11772_v49, %s9422_s0  ;;  %v5710_v1 = vmax.f32 %v12982_v54, 0.0  ;;  %v5708_v27 = vmax.f32 %v12983_v4, 0.0  ;;  %v12984_v53 = vld [vmem:[#allocation235_spill] sm:$0xff] }
 0x356   :  { %v6138_v33 = vmax.f32 %v12977_v55, %v5994_v30  ;;  %v5995_v17 = vmax.f32 %v5563_v3, %v5707_v35  ;;  %v6455_v28 = vpop.permute.xlu0 %6454  ;;  %v5711_v34 = vmax.f32 %v12984_v53, 0.0  ;;  %v12991_v54 = vld [vmem:[#allocation239_spill] sm:$0xff] }
 0x357   :  { %v6136_v23 = vmax.f32 %v12978_v56, %v5992_v42  ;;  %v5993_v44 = vmax.f32 %v5561_v2, %v5705_v16  ;;  %v12084_v51 = vsel %vm6510_vm3, %v12018_v20, %v6455_v28  ;;  %v12985_v2 = vld [vmem:[#allocation237_spill] sm:$0xff] }
 0x358   :  { %v6139_v32 = vmax.f32 %v12979_v10, %v5995_v17  ;;  %v5709_v55 = vmax.f32 %v12985_v2, 0.0 }
 0x359   :  { %v6137_v49 = vmax.f32 %v12981_v9, %v5993_v44  ;;  %6436 = vrot.lane.b32.xlu0 %v11847_v5, %s9423_s21  ;;  %v8765_v39 = vpop.f32.mrb[64].mxu0  ;;  %v12987_v44 = vld [vmem:[#allocation15_spill] sm:$0xff]  ;;  %v12989_v9 = vld [vmem:[#allocation18_spill] sm:$0xff] }
 0x35a   :  { %v5566_v36 = vmax.f32 %v8765_v39, 0.0  ;;  %v6453_v45 = vpop.permute.xlu0 %6452  ;;  %v4221_v20 = vpop.f32.mrb[65].mxu0  ;;  %v12095_v59 = vpack.c.bf16 %v6139_v32, %v6138_v33  ;;  %v12986_v33 = vld [vmem:[#allocation14_spill] sm:$0xff]  ;;  %v12990_v39 = vld [vmem:[#allocation55_spill] sm:$0xff] }
 0x35b   :  { %v5564_v35 = vmax.f32 %v4221_v20, 0.0  ;;  %v8766_v30 = vpop.f32.mrb[66].mxu0  ;;  %v6576_v19 = vsel %vm6510_vm3, %v6560_v13, %v6453_v45  ;;  %v6266_v3 = vpack.c.bf16 %v6137_v49, %v6136_v23  ;;  %v12107_v23 = vld [vmem:[%s12368_s2 + $0x88] sm:$0xff]   ;;  %v12992_v20 = vld [vmem:[#allocation241_spill] sm:$0xff] }
 0x35c   :  { %v5998_v5 = vmax.f32 %v5566_v36, %v5710_v1  ;;  %v5567_v16 = vmax.f32 %v8766_v30, 0.0  ;;  %v4224_v42 = vpop.f32.mrb[67].mxu0  ;;  %6804 = vmatprep.mubr.bf16.mxu1 %v6576_v19  ;;  %9019 = vmatprep.subr.bf16.mxu1 %v12107_v23  ;;  %v5714_v1 = vmax.f32 %v12991_v54, 0.0  ;;  %v5712_v4 = vmax.f32 %v12992_v20, 0.0  ;;  %v12993_v19 = vld [vmem:[#allocation243_spill] sm:$0xff] }
 0x35d   :  { %v5996_v17 = vmax.f32 %v5564_v35, %v5708_v27  ;;  %v5565_v28 = vmax.f32 %v4224_v42, 0.0  ;;  %6460 = vrot.lane.b32.xlu0 %v11898_v63, %s9421_s19  ;;  %v5715_v53 = vmax.f32 %v12993_v19, 0.0  ;;  %v12994_v42 = vld [vmem:[#allocation245_spill] sm:$0xff]  ;;  %v13002_v54 = vld [vmem:[#allocation31_spill] sm:$0xff] }
 0x35e   :  { %v6142_v31 = vmax.f32 %v12986_v33, %v5998_v5  ;;  %v5999_v56 = vmax.f32 %v5567_v16, %v5711_v34  ;;  %v5713_v2 = vmax.f32 %v12994_v42, 0.0 }
 0x35f   :  { %v6140_v10 = vmax.f32 %v12987_v44, %v5996_v17  ;;  %v5997_v32 = vmax.f32 %v5565_v28, %v5709_v55  ;;  %v12995_v28 = vld [vmem:[#allocation19_spill] sm:$0xff] }
 0x360   :  { %v6143_v62 = vmax.f32 %v12988_v47, %v5999_v56  ;;  %v12996_v56 = vld [vmem:[#allocation21_spill] sm:$0xff] }
 0x361   :  { %v6141_v49 = vmax.f32 %v12989_v9, %v5997_v32  ;;  %6414 = vrot.lane.b32.xlu0 %v12990_v39, %s9422_s0  ;;  %v8769_v63 = vpop.f32.mrb[68].mxu0  ;;  %v12997_v32 = vld [vmem:[#allocation23_spill] sm:$0xff] }
 0x362   :  { %v5570_v13 = vmax.f32 %v8769_v63, 0.0  ;;  %v4237_v36 = vpop.f32.mrb[69].mxu0  ;;  %v6269_v45 = vpack.c.bf16 %v6143_v62, %v6142_v31  ;;  %v12998_v62 = vld [vmem:[#allocation26_spill] sm:$0xff]  ;;  %v12999_v63 = vld [vmem:[#allocation33_spill] sm:$0xff] }
 0x363   :  { %v5568_v27 = vmax.f32 %v4237_v36, 0.0  ;;  %v8770_v35 = vpop.f32.mrb[70].mxu0  ;;  %v6268_v30 = vpack.c.bf16 %v6141_v49, %v6140_v10 }
 0x364   :  { %v6002_v34 = vmax.f32 %v5570_v13, %v5714_v1  ;;  %v5571_v5 = vmax.f32 %v8770_v35, 0.0  ;;  %6358 = vrot.lane.b32.xlu1 %v6269_v45, %s9423_s21  ;;  %v4240_v16 = vpop.f32.mrb[71].mxu0  ;;  %v13006_v1 = vld [vmem:[#allocation34_spill] sm:$0xff]  ;;  %v6457_v13 = vpop.permute.xlu0 %6456 }
 0x365   :  { %v6000_v55 = vmax.f32 %v5568_v27, %v5712_v4  ;;  %v5569_v17 = vmax.f32 %v4240_v16, 0.0  ;;  %6438 = vrot.lane.b32.xlu0 %v11844_v8, %s9423_s21  ;;  %v13000_v8 = vld [vmem:[#allocation57_spill] sm:$0xff] }
 0x366   :  { %v6146_v33 = vmax.f32 %v12995_v28, %v6002_v34  ;;  %v6003_v31 = vmax.f32 %v5571_v5, %v5715_v53 }
 0x367   :  { %v6144_v44 = vmax.f32 %v12996_v56, %v6000_v55  ;;  %v6001_v10 = vmax.f32 %v5569_v17, %v5713_v2  ;;  %v9406_v2 = vld [vmem:[%s12368_s2 + $0x90] sm:$0xff]  }
 0x368   :  { %v6147_v47 = vmax.f32 %v12997_v32, %v6003_v31  ;;  %6356 = vrot.lane.b32.xlu1 %v6268_v30, %s9423_s21 }
 0x369   :  { %v6145_v9 = vmax.f32 %v12998_v62, %v6001_v10  ;;  %6462 = vrot.lane.b32.xlu0 %v11895_v57, %s9421_s19  ;;  %v13001_v57 = vld [vmem:[#allocation58_spill] sm:$0xff] }
 0x36a   :  { %v6271_v49 = vpack.c.bf16 %v6147_v47, %v6146_v33 }
 0x36b   :  { %v6270_v39 = vpack.c.bf16 %v6145_v9, %v6144_v44 }
 0x36c   :  { %6386 = vrot.lane.b32.xlu1 %v12999_v63, %s9421_s19 }
 0x36d   :  { %6416 = vrot.lane.b32.xlu0 %v13000_v8, %s9422_s0 }
 0x370   :  { %6340 = vrot.lane.b32.xlu1 %v12074_v52, %s9422_s0  ;;  %v13003_v52 = vld [vmem:[#allocation36_spill] sm:$0xff] }
 0x371   :  { %6440 = vrot.lane.b32.xlu0 %v11859_v21, %s9423_s21  ;;  %v13004_v21 = vld [vmem:[#allocation30_spill] sm:$0xff] }
 0x374   :  { %6362 = vrot.lane.b32.xlu1 %v6271_v49, %s9423_s21 }
 0x375   :  { %6464 = vrot.lane.b32.xlu0 %v11910_v38, %s9421_s19  ;;  %v13005_v38 = vld [vmem:[#allocation35_spill] sm:$0xff] }
 0x378   :  { %6360 = vrot.lane.b32.xlu1 %v6270_v39, %s9423_s21 }
 0x379   :  { %6418 = vrot.lane.b32.xlu0 %v13001_v57, %s9422_s0  ;;  %v13011_v57 = vld [vmem:[#allocation45_spill] sm:$0xff] }
 0x37c   :  { %6364 = vrot.lane.b32.xlu1 %v13002_v54, %s9423_s21 }
 0x37d   :  { %6442 = vrot.lane.b32.xlu0 %v11856_v26, %s9423_s21  ;;  %v13007_v26 = vld [vmem:[#allocation38_spill] sm:$0xff] }
 0x380   :  { %6388 = vrot.lane.b32.xlu1 %v13003_v52, %s9421_s19 }
 0x381   :  { %6466 = vrot.lane.b32.xlu0 %v11907_v24, %s9421_s19  ;;  %v13008_v24 = vld [vmem:[#allocation32_spill] sm:$0xff] }
 0x384   :  { %6342 = vrot.lane.b32.xlu1 %v12069_v29, %s9422_s0  ;;  %v13009_v29 = vld [vmem:[#allocation37_spill] sm:$0xff] }
 0x388   :  { %6366 = vrot.lane.b32.xlu1 %v13004_v21, %s9423_s21 }
 0x38c   :  { %6390 = vrot.lane.b32.xlu1 %v13005_v38, %s9421_s19 }
 0x390   :  { %6344 = vrot.lane.b32.xlu1 %v6266_v3, %s9422_s0 }
 0x394   :  { %6368 = vrot.lane.b32.xlu1 %v13006_v1, %s9423_s21 }
 0x398   :  { %6392 = vrot.lane.b32.xlu1 %v13007_v26, %s9421_s19 }
 0x39c   :  { %6346 = vrot.lane.b32.xlu1 %v12095_v59, %s9422_s0 }
 0x3a0   :  { %6370 = vrot.lane.b32.xlu1 %v13008_v24, %s9423_s21  ;;  %v13012_v24 = vld [vmem:[#allocation44_spill] sm:$0xff] }
 0x3a4   :  { %6394 = vrot.lane.b32.xlu1 %v13009_v29, %s9421_s19 }
 0x3b6   :  { %v6335_v4 = vpop.permute.xlu1 %6334 }
 0x3b7   :  { %v6333_v36 = vpop.permute.xlu0 %6332 }
 0x3b8   :  { %v6471_v59 = vsel %vm6468_vm1, %v11986_v60, %v6333_v36  ;;  %v6474_v60 = vsel %vm6468_vm1, %v11983_v48, %v6335_v4  ;;  %v13010_v48 = vld [vmem:[#allocation42_spill] sm:$0xff] }
 0x3bb   :  { %v6411_v45 = vpop.permute.xlu0 %6410 }
 0x3bc   :  { %v6546_v32 = vsel %vm6468_vm1, %v13010_v48, %v6411_v45 }
 0x3be   :  { %v6339_v35 = vpop.permute.xlu1 %6338 }
 0x3bf   :  { %v6435_v20 = vpop.permute.xlu0 %6434 }
 0x3c0   :  { %v6566_v62 = vsel %vm6493_vm2, %v6546_v32, %v6435_v20 }
 0x3c2   :  { %v6337_v19 = vpop.permute.xlu1 %6336 }
 0x3c3   :  { %v6459_v3 = vpop.permute.xlu0 %6458 }
 0x3c7   :  { %v6413_v27 = vpop.permute.xlu0 %6412 }
 0x3c8   :  { %v6549_v54 = vsel %vm6468_vm1, %v13011_v57, %v6413_v27 }
 0x3cb   :  { %v6437_v30 = vpop.permute.xlu0 %6436 }
 0x3cc   :  { %v6568_v52 = vsel %vm6493_vm2, %v6549_v54, %v6437_v30 }
 0x3cf   :  { %v6461_v53 = vpop.permute.xlu0 %6460 }
 0x3d3   :  { %v6415_v5 = vpop.permute.xlu0 %6414 }
 0x3d4   :  { %v6552_v29 = vsel %vm6468_vm1, %v13012_v24, %v6415_v5 }
 0x3d6   :  { %v6359_v34 = vpop.permute.xlu1 %6358 }
 0x3d7   :  { %v6439_v28 = vpop.permute.xlu0 %6438  ;;  %v6497_v33 = vsel %vm6493_vm2, %v6474_v60, %v6359_v34 }
 0x3d8   :  { %v6515_v56 = vsel %vm6510_vm3, %v6497_v33, %v12045_v46  ;;  %v6570_v36 = vsel %vm6493_vm2, %v6552_v29, %v6439_v28 }
 0x3da   :  { %v6357_v16 = vpop.permute.xlu1 %6356 }
 0x3db   :  { %v6495_v42 = vsel %vm6493_vm2, %v6471_v59, %v6357_v16 }
 0x3dc   :  { %v6512_v55 = vsel %vm6510_vm3, %v6495_v42, %v12057_v61  ;;  %v6582_v61 = vsel %vm6510_vm3, %v12035_v6, %v6457_v13  ;;  %v6585_v6 = vsel %vm6510_vm3, %v6566_v62, %v6459_v3 }
 0x3dd   :  { %6805 = vmatmul.mubr.bf16.vlgmr.msra.gmra.mrb[248].mxu1 %v6512_v55 }
 0x3de   :  { %6812 = vmatprep.mubr.bf16.mxu1 %v12084_v51  ;;  %v6387_v17 = vpop.permute.xlu1 %6386  ;;  %9020 = vmatpush3.bf16.msra.mxu1 %v12107_v23  ;;  %v6463_v51 = vpop.permute.xlu0 %6462  ;;  %v6477_v23 = vsel %vm6468_vm1, %v11998_v58, %v6337_v19  ;;  %v6480_v58 = vsel %vm6468_vm1, %v11995_v40, %v6339_v35  ;;  %v13013_v35 = vld [vmem:[#allocation49_spill] sm:$0xff] }
 0x3df   :  { %9021 = vmatprep.subr.bf16.mxu1 %v9406_v2  ;;  %v6591_v20 = vsel %vm6510_vm3, %v6570_v36, %v6463_v51 }
 0x3e2   :  { %v6341_v31 = vpop.permute.xlu1 %6340  ;;  %9022 = vmatpush3.bf16.msra.mxu1 %v9406_v2  ;;  %v6417_v9 = vpop.permute.xlu0 %6416 }
 0x3e3   :  { %v6483_v40 = vsel %vm6468_vm1, %v12010_v25, %v6341_v31  ;;  %v6555_v30 = vsel %vm6468_vm1, %v13013_v35, %v6417_v9 }
 0x3e5   :  { %6813 = vmatmul.mubr.bf16.gmra.mrb[252].mxu1 %v6515_v56 }
 0x3e6   :  { %6820 = vmatprep.mubr.bf16.mxu1 %v6582_v61  ;;  %v6363_v44 = vpop.permute.xlu1 %6362  ;;  %v6441_v63 = vpop.permute.xlu0 %6440 }
 0x3e7   :  { %v6501_v39 = vsel %vm6493_vm2, %v6480_v58, %v6363_v44 }
 0x3e8   :  { %v6521_v21 = vsel %vm6510_vm3, %v6501_v39, %v6387_v17  ;;  %v13014_v17 = vld [vmem:[#allocation50_spill] sm:$0xff] }
 0x3ea   :  { %v6361_v10 = vpop.permute.xlu1 %6360  ;;  %v6465_v1 = vpop.permute.xlu0 %6464 }
 0x3eb   :  { %v6499_v47 = vsel %vm6493_vm2, %v6477_v23, %v6361_v10 }
 0x3ec   :  { %v6518_v46 = vsel %vm6510_vm3, %v6499_v47, %v12072_v37  ;;  %v6588_v37 = vsel %vm6510_vm3, %v6568_v52, %v6461_v53  ;;  %v6572_v53 = vsel %vm6493_vm2, %v6555_v30, %v6441_v63 }
 0x3ed   :  { %6821 = vmatmul.mubr.bf16.gmra.mrb[0].mxu1 %v6518_v46  ;;  %v6594_v5 = vsel %vm6510_vm3, %v6572_v53, %v6465_v1 }
 0x3ee   :  { %6828 = vmatprep.mubr.bf16.mxu1 %v6585_v6  ;;  %v6365_v49 = vpop.permute.xlu1 %6364  ;;  %v6419_v3 = vpop.permute.xlu0 %6418 }
 0x3ef   :  { %v6503_v13 = vsel %vm6493_vm2, %v6483_v40, %v6365_v49  ;;  %v6558_v60 = vsel %vm6468_vm1, %v13014_v17, %v6419_v3 }
 0x3f2   :  { %v6389_v8 = vpop.permute.xlu1 %6388  ;;  %v6443_v34 = vpop.permute.xlu0 %6442 }
 0x3f3   :  { %v6524_v45 = vsel %vm6510_vm3, %v6503_v13, %v6389_v8  ;;  %v6574_v33 = vsel %vm6493_vm2, %v6558_v60, %v6443_v34 }
 0x3f5   :  { %6829 = vmatmul.mubr.bf16.gmra.mrb[4].mxu1 %v6521_v21 }
 0x3f6   :  { %6836 = vmatprep.mubr.bf16.mxu1 %v6588_v37  ;;  %v6343_v38 = vpop.permute.xlu1 %6342 }
 0x3f7   :  { %v6486_v27 = vsel %vm6468_vm1, %v12007_v14, %v6343_v38  ;;  %v6467_v14 = vpop.permute.xlu0 %6466 }
 0x3f8   :  { %v6597_v31 = vsel %vm6510_vm3, %v6574_v33, %v6467_v14 }
 0x3fa   :  { %v6367_v26 = vpop.permute.xlu1 %6366 }
 0x3fb   :  { %v6505_v19 = vsel %vm6493_vm2, %v6486_v27, %v6367_v26 }
 0x3fd   :  { %6837 = vmatmul.mubr.bf16.gmra.mrb[8].mxu1 %v6524_v45 }
 0x3fe   :  { %6844 = vmatprep.mubr.bf16.mxu1 %v6591_v20  ;;  %v6391_v4 = vpop.permute.xlu1 %6390 }
 0x3ff   :  { %v6527_v59 = vsel %vm6510_vm3, %v6505_v19, %v6391_v4 }
 0x402   :  { %v6345_v25 = vpop.permute.xlu1 %6344 }
 0x403   :  { %v6489_v42 = vsel %vm6468_vm1, %v12026_v22, %v6345_v25 }
 0x405   :  { %6845 = vmatmul.mubr.bf16.gmra.mrb[12].mxu1 %v6527_v59 }
 0x406   :  { %6852 = vmatprep.mubr.bf16.mxu1 %v6594_v5  ;;  %v6369_v16 = vpop.permute.xlu1 %6368 }
 0x407   :  { %v6507_v2 = vsel %vm6493_vm2, %v6489_v42, %v6369_v16 }
 0x40a   :  { %v6393_v55 = vpop.permute.xlu1 %6392 }
 0x40b   :  { %v6530_v28 = vsel %vm6510_vm3, %v6507_v2, %v6393_v55 }
 0x40d   :  { %6853 = vmatmul.mubr.bf16.gmra.mrb[16].mxu1 %v6530_v28 }
 0x40e   :  { %6860 = vmatprep.mubr.bf16.mxu1 %v6597_v31  ;;  %v6347_v56 = vpop.permute.xlu1 %6346 }
 0x40f   :  { %v6492_v22 = vsel %vm6468_vm1, %v12023_v0, %v6347_v56 }
 0x412   :  { %v6371_v61 = vpop.permute.xlu1 %6370 }
 0x413   :  { %v6509_v51 = vsel %vm6493_vm2, %v6492_v22, %v6371_v61 }
 0x416   :  { %v6395_v44 = vpop.permute.xlu1 %6394 }
 0x417   :  { %v6533_v23 = vsel %vm6510_vm3, %v6509_v51, %v6395_v44 }
 0x418   :  { %6861 = vmatmul.mubr.bf16.gmra.mrb[20].mxu1 %v6533_v23 }
 0x419   :  { %9023 = vmatprep.mubr.msk.bf16.mxu1 %vm6468_vm1, %v11922_v15  ;;  %v9424_v15 = vmov 0.0  }
 0x41a   :  { %9039 = vmatprep.subr.bf16.mxu1 %v9424_v15 }
 0x420   :  { %9024 = vmatmul.mubr.msk.bf16.vlgmr.msra.gmra.mrb[24].mxu1 %vm6468_vm1, %v11919_v43  ;;  %v9407_v43 = vld [vmem:[%s12368_s2 + $0x98] sm:$0xff]  }
 0x421   :  { %9027 = vmatprep.mubr.msk.bf16.mxu1 %vm6468_vm1, %v11934_v11  ;;  %9040 = vmatpush3.bf16.msra.mxu1 %v9407_v43  ;;  %v9409_v11 = vld [vmem:[%s12368_s2 + $0xa8] sm:$0xff]  }
 0x422   :  { %9041 = vmatprep.subr.bf16.mxu1 %v9424_v15 }
 0x428   :  { %9028 = vmatmul.mubr.msk.bf16.gmra.mrb[28].mxu1 %vm6468_vm1, %v11931_v41  ;;  %v9408_v41 = vld [vmem:[%s12368_s2 + $0xa0] sm:$0xff]  }
 0x429   :  { %9031 = vmatprep.mubr.msk.bf16.mxu1 %vm6468_vm1, %v11946_v18  ;;  %9042 = vmatpush3.bf16.msra.mxu1 %v9408_v41 }
 0x42a   :  { %9043 = vmatprep.subr.bf16.mxu1 %v9424_v15 }
 0x42d   :  { %9044 = vmatpush3.bf16.msra.mxu1 %v9409_v11 }
 0x42e   :  { %9045 = vmatprep.subr.bf16.mxu1 %v9424_v15 }
 0x430   :  { %9032 = vmatmul.mubr.msk.bf16.gmra.mrb[32].mxu1 %vm6468_vm1, %v11943_v7 }
 0x431   :  { %9035 = vmatprep.mubr.msk.bf16.mxu1 %vm6468_vm1, %v11964_v50 }
 0x438   :  { %9036 = vmatmul.mubr.msk.bf16.gmra.mrb[36].mxu1 %vm6468_vm1, %v11959_v12  ;;  %v12262_v12 = vld [vmem:[%s12370_s3] ss:$0 sm:$0xff] }
 0x439   :  { %9047 = vmatprep.mubr.msk.bf16.mxu1 %vm9425_vm4, %v9424_v15 }
 0x4b0   :  { %v8363_v7 = vpop.f32.mrb[248].mxu1 }
 0x4b1   :  { %v8364_v18 = vpop.f32.mrb[249].mxu1 }
 0x4b2   :  { %v8365_v50 = vadd.f32 %v8364_v18, %v8363_v7  ;;  %v8366_v0 = vpop.f32.mrb[250].mxu1 }
 0x4b3   :  { %v8367_v10 = vpop.f32.mrb[251].mxu1 }
 0x4b4   :  { %v8368_v48 = vadd.f32 %v8367_v10, %v8366_v0  ;;  %v6807_v32 = vadd.f32 %v8365_v50, %v12262_v12 }
 0x4b6   :  { %v6810_v43 = vadd.f32 %v8368_v48, %v12262_v12 }
 0x4b8   :  { %v8369_v47 = vpop.f32.mrb[252].mxu1 }
 0x4b9   :  { %v8370_v62 = vpop.f32.mrb[253].mxu1 }
 0x4ba   :  { %v8371_v9 = vadd.f32 %v8370_v62, %v8369_v47  ;;  %v8372_v46 = vpop.f32.mrb[254].mxu1 }
 0x4bb   :  { %v8373_v6 = vpop.f32.mrb[255].mxu1 }
 0x4bc   :  { %v8374_v49 = vadd.f32 %v8373_v6, %v8372_v46  ;;  %v6815_v31 = vadd.f32 %v8371_v9, %v12262_v12 }
 0x4be   :  { %v6818_v51 = vadd.f32 %v8374_v49, %v12262_v12 }
 0x4c0   :  { %v8375_v58 = vpop.f32.mrb[0].mxu1 }
 0x4c1   :  { %v8376_v39 = vpop.f32.mrb[1].mxu1 }
 0x4c2   :  { %v8377_v63 = vadd.f32 %v8376_v39, %v8375_v58  ;;  %v8378_v8 = vpop.f32.mrb[2].mxu1 }
 0x4c3   :  { %v8379_v57 = vpop.f32.mrb[3].mxu1 }
 0x4c4   :  { %v8380_v54 = vadd.f32 %v8379_v57, %v8378_v8  ;;  %v6823_v52 = vadd.f32 %v8377_v63, %v12262_v12 }
 0x4c6   :  { %v6826_v46 = vadd.f32 %v8380_v54, %v12262_v12 }
 0x4c8   :  { %v8381_v21 = vpop.f32.mrb[4].mxu1 }
 0x4c9   :  { %v8382_v37 = vpop.f32.mrb[5].mxu1 }
 0x4ca   :  { %v8383_v38 = vadd.f32 %v8382_v37, %v8381_v21  ;;  %v8384_v1 = vpop.f32.mrb[6].mxu1 }
 0x4cb   :  { %v8385_v40 = vpop.f32.mrb[7].mxu1 }
 0x4cc   :  { %v8386_v26 = vadd.f32 %v8385_v40, %v8384_v1  ;;  %v6831_v18 = vadd.f32 %v8383_v38, %v12262_v12 }
 0x4ce   :  { %v6834_v47 = vadd.f32 %v8386_v26, %v12262_v12 }
 0x4d0   :  { %v8387_v24 = vpop.f32.mrb[8].mxu1 }
 0x4d1   :  { %v8388_v29 = vpop.f32.mrb[9].mxu1 }
 0x4d2   :  { %v8389_v13 = vadd.f32 %v8388_v29, %v8387_v24  ;;  %v8390_v36 = vpop.f32.mrb[10].mxu1 }
 0x4d3   :  { %v8391_v45 = vpop.f32.mrb[11].mxu1 }
 0x4d4   :  { %v8392_v20 = vadd.f32 %v8391_v45, %v8390_v36  ;;  %v6839_v3 = vadd.f32 %v8389_v13, %v12262_v12 }
 0x4d8   :  { %v8393_v4 = vpop.f32.mrb[12].mxu1 }
 0x4d9   :  { %v8394_v27 = vpop.f32.mrb[13].mxu1 }
 0x4da   :  { %v8395_v25 = vadd.f32 %v8394_v27, %v8393_v4  ;;  %v8396_v35 = vpop.f32.mrb[14].mxu1  ;;  %v6842_v4 = vadd.f32 %v8392_v20, %v12262_v12 }
 0x4db   :  { %v8397_v30 = vpop.f32.mrb[15].mxu1 }
 0x4dc   :  { %v8398_v19 = vadd.f32 %v8397_v30, %v8396_v35  ;;  %v6847_v26 = vadd.f32 %v8395_v25, %v12262_v12  ;;  %v9410_v30 = vld [vmem:[%s12368_s2 + $0xb0] sm:$0xff]  }
 0x4dd   :  { %9046 = vmatpush3.bf16.msra.mxu1 %v9410_v30 }
 0x4de   :  { %v6850_v13 = vadd.f32 %v8398_v19, %v12262_v12  ;;  %9051 = vmatprep.subr.bf16.mxu1 %v9424_v15 }
 0x4e0   :  { %v8399_v53 = vpop.f32.mrb[16].mxu1 }
 0x4e1   :  { %v8400_v34 = vpop.f32.mrb[17].mxu1 }
 0x4e2   :  { %v8401_v59 = vadd.f32 %v8400_v34, %v8399_v53  ;;  %v8402_v5 = vpop.f32.mrb[18].mxu1 }
 0x4e3   :  { %v8403_v16 = vpop.f32.mrb[19].mxu1 }
 0x4e4   :  { %v12267_v42 = vadd.f32 %v8403_v16, %v8402_v5  ;;  %v6855_v14 = vadd.f32 %v8401_v59, %v12262_v12 }
 0x4e6   :  { %v6858_v20 = vadd.f32 %v12267_v42, %v12262_v12 }
 0x4eb   :  { %v8405_v2 = vpop.f32.mrb[20].mxu1 }
 0x4ec   :  { %v8406_v55 = vpop.f32.mrb[21].mxu1 }
 0x4ed   :  { %v8407_v17 = vadd.f32 %v8406_v55, %v8405_v2  ;;  %v8408_v60 = vpop.f32.mrb[22].mxu1 }
 0x4ee   :  { %v8409_v28 = vpop.f32.mrb[23].mxu1 }
 0x4ef   :  { %v8410_v33 = vadd.f32 %v8409_v28, %v8408_v60  ;;  %v6863_v25 = vadd.f32 %v8407_v17, %v12262_v12 }
 0x4f3   :  { %v9025_v56 = vpop.f32.mrb[24].mxu1 }
 0x4f4   :  { %v6912_v61 = vadd.f32 %v9025_v56, %v6815_v31  ;;  %v6903_v22 = vpop.f32.mrb[25].mxu1 }
 0x4f5   :  { %v6904_v44 = vadd.f32 %v6903_v22, %v6807_v32  ;;  %v9026_v23 = vpop.f32.mrb[26].mxu1 }
 0x4f6   :  { %v6915_v41 = vadd.f32 %v9026_v23, %v6818_v51  ;;  %v6906_v11 = vpop.f32.mrb[27].mxu1  ;;  %v6968_v6 = vmax.f32 %v6912_v61, 0.0 }
 0x4f7   :  { %v6907_v7 = vadd.f32 %v6906_v11, %v6810_v43  ;;  %v6966_v39 = vmax.f32 %v6904_v44, 0.0 }
 0x4f8   :  { %v6969_v8 = vmax.f32 %v6915_v41, 0.0 }
 0x4f9   :  { %v6967_v37 = vmax.f32 %v6907_v7, 0.0 }
 0x4fb   :  { %v9029_v50 = vpop.f32.mrb[28].mxu1 }
 0x4fc   :  { %v6928_v0 = vadd.f32 %v9029_v50, %v6831_v18  ;;  %v6919_v10 = vpop.f32.mrb[29].mxu1 }
 0x4fd   :  { %v6920_v62 = vadd.f32 %v6919_v10, %v6823_v52  ;;  %v9030_v9 = vpop.f32.mrb[30].mxu1 }
 0x4fe   :  { %v6972_v49 = vmax.f32 %v6928_v0, 0.0  ;;  %v6931_v32 = vadd.f32 %v9030_v9, %v6834_v47  ;;  %v6922_v58 = vpop.f32.mrb[31].mxu1 }
 0x4ff   :  { %v6970_v48 = vmax.f32 %v6920_v62, 0.0  ;;  %v6923_v63 = vadd.f32 %v6922_v58, %v6826_v46  ;;  %v9411_v62 = vld [vmem:[%s12368_s2 + $0xc8] sm:$0xff]   ;;  %v7097_v46 = vld [vmem:[%s12371_s1] sm:$0xff] }
 0x500   :  { %v6984_v57 = vmax.f32 %v6968_v6, %v6972_v49  ;;  %v6973_v21 = vmax.f32 %v6931_v32, 0.0  ;;  %v7098_v6 = vpack.c.bf16 %v7097_v46, %v7097_v46  ;;  %v9412_v49 = vld [vmem:[%s12368_s2 + $0xb8] sm:$0xff]   ;;  %v9413_v32 = vld [vmem:[%s12368_s2 + $0xc0] sm:$0xff]  }
 0x501   :  { %v6982_v38 = vmax.f32 %v6966_v39, %v6970_v48  ;;  %v6971_v1 = vmax.f32 %v6923_v63, 0.0  ;;  %v8033_v58 = vld [vmem:[%s12370_s3 + $0x1] ss:$0 sm:$0xff] }
 0x502   :  { %v6985_v40 = vmax.f32 %v6969_v8, %v6973_v21 }
 0x503   :  { %v6983_v52 = vmax.f32 %v6967_v37, %v6971_v1  ;;  %v9033_v24 = vpop.f32.mrb[32].mxu1  ;;  %v9414_v37 = vld [vmem:[%s12368_s2 + $0xd0] sm:$0xff]  }
 0x504   :  { %v6944_v29 = vadd.f32 %v9033_v24, %v6847_v26  ;;  %v6935_v54 = vpop.f32.mrb[33].mxu1 }
 0x505   :  { %v6936_v36 = vadd.f32 %v6935_v54, %v6839_v3  ;;  %v9034_v45 = vpop.f32.mrb[34].mxu1  ;;  %v6866_v3 = vadd.f32 %v8410_v33, %v12262_v12  ;;  %v9417_v54 = vld [vmem:[%s12368_s2 + $0xe8] sm:$0xff]  }
 0x506   :  { %v6947_v27 = vadd.f32 %v9034_v45, %v6850_v13  ;;  %v6938_v35 = vpop.f32.mrb[35].mxu1  ;;  %v6976_v2 = vmax.f32 %v6944_v29, 0.0  ;;  %v9416_v29 = vld [vmem:[%s12368_s2 + $0xe0] sm:$0xff]  }
 0x507   :  { %v6939_v53 = vadd.f32 %v6938_v35, %v6842_v4  ;;  %v6974_v31 = vmax.f32 %v6936_v36, 0.0  ;;  %v8044_v36 = vld [vmem:[%s12370_s3 + $0x2] ss:$0 sm:$0xff] }
 0x508   :  { %v6977_v22 = vmax.f32 %v6947_v27, 0.0 }
 0x509   :  { %v6975_v33 = vmax.f32 %v6939_v53, 0.0 }
 0x50b   :  { %v9037_v34 = vpop.f32.mrb[36].mxu1 }
 0x50c   :  { %v6960_v59 = vadd.f32 %v9037_v34, %v6863_v25  ;;  %v6951_v5 = vpop.f32.mrb[37].mxu1  ;;  %v9418_v25 = vld [vmem:[%s12368_s2 + $0xf0] sm:$0xff]  }
 0x50d   :  { %v6952_v19 = vadd.f32 %v6951_v5, %v6855_v14  ;;  %v9038_v16 = vpop.f32.mrb[38].mxu1  ;;  %v8045_v5 = vld [vmem:[%s12370_s3 + $0x3] ss:$0 sm:$0xff] }
 0x50e   :  { %v6980_v55 = vmax.f32 %v6960_v59, 0.0  ;;  %v6963_v60 = vadd.f32 %v9038_v16, %v6866_v3  ;;  %v6954_v28 = vpop.f32.mrb[39].mxu1  ;;  %v9419_v59 = vld [vmem:[%s12368_s2 + $0xf8] sm:$0xff]  }
 0x50f   :  { %v6978_v56 = vmax.f32 %v6952_v19, 0.0  ;;  %v6955_v61 = vadd.f32 %v6954_v28, %v6858_v20 }
 0x510   :  { %v6988_v51 = vmax.f32 %v6976_v2, %v6980_v55  ;;  %v6981_v17 = vmax.f32 %v6963_v60, 0.0  ;;  %v9420_v60 = vld [vmem:[%s12368_s2 + $0x100] sm:$0xff]  }
 0x511   :  { %v6986_v14 = vmax.f32 %v6974_v31, %v6978_v56  ;;  %v6979_v44 = vmax.f32 %v6955_v61, 0.0  ;;  %v8051_v31 = vld [vmem:[%s12370_s3 + $0x4] ss:$0 sm:$0xff] }
 0x512   :  { %v6989_v23 = vmax.f32 %v6977_v22, %v6981_v17  ;;  %v6992_v43 = vmax.f32 %v6984_v57, %v6988_v51 }
 0x513   :  { %v6990_v12 = vmax.f32 %v6982_v38, %v6986_v14  ;;  %v6987_v42 = vmax.f32 %v6975_v33, %v6979_v44  ;;  %v7417_v44 = vlaneseq }
 0x514   :  { %6999 = vrot.lane.b32.xlu1 %v6992_v43, %s9422_s0  ;;  %v6993_v41 = vmax.f32 %v6985_v40, %v6989_v23  ;;  %v9415_v40 = vld [vmem:[%s12368_s2 + $0xd8] sm:$0xff]   ;;  %v8055_v23 = vld [vmem:[%s12370_s3 + $0x5] ss:$0 sm:$0xff] }
 0x515   :  { %v6991_v11 = vmax.f32 %v6983_v52, %v6987_v42 }
 0x517   :  { %6995 = vrot.lane.b32.xlu0 %v6991_v11, %s9426_s17 }
 0x51b   :  { %7003 = vrot.lane.b32.xlu0 %v6993_v41, %s9427_s18 }
 0x586   :  { %v7000_v50 = vpop.permute.xlu1 %6999 }
 0x589   :  { %v6996_v7 = vpop.permute.xlu0 %6995 }
 0x58a   :  { %v7006_v18 = vsel %vm2042_vm0, %v6990_v12, %v6996_v7 }
 0x58b   :  { %v7007_v10 = vsel %vm6468_vm1, %v7006_v18, %v7000_v50 }
 0x58d   :  { %v7004_v0 = vpop.permute.xlu0 %7003 }
 0x58e   :  { %v7009_v47 = vsel %vm7008_vm5, %v7007_v10, %v7004_v0 }
 0x58f   :  { %v7010_v9 = vpack.c.bf16 %v7009_v47, %v7009_v47 }
 0x591   :  { %9048 = vmatmul.mubr.msk.bf16.vlgmr.msra.gmra.mrb[40].mxu1 %vm6493_vm2, %v7010_v9 }
 0x592   :  { %9052 = vmatpush3.bf16.msra.mxu1 %v9411_v62  ;;  %9053 = vmatprep.mubr.msk.bf16.mxu1 %vm9425_vm4, %v9424_v15 }
 0x593   :  { %9057 = vmatprep.subr.bf16.mxu1 %v9424_v15 }
 0x599   :  { %9054 = vmatmul.mubr.msk.bf16.vlgmr.msra.gmra.mrb[44].mxu1 %vm2042_vm0, %v7098_v6 }
 0x59a   :  { %9058 = vmatpush3.bf16.msra.mxu1 %v9412_v49  ;;  %9061 = vmatprep.mubr.msk.bf16.mxu1 %vm9425_vm4, %v9424_v15 }
 0x59b   :  { %9059 = vmatprep.subr.bf16.mxu1 %v9424_v15 }
 0x59e   :  { %9060 = vmatpush3.bf16.msra.mxu1 %v9413_v32 }
 0x59f   :  { %9065 = vmatprep.subr.bf16.mxu1 %v9424_v15 }
 0x664   :  { %v7085_v39 = vpop.f32.mrb[40].mxu1 }
 0x665   :  { %v7086_v48 = vadd.f32 %v8033_v58, %v7085_v39  ;;  %v9049_v63 = vpop.f32.mrb[41].mxu1 }
 0x666   :  { %v7088_v8 = vpop.f32.mrb[42].mxu1 }
 0x667   :  { %v7091_v57 = vmax.f32 %v7086_v48, 0.0  ;;  %v9050_v21 = vpop.f32.mrb[43].mxu1 }
 0x669   :  { %v7092_v38 = vpack.c.bf16 %v7091_v57, %v7091_v57 }
 0x66b   :  { %9062 = vmatmul.mubr.msk.bf16.vlgmr.msra.gmra.mrb[48].mxu1 %vm6468_vm1, %v7092_v38 }
 0x66c   :  { %v7144_v1 = vpop.f32.mrb[44].mxu1  ;;  %9066 = vmatpush3.bf16.msra.mxu1 %v9414_v37  ;;  %9073 = vmatprep.mubr.msk.bf16.mxu1 %vm9425_vm4, %v9424_v15 }
 0x66d   :  { %v9055_v26 = vpop.f32.mrb[45].mxu1  ;;  %9067 = vmatprep.subr.bf16.mxu1 %v9424_v15 }
 0x66e   :  { %v7147_v52 = vpop.f32.mrb[46].mxu1 }
 0x66f   :  { %v9056_v24 = vpop.f32.mrb[47].mxu1 }
 0x670   :  { %9068 = vmatpush3.bf16.msra.mxu1 %v9415_v40 }
 0x671   :  { %9069 = vmatprep.subr.bf16.mxu1 %v9424_v15 }
 0x674   :  { %9070 = vmatpush3.bf16.msra.mxu1 %v9416_v29 }
 0x675   :  { %9071 = vmatprep.subr.bf16.mxu1 %v9424_v15 }
 0x678   :  { %9072 = vmatpush3.bf16.msra.mxu1 %v9417_v54 }
 0x679   :  { %9077 = vmatprep.subr.bf16.mxu1 %v9424_v15 }
 0x73e   :  { %v7199_v13 = vpop.f32.mrb[48].mxu1 }
 0x73f   :  { %v7200_v45 = vadd.f32 %v7199_v13, %v7144_v1  ;;  %v9063_v4 = vpop.f32.mrb[49].mxu1 }
 0x740   :  { %v7202_v27 = vpop.f32.mrb[50].mxu1 }
 0x741   :  { %v7210_v35 = vadd.f32 %v8044_v36, %v7200_v45  ;;  %v9064_v30 = vpop.f32.mrb[51].mxu1 }
 0x743   :  { %v7211_v53 = vmax.f32 %v7210_v35, 0.0 }
 0x745   :  { %v7212_v34 = vpack.c.bf16 %v7211_v53, %v7211_v53 }
 0x747   :  { %9074 = vmatmul.mubr.msk.bf16.vlgmr.msra.gmra.mrb[52].mxu1 %vm6493_vm2, %v7212_v34 }
 0x748   :  { %9078 = vmatpush3.bf16.msra.mxu1 %v9418_v25  ;;  %9081 = vmatprep.mubr.msk.bf16.mxu1 %vm9425_vm4, %v9424_v15 }
 0x749   :  { %9079 = vmatprep.subr.bf16.mxu1 %v9424_v15 }
 0x74c   :  { %9080 = vmatpush3.bf16.msra.mxu1 %v9419_v59 }
 0x74d   :  { %9085 = vmatprep.subr.bf16.mxu1 %v9424_v15 }
 0x81a   :  { %v7287_v3 = vpop.f32.mrb[52].mxu1 }
 0x81b   :  { %v7288_v19 = vadd.f32 %v8045_v5, %v7287_v3  ;;  %v9075_v16 = vpop.f32.mrb[53].mxu1 }
 0x81c   :  { %v7290_v20 = vpop.f32.mrb[54].mxu1 }
 0x81d   :  { %v7293_v2 = vmax.f32 %v7288_v19, 0.0  ;;  %v9076_v55 = vpop.f32.mrb[55].mxu1 }
 0x81f   :  { %v7294_v28 = vpack.c.bf16 %v7293_v2, %v7293_v2 }
 0x821   :  { %9082 = vmatmul.mubr.msk.bf16.vlgmr.msra.gmra.mrb[56].mxu1 %vm6468_vm1, %v7294_v28 }
 0x822   :  { %9086 = vmatpush3.bf16.msra.mxu1 %v9420_v60  ;;  %9087 = vmatprep.mubr.msk.bf16.mxu1 %vm9425_vm4, %v9424_v15  ;;  %v7418_v15 = vand.u32 127, %v7417_v44 }
 0x824   :  { %vm7421_vm6 = vcmp.ge.s32.totalorder %v7418_v15, 2 }
 0x8f4   :  { %v7353_v56 = vpop.f32.mrb[56].mxu1 }
 0x8f5   :  { %v7354_v61 = vadd.f32 %v8051_v31, %v7353_v56  ;;  %v9083_v22 = vpop.f32.mrb[57].mxu1 }
 0x8f6   :  { %v7356_v51 = vpop.f32.mrb[58].mxu1 }
 0x8f7   :  { %v7359_v17 = vmax.f32 %v7354_v61, 0.0  ;;  %v9084_v33 = vpop.f32.mrb[59].mxu1 }
 0x8f9   :  { %v7360_v14 = vpack.c.bf16 %v7359_v17, %v7359_v17 }
 0x8fb   :  { %9088 = vmatmul.mubr.msk.bf16.vlgmr.msra.gmra.mrb[60].mxu1 %vm2042_vm0, %v7360_v14 }
 0x9ce   :  { %v7411_v43 = vpop.f32.mrb[60].mxu1 }
 0x9cf   :  { %v7412_v12 = vadd.f32 %v8055_v23, %v7411_v43  ;;  %v9089_v42 = vpop.f32.mrb[61].mxu1 }
 0x9d0   :  { %v7414_v41 = vpop.f32.mrb[62].mxu1 }
 0x9d1   :  { %v7419_v11 = vmax.f32 %v7412_v12, -20.0  ;;  %v9090_v7 = vpop.f32.mrb[63].mxu1 }
 0x9d3   :  { %v7420_v18 = vmin.f32 %v7419_v11, 2.0 }
 0x9d5   :  { %v7422_v50 = vsel %vm7421_vm6, %v7420_v18, %v7412_v12 }
 0x9d6   :  { %7424 = vst.msk [vmem:[%s12372_s4] sm:$0xff] %vm7423_vm7, %v7422_v50 }

</bundles_post_ra>
